<compile_context>
chip_gen: v7x
topology: tpu7x:2x2x1
jax: 0.10.0
libtpu: 0.0.40
codegen_flags: <defaults>
</compile_context>

<pallas_src>
import functools

import jax
import jax.numpy as jnp
import numpy as np
from jax.experimental import pallas as pl
from jax.experimental.pallas import tpu as pltpu


# ---------------------------------------------------------------------------
# Fused Res kernel: one batch element per grid step.
# ---------------------------------------------------------------------------
def _res_kernel(x_ref, w1_ref, b1_ref, w2_ref, b2_ref,
                sw1_ref, sb1_ref, sw2_ref, sb2_ref,
                o_ref, xpad_ref, *, H, W, C):
    """x_ref/o_ref: (1, H, W, C).  wX_ref: (3, 3, C, C) HWIO.  bX_ref: (1, C).
    sw1_ref: (C, Cr), sb1_ref: (1, Cr), sw2_ref: (Cr, C), sb2_ref: (1, C).
    xpad_ref: (H+2, W+2, C) f32 VMEM scratch for reflection padding."""

    def reflect_pad(img):
        # img: (H, W, C) f32 value -> fills xpad_ref with ReflectionPad2d(1).
        xpad_ref[1:H + 1, 1:W + 1, :] = img
        xpad_ref[0:1, 1:W + 1, :] = img[1:2, :, :]              # top    <- row 1
        xpad_ref[H + 1:H + 2, 1:W + 1, :] = img[H - 2:H - 1, :, :]  # bottom <- row H-2
        xpad_ref[:, 0:1, :] = xpad_ref[:, 2:3, :]               # left   <- col 1
        xpad_ref[:, W + 1:W + 2, :] = xpad_ref[:, W - 1:W, :]   # right  <- col W-2

    def conv3x3(img, w_ref, b_ref):
        # img: (H, W, C) f32 -> (H*W, C) f32; 9 shifted MXU matmuls.
        reflect_pad(img)
        acc = jnp.zeros((H * W, C), jnp.float32)
        for dy in range(3):
            for dx in range(3):
                patch = xpad_ref[dy:dy + H, dx:dx + W, :]        # (H, W, C)
                acc = acc + jnp.dot(
                    patch.reshape(H * W, C),
                    w_ref[dy, dx, :, :].astype(jnp.float32),
                    preferred_element_type=jnp.float32)
        return acc + b_ref[...].astype(jnp.float32)

    x = x_ref[0, :, :, :].astype(jnp.float32)                    # (H, W, C)

    h = conv3x3(x, w1_ref, b1_ref)                               # conv1
    h = jnp.maximum(h, 0.2 * h)                                  # LeakyReLU(0.2)
    h = conv3x3(h.reshape(H, W, C), w2_ref, b2_ref)              # conv2, (H*W, C)

    # --- SELayer: global average pool -> 1x1 conv -> ReLU -> 1x1 conv -> sigmoid
    pooled = jnp.mean(h, axis=0, keepdims=True)                  # (1, C)
    z = jnp.dot(pooled, sw1_ref[...].astype(jnp.float32),
                preferred_element_type=jnp.float32) + sb1_ref[...]
    z = jnp.maximum(z, 0.0)                                      # ReLU
    g = jnp.dot(z, sw2_ref[...].astype(jnp.float32),
                preferred_element_type=jnp.float32) + sb2_ref[...]
    gate = 1.0 / (1.0 + jnp.exp(-g))                             # sigmoid, (1, C)

    out = h * gate + x.reshape(H * W, C)                         # SE scale + residual
    o_ref[0, :, :, :] = out.reshape(H, W, C).astype(o_ref.dtype)


# ---------------------------------------------------------------------------
# Wrappers
# ---------------------------------------------------------------------------
def res_forward_nhwc(x, w1, b1, w2, b2, se_w1, se_b1, se_w2, se_b2):
    """Res forward on NHWC input.

    x: (N, H, W, C).  w1/w2: (3, 3, C, C) HWIO.  b1/b2: (C,).
    se_w1: (C, Cr), se_b1: (Cr,), se_w2: (Cr, C), se_b2: (C,)."""
    N, H, W, C = x.shape
    Cr = se_w1.shape[1]

    b1 = b1.reshape(1, C).astype(jnp.float32)
    b2 = b2.reshape(1, C).astype(jnp.float32)
    se_b1 = se_b1.reshape(1, Cr).astype(jnp.float32)
    se_b2 = se_b2.reshape(1, C).astype(jnp.float32)

    kernel = functools.partial(_res_kernel, H=H, W=W, C=C)

    def full(shape):
        return pl.BlockSpec(shape, lambda n, _s=len(shape): (0,) * _s)

    return pl.pallas_call(
        kernel,
        out_shape=jax.ShapeDtypeStruct((N, H, W, C), x.dtype),
        grid_spec=pltpu.PrefetchScalarGridSpec(
            num_scalar_prefetch=0,
            grid=(N,),
            in_specs=[
                pl.BlockSpec((1, H, W, C), lambda n: (n, 0, 0, 0)),  # x
                full((3, 3, C, C)),                                  # w1
                full((1, C)),                                        # b1
                full((3, 3, C, C)),                                  # w2
                full((1, C)),                                        # b2
                full((C, Cr)),                                       # se_w1 (x @ W form)
                full((1, Cr)),                                       # se_b1
                full((Cr, C)),                                       # se_w2
                full((1, C)),                                        # se_b2
            ],
            out_specs=pl.BlockSpec((1, H, W, C), lambda n: (n, 0, 0, 0)),
            scratch_shapes=[pltpu.VMEM((H + 2, W + 2, C), jnp.float32)],
        ),
        compiler_params=pltpu.CompilerParams(
            dimension_semantics=("parallel",),
        ),
    )(x, w1, b1, w2, b2, se_w1, se_b1, se_w2, se_b2)


@jax.jit
def res_forward_nchw(x_nchw, params):
    """PyTorch-layout entry point.  params use torch layouts:
    w1/w2: (Cout, Cin, 3, 3); b: (C,); se_w1: (Cr, C); se_w2: (C, Cr)."""
    x = jnp.transpose(x_nchw, (0, 2, 3, 1))                 # NCHW -> NHWC
    w1 = jnp.transpose(params["w1"], (2, 3, 1, 0))          # OIHW -> HWIO
    w2 = jnp.transpose(params["w2"], (2, 3, 1, 0))
    out = res_forward_nhwc(
        x, w1, params["b1"], w2, params["b2"],
        params["se_w1"].T, params["se_b1"], params["se_w2"].T, params["se_b2"])
    return jnp.transpose(out, (0, 3, 1, 2))                 # NHWC -> NCHW


# ---------------------------------------------------------------------------
# Pure-JAX reference (mirrors the PyTorch module, NCHW)
# ---------------------------------------------------------------------------
def res_reference_nchw(x, p):
    def conv3x3(inp, w, b):
        inp_p = jnp.pad(inp, ((0, 0), (0, 0), (1, 1), (1, 1)), mode="reflect")
        out = jax.lax.conv_general_dilated(
            inp_p, w, window_strides=(1, 1), padding="VALID",
            dimension_numbers=("NCHW", "OIHW", "NCHW"),
            precision=jax.lax.Precision.HIGHEST)
        return out + b.reshape(1, -1, 1, 1)

    h = conv3x3(x, p["w1"], p["b1"])
    h = jnp.where(h >= 0, h, 0.2 * h)                        # LeakyReLU(0.2)
    h = conv3x3(h, p["w2"], p["b2"])
    pooled = jnp.mean(h, axis=(2, 3))                        # (N, C)
    z = jnp.maximum(pooled @ p["se_w1"].T + p["se_b1"], 0.0)
    gate = jax.nn.sigmoid(z @ p["se_w2"].T + p["se_b2"])     # (N, C)
    return h * gate[:, :, None, None] + x


# ---------------------------------------------------------------------------
# Main
# ---------------------------------------------------------------------------
if __name__ == "__main__":
    key = jax.random.PRNGKey(0)
    N, C, H, W = 2, 32, 16, 16         # n_feat = 32  ->  SE bottleneck C//16 = 2
    Cr = C // 16
    keys = jax.random.split(key, 9)

    s_conv = 1.0 / np.sqrt(9 * C)
    x = jax.random.normal(keys[0], (N, C, H, W), jnp.float32)
    params = dict(
        w1=jax.random.normal(keys[1], (C, C, 3, 3), jnp.float32) * s_conv,
        b1=jax.random.normal(keys[2], (C,), jnp.float32) * 0.1,
        w2=jax.random.normal(keys[3], (C, C, 3, 3), jnp.float32) * s_conv,
        b2=jax.random.normal(keys[4], (C,), jnp.float32) * 0.1,
        se_w1=jax.random.normal(keys[5], (Cr, C), jnp.float32) * (1.0 / np.sqrt(C)),
        se_b1=jax.random.normal(keys[6], (Cr,), jnp.float32) * 0.1,
        se_w2=jax.random.normal(keys[7], (C, Cr), jnp.float32) * (1.0 / np.sqrt(Cr)),
        se_b2=jax.random.normal(keys[8], (C,), jnp.float32) * 0.1,
    )

    out = res_forward_nchw(x, params)
    out = jax.block_until_ready(out)

    ref = res_reference_nchw(x, params)
    max_err = jnp.max(jnp.abs(out - ref))
    assert out.shape == x.shape, f"shape mismatch: {out.shape} vs {x.shape}"
    assert jnp.allclose(out, ref, atol=5e-3, rtol=5e-3), f"max abs err {max_err}"

    print("KERNEL_OK")
</pallas_src>

<mosaic_0001>
module attributes {stable_mosaic.version = 11 : i64} {
  func.func @_res_kernel(%arg0: i32, %arg1: memref<1x16x16x32xf32, #tpu.memory_space<vmem>>, %arg2: memref<3x3x32x32xf32, #tpu.memory_space<vmem>>, %arg3: memref<1x32xf32, #tpu.memory_space<vmem>>, %arg4: memref<3x3x32x32xf32, #tpu.memory_space<vmem>>, %arg5: memref<1x32xf32, #tpu.memory_space<vmem>>, %arg6: memref<32x2xf32, #tpu.memory_space<vmem>>, %arg7: memref<1x2xf32, #tpu.memory_space<vmem>>, %arg8: memref<2x32xf32, #tpu.memory_space<vmem>>, %arg9: memref<1x32xf32, #tpu.memory_space<vmem>>, %arg10: memref<1x16x16x32xf32, #tpu.memory_space<vmem>>, %arg11: memref<18x18x32xf32, #tpu.memory_space<vmem>>) attributes {dimension_semantics = [#tpu.dimension_semantics<parallel>], iteration_bounds = array<i64: 2>, scalar_prefetch = 0 : i64, scratch_operands = 1 : i64, tpu.core_type = #tpu.core_type<tc>, window_params = [{transform_indices = @transform_0, window_bounds = array<i64: 1, 16, 16, 32>}, {pipeline_mode = #tpu.pipeline_mode<synchronous>, transform_indices = @transform_1, window_bounds = array<i64: 3, 3, 32, 32>}, {pipeline_mode = #tpu.pipeline_mode<synchronous>, transform_indices = @transform_2, window_bounds = array<i64: 1, 32>}, {pipeline_mode = #tpu.pipeline_mode<synchronous>, transform_indices = @transform_3, window_bounds = array<i64: 3, 3, 32, 32>}, {pipeline_mode = #tpu.pipeline_mode<synchronous>, transform_indices = @transform_4, window_bounds = array<i64: 1, 32>}, {pipeline_mode = #tpu.pipeline_mode<synchronous>, transform_indices = @transform_5, window_bounds = array<i64: 32, 2>}, {pipeline_mode = #tpu.pipeline_mode<synchronous>, transform_indices = @transform_6, window_bounds = array<i64: 1, 2>}, {pipeline_mode = #tpu.pipeline_mode<synchronous>, transform_indices = @transform_7, window_bounds = array<i64: 2, 32>}, {pipeline_mode = #tpu.pipeline_mode<synchronous>, transform_indices = @transform_8, window_bounds = array<i64: 1, 32>}, {transform_indices = @transform_9, window_bounds = array<i64: 1, 16, 16, 32>}]} {
    %c0 = arith.constant 0 : index
    %c0_0 = arith.constant 0 : index
    %c0_1 = arith.constant 0 : index
    %c0_2 = arith.constant 0 : index
    %0 = vector.load %arg1[%c0, %c0_0, %c0_1, %c0_2] : memref<1x16x16x32xf32, #tpu.memory_space<vmem>>, vector<1x16x16x32xf32>
    %1 = vector.shape_cast %0 : vector<1x16x16x32xf32> to vector<16x16x32xf32>
    %c1 = arith.constant 1 : index
    %c1_3 = arith.constant 1 : index
    %c0_4 = arith.constant 0 : index
    %2 = vector.load %arg11[%c1, %c1_3, %c0_4] : memref<18x18x32xf32, #tpu.memory_space<vmem>>, vector<16x16x32xf32>
    tpu.vector_store %arg11[%c1, %c1_3, %c0_4], %1 {strides = array<i32>} : memref<18x18x32xf32, #tpu.memory_space<vmem>>, vector<16x16x32xf32>,
    %3 = vector.extract_strided_slice %1 {offsets = [1, 0, 0], sizes = [1, 16, 32], strides = [1, 1, 1]} : vector<16x16x32xf32> to vector<1x16x32xf32>
    %c0_5 = arith.constant 0 : index
    %c1_6 = arith.constant 1 : index
    %c0_7 = arith.constant 0 : index
    %4 = vector.load %arg11[%c0_5, %c1_6, %c0_7] : memref<18x18x32xf32, #tpu.memory_space<vmem>>, vector<1x16x32xf32>
    tpu.vector_store %arg11[%c0_5, %c1_6, %c0_7], %3 {strides = array<i32>} : memref<18x18x32xf32, #tpu.memory_space<vmem>>, vector<1x16x32xf32>,
    %5 = vector.extract_strided_slice %1 {offsets = [14, 0, 0], sizes = [1, 16, 32], strides = [1, 1, 1]} : vector<16x16x32xf32> to vector<1x16x32xf32>
    %c17 = arith.constant 17 : index
    %c1_8 = arith.constant 1 : index
    %c0_9 = arith.constant 0 : index
    %6 = vector.load %arg11[%c17, %c1_8, %c0_9] : memref<18x18x32xf32, #tpu.memory_space<vmem>>, vector<1x16x32xf32>
    tpu.vector_store %arg11[%c17, %c1_8, %c0_9], %5 {strides = array<i32>} : memref<18x18x32xf32, #tpu.memory_space<vmem>>, vector<1x16x32xf32>,
    %c0_10 = arith.constant 0 : index
    %c2 = arith.constant 2 : index
    %c0_11 = arith.constant 0 : index
    %7 = vector.load %arg11[%c0_10, %c2, %c0_11] : memref<18x18x32xf32, #tpu.memory_space<vmem>>, vector<18x1x32xf32>
    %c0_12 = arith.constant 0 : index
    %c0_13 = arith.constant 0 : index
    %c0_14 = arith.constant 0 : index
    %8 = vector.load %arg11[%c0_12, %c0_13, %c0_14] : memref<18x18x32xf32, #tpu.memory_space<vmem>>, vector<18x1x32xf32>
    tpu.vector_store %arg11[%c0_12, %c0_13, %c0_14], %7 {strides = array<i32>} : memref<18x18x32xf32, #tpu.memory_space<vmem>>, vector<18x1x32xf32>,
    %c0_15 = arith.constant 0 : index
    %c15 = arith.constant 15 : index
    %c0_16 = arith.constant 0 : index
    %9 = vector.load %arg11[%c0_15, %c15, %c0_16] : memref<18x18x32xf32, #tpu.memory_space<vmem>>, vector<18x1x32xf32>
    %c0_17 = arith.constant 0 : index
    %c17_18 = arith.constant 17 : index
    %c0_19 = arith.constant 0 : index
    %10 = vector.load %arg11[%c0_17, %c17_18, %c0_19] : memref<18x18x32xf32, #tpu.memory_space<vmem>>, vector<18x1x32xf32>
    tpu.vector_store %arg11[%c0_17, %c17_18, %c0_19], %9 {strides = array<i32>} : memref<18x18x32xf32, #tpu.memory_space<vmem>>, vector<18x1x32xf32>,
    %cst = arith.constant 0.000000e+00 : f32
    %11 = vector.broadcast %cst : f32 to vector<256x32xf32>
    %c0_20 = arith.constant 0 : index
    %c0_21 = arith.constant 0 : index
    %c0_22 = arith.constant 0 : index
    %12 = vector.load %arg11[%c0_20, %c0_21, %c0_22] : memref<18x18x32xf32, #tpu.memory_space<vmem>>, vector<16x16x32xf32>
    %13 = vector.shape_cast %12 : vector<16x16x32xf32> to vector<256x32xf32>
    %c0_23 = arith.constant 0 : index
    %c0_24 = arith.constant 0 : index
    %c0_25 = arith.constant 0 : index
    %c0_26 = arith.constant 0 : index
    %14 = vector.load %arg2[%c0_23, %c0_24, %c0_25, %c0_26] : memref<3x3x32x32xf32, #tpu.memory_space<vmem>>, vector<1x1x32x32xf32>
    %15 = vector.shape_cast %14 : vector<1x1x32x32xf32> to vector<32x32xf32>
    %cst_27 = arith.constant dense<0.000000e+00> : vector<256x32xf32>
    %16 = tpu.matmul %13, %15, %cst_27 {dimension_numbers = #tpu.dot_dimension_numbers<[1], [0], [0], [1], [0, 0, 1, 1], [], []>} : vector<256x32xf32>, vector<32x32xf32>, vector<256x32xf32> -> vector<256x32xf32>
    %17 = arith.addf %11, %16 : vector<256x32xf32>
    %c0_28 = arith.constant 0 : index
    %c1_29 = arith.constant 1 : index
    %c0_30 = arith.constant 0 : index
    %18 = vector.load %arg11[%c0_28, %c1_29, %c0_30] : memref<18x18x32xf32, #tpu.memory_space<vmem>>, vector<16x16x32xf32>
    %19 = vector.shape_cast %18 : vector<16x16x32xf32> to vector<256x32xf32>
    %c0_31 = arith.constant 0 : index
    %c1_32 = arith.constant 1 : index
    %c0_33 = arith.constant 0 : index
    %c0_34 = arith.constant 0 : index
    %20 = vector.load %arg2[%c0_31, %c1_32, %c0_33, %c0_34] : memref<3x3x32x32xf32, #tpu.memory_space<vmem>>, vector<1x1x32x32xf32>
    %21 = vector.shape_cast %20 : vector<1x1x32x32xf32> to vector<32x32xf32>
    %cst_35 = arith.constant dense<0.000000e+00> : vector<256x32xf32>
    %22 = tpu.matmul %19, %21, %cst_35 {dimension_numbers = #tpu.dot_dimension_numbers<[1], [0], [0], [1], [0, 0, 1, 1], [], []>} : vector<256x32xf32>, vector<32x32xf32>, vector<256x32xf32> -> vector<256x32xf32>
    %23 = arith.addf %17, %22 : vector<256x32xf32>
    %c0_36 = arith.constant 0 : index
    %c2_37 = arith.constant 2 : index
    %c0_38 = arith.constant 0 : index
    %24 = vector.load %arg11[%c0_36, %c2_37, %c0_38] : memref<18x18x32xf32, #tpu.memory_space<vmem>>, vector<16x16x32xf32>
    %25 = vector.shape_cast %24 : vector<16x16x32xf32> to vector<256x32xf32>
    %c0_39 = arith.constant 0 : index
    %c2_40 = arith.constant 2 : index
    %c0_41 = arith.constant 0 : index
    %c0_42 = arith.constant 0 : index
    %26 = vector.load %arg2[%c0_39, %c2_40, %c0_41, %c0_42] : memref<3x3x32x32xf32, #tpu.memory_space<vmem>>, vector<1x1x32x32xf32>
    %27 = vector.shape_cast %26 : vector<1x1x32x32xf32> to vector<32x32xf32>
    %cst_43 = arith.constant dense<0.000000e+00> : vector<256x32xf32>
    %28 = tpu.matmul %25, %27, %cst_43 {dimension_numbers = #tpu.dot_dimension_numbers<[1], [0], [0], [1], [0, 0, 1, 1], [], []>} : vector<256x32xf32>, vector<32x32xf32>, vector<256x32xf32> -> vector<256x32xf32>
    %29 = arith.addf %23, %28 : vector<256x32xf32>
    %c1_44 = arith.constant 1 : index
    %c0_45 = arith.constant 0 : index
    %c0_46 = arith.constant 0 : index
    %30 = vector.load %arg11[%c1_44, %c0_45, %c0_46] : memref<18x18x32xf32, #tpu.memory_space<vmem>>, vector<16x16x32xf32>
    %31 = vector.shape_cast %30 : vector<16x16x32xf32> to vector<256x32xf32>
    %c1_47 = arith.constant 1 : index
    %c0_48 = arith.constant 0 : index
    %c0_49 = arith.constant 0 : index
    %c0_50 = arith.constant 0 : index
    %32 = vector.load %arg2[%c1_47, %c0_48, %c0_49, %c0_50] : memref<3x3x32x32xf32, #tpu.memory_space<vmem>>, vector<1x1x32x32xf32>
    %33 = vector.shape_cast %32 : vector<1x1x32x32xf32> to vector<32x32xf32>
    %cst_51 = arith.constant dense<0.000000e+00> : vector<256x32xf32>
    %34 = tpu.matmul %31, %33, %cst_51 {dimension_numbers = #tpu.dot_dimension_numbers<[1], [0], [0], [1], [0, 0, 1, 1], [], []>} : vector<256x32xf32>, vector<32x32xf32>, vector<256x32xf32> -> vector<256x32xf32>
    %35 = arith.addf %29, %34 : vector<256x32xf32>
    %c1_52 = arith.constant 1 : index
    %c1_53 = arith.constant 1 : index
    %c0_54 = arith.constant 0 : index
    %36 = vector.load %arg11[%c1_52, %c1_53, %c0_54] : memref<18x18x32xf32, #tpu.memory_space<vmem>>, vector<16x16x32xf32>
    %37 = vector.shape_cast %36 : vector<16x16x32xf32> to vector<256x32xf32>
    %c1_55 = arith.constant 1 : index
    %c1_56 = arith.constant 1 : index
    %c0_57 = arith.constant 0 : index
    %c0_58 = arith.constant 0 : index
    %38 = vector.load %arg2[%c1_55, %c1_56, %c0_57, %c0_58] : memref<3x3x32x32xf32, #tpu.memory_space<vmem>>, vector<1x1x32x32xf32>
    %39 = vector.shape_cast %38 : vector<1x1x32x32xf32> to vector<32x32xf32>
    %cst_59 = arith.constant dense<0.000000e+00> : vector<256x32xf32>
    %40 = tpu.matmul %37, %39, %cst_59 {dimension_numbers = #tpu.dot_dimension_numbers<[1], [0], [0], [1], [0, 0, 1, 1], [], []>} : vector<256x32xf32>, vector<32x32xf32>, vector<256x32xf32> -> vector<256x32xf32>
    %41 = arith.addf %35, %40 : vector<256x32xf32>
    %c1_60 = arith.constant 1 : index
    %c2_61 = arith.constant 2 : index
    %c0_62 = arith.constant 0 : index
    %42 = vector.load %arg11[%c1_60, %c2_61, %c0_62] : memref<18x18x32xf32, #tpu.memory_space<vmem>>, vector<16x16x32xf32>
    %43 = vector.shape_cast %42 : vector<16x16x32xf32> to vector<256x32xf32>
    %c1_63 = arith.constant 1 : index
    %c2_64 = arith.constant 2 : index
    %c0_65 = arith.constant 0 : index
    %c0_66 = arith.constant 0 : index
    %44 = vector.load %arg2[%c1_63, %c2_64, %c0_65, %c0_66] : memref<3x3x32x32xf32, #tpu.memory_space<vmem>>, vector<1x1x32x32xf32>
    %45 = vector.shape_cast %44 : vector<1x1x32x32xf32> to vector<32x32xf32>
    %cst_67 = arith.constant dense<0.000000e+00> : vector<256x32xf32>
    %46 = tpu.matmul %43, %45, %cst_67 {dimension_numbers = #tpu.dot_dimension_numbers<[1], [0], [0], [1], [0, 0, 1, 1], [], []>} : vector<256x32xf32>, vector<32x32xf32>, vector<256x32xf32> -> vector<256x32xf32>
    %47 = arith.addf %41, %46 : vector<256x32xf32>
    %c2_68 = arith.constant 2 : index
    %c0_69 = arith.constant 0 : index
    %c0_70 = arith.constant 0 : index
    %48 = vector.load %arg11[%c2_68, %c0_69, %c0_70] : memref<18x18x32xf32, #tpu.memory_space<vmem>>, vector<16x16x32xf32>
    %49 = vector.shape_cast %48 : vector<16x16x32xf32> to vector<256x32xf32>
    %c2_71 = arith.constant 2 : index
    %c0_72 = arith.constant 0 : index
    %c0_73 = arith.constant 0 : index
    %c0_74 = arith.constant 0 : index
    %50 = vector.load %arg2[%c2_71, %c0_72, %c0_73, %c0_74] : memref<3x3x32x32xf32, #tpu.memory_space<vmem>>, vector<1x1x32x32xf32>
    %51 = vector.shape_cast %50 : vector<1x1x32x32xf32> to vector<32x32xf32>
    %cst_75 = arith.constant dense<0.000000e+00> : vector<256x32xf32>
    %52 = tpu.matmul %49, %51, %cst_75 {dimension_numbers = #tpu.dot_dimension_numbers<[1], [0], [0], [1], [0, 0, 1, 1], [], []>} : vector<256x32xf32>, vector<32x32xf32>, vector<256x32xf32> -> vector<256x32xf32>
    %53 = arith.addf %47, %52 : vector<256x32xf32>
    %c2_76 = arith.constant 2 : index
    %c1_77 = arith.constant 1 : index
    %c0_78 = arith.constant 0 : index
    %54 = vector.load %arg11[%c2_76, %c1_77, %c0_78] : memref<18x18x32xf32, #tpu.memory_space<vmem>>, vector<16x16x32xf32>
    %55 = vector.shape_cast %54 : vector<16x16x32xf32> to vector<256x32xf32>
    %c2_79 = arith.constant 2 : index
    %c1_80 = arith.constant 1 : index
    %c0_81 = arith.constant 0 : index
    %c0_82 = arith.constant 0 : index
    %56 = vector.load %arg2[%c2_79, %c1_80, %c0_81, %c0_82] : memref<3x3x32x32xf32, #tpu.memory_space<vmem>>, vector<1x1x32x32xf32>
    %57 = vector.shape_cast %56 : vector<1x1x32x32xf32> to vector<32x32xf32>
    %cst_83 = arith.constant dense<0.000000e+00> : vector<256x32xf32>
    %58 = tpu.matmul %55, %57, %cst_83 {dimension_numbers = #tpu.dot_dimension_numbers<[1], [0], [0], [1], [0, 0, 1, 1], [], []>} : vector<256x32xf32>, vector<32x32xf32>, vector<256x32xf32> -> vector<256x32xf32>
    %59 = arith.addf %53, %58 : vector<256x32xf32>
    %c2_84 = arith.constant 2 : index
    %c2_85 = arith.constant 2 : index
    %c0_86 = arith.constant 0 : index
    %60 = vector.load %arg11[%c2_84, %c2_85, %c0_86] : memref<18x18x32xf32, #tpu.memory_space<vmem>>, vector<16x16x32xf32>
    %61 = vector.shape_cast %60 : vector<16x16x32xf32> to vector<256x32xf32>
    %c2_87 = arith.constant 2 : index
    %c2_88 = arith.constant 2 : index
    %c0_89 = arith.constant 0 : index
    %c0_90 = arith.constant 0 : index
    %62 = vector.load %arg2[%c2_87, %c2_88, %c0_89, %c0_90] : memref<3x3x32x32xf32, #tpu.memory_space<vmem>>, vector<1x1x32x32xf32>
    %63 = vector.shape_cast %62 : vector<1x1x32x32xf32> to vector<32x32xf32>
    %cst_91 = arith.constant dense<0.000000e+00> : vector<256x32xf32>
    %64 = tpu.matmul %61, %63, %cst_91 {dimension_numbers = #tpu.dot_dimension_numbers<[1], [0], [0], [1], [0, 0, 1, 1], [], []>} : vector<256x32xf32>, vector<32x32xf32>, vector<256x32xf32> -> vector<256x32xf32>
    %65 = arith.addf %59, %64 : vector<256x32xf32>
    %c0_92 = arith.constant 0 : index
    %c0_93 = arith.constant 0 : index
    %66 = vector.load %arg3[%c0_92, %c0_93] : memref<1x32xf32, #tpu.memory_space<vmem>>, vector<1x32xf32>
    %67 = vector.broadcast %66 : vector<1x32xf32> to vector<256x32xf32>
    %68 = arith.addf %65, %67 : vector<256x32xf32>
    %cst_94 = arith.constant 2.000000e-01 : f32
    %69 = vector.broadcast %cst_94 : f32 to vector<256x32xf32>
    %70 = arith.mulf %69, %68 : vector<256x32xf32>
    %71 = arith.maximumf %68, %70 : vector<256x32xf32>
    %72 = vector.shape_cast %71 : vector<256x32xf32> to vector<16x16x32xf32>
    %c1_95 = arith.constant 1 : index
    %c1_96 = arith.constant 1 : index
    %c0_97 = arith.constant 0 : index
    %73 = vector.load %arg11[%c1_95, %c1_96, %c0_97] : memref<18x18x32xf32, #tpu.memory_space<vmem>>, vector<16x16x32xf32>
    tpu.vector_store %arg11[%c1_95, %c1_96, %c0_97], %72 {strides = array<i32>} : memref<18x18x32xf32, #tpu.memory_space<vmem>>, vector<16x16x32xf32>,
    %74 = vector.extract_strided_slice %72 {offsets = [1, 0, 0], sizes = [1, 16, 32], strides = [1, 1, 1]} : vector<16x16x32xf32> to vector<1x16x32xf32>
    %c0_98 = arith.constant 0 : index
    %c1_99 = arith.constant 1 : index
    %c0_100 = arith.constant 0 : index
    %75 = vector.load %arg11[%c0_98, %c1_99, %c0_100] : memref<18x18x32xf32, #tpu.memory_space<vmem>>, vector<1x16x32xf32>
    tpu.vector_store %arg11[%c0_98, %c1_99, %c0_100], %74 {strides = array<i32>} : memref<18x18x32xf32, #tpu.memory_space<vmem>>, vector<1x16x32xf32>,
    %76 = vector.extract_strided_slice %72 {offsets = [14, 0, 0], sizes = [1, 16, 32], strides = [1, 1, 1]} : vector<16x16x32xf32> to vector<1x16x32xf32>
    %c17_101 = arith.constant 17 : index
    %c1_102 = arith.constant 1 : index
    %c0_103 = arith.constant 0 : index
    %77 = vector.load %arg11[%c17_101, %c1_102, %c0_103] : memref<18x18x32xf32, #tpu.memory_space<vmem>>, vector<1x16x32xf32>
    tpu.vector_store %arg11[%c17_101, %c1_102, %c0_103], %76 {strides = array<i32>} : memref<18x18x32xf32, #tpu.memory_space<vmem>>, vector<1x16x32xf32>,
    %c0_104 = arith.constant 0 : index
    %c2_105 = arith.constant 2 : index
    %c0_106 = arith.constant 0 : index
    %78 = vector.load %arg11[%c0_104, %c2_105, %c0_106] : memref<18x18x32xf32, #tpu.memory_space<vmem>>, vector<18x1x32xf32>
    %c0_107 = arith.constant 0 : index
    %c0_108 = arith.constant 0 : index
    %c0_109 = arith.constant 0 : index
    %79 = vector.load %arg11[%c0_107, %c0_108, %c0_109] : memref<18x18x32xf32, #tpu.memory_space<vmem>>, vector<18x1x32xf32>
    tpu.vector_store %arg11[%c0_107, %c0_108, %c0_109], %78 {strides = array<i32>} : memref<18x18x32xf32, #tpu.memory_space<vmem>>, vector<18x1x32xf32>,
    %c0_110 = arith.constant 0 : index
    %c15_111 = arith.constant 15 : index
    %c0_112 = arith.constant 0 : index
    %80 = vector.load %arg11[%c0_110, %c15_111, %c0_112] : memref<18x18x32xf32, #tpu.memory_space<vmem>>, vector<18x1x32xf32>
    %c0_113 = arith.constant 0 : index
    %c17_114 = arith.constant 17 : index
    %c0_115 = arith.constant 0 : index
    %81 = vector.load %arg11[%c0_113, %c17_114, %c0_115] : memref<18x18x32xf32, #tpu.memory_space<vmem>>, vector<18x1x32xf32>
    tpu.vector_store %arg11[%c0_113, %c17_114, %c0_115], %80 {strides = array<i32>} : memref<18x18x32xf32, #tpu.memory_space<vmem>>, vector<18x1x32xf32>,
    %cst_116 = arith.constant 0.000000e+00 : f32
    %82 = vector.broadcast %cst_116 : f32 to vector<256x32xf32>
    %c0_117 = arith.constant 0 : index
    %c0_118 = arith.constant 0 : index
    %c0_119 = arith.constant 0 : index
    %83 = vector.load %arg11[%c0_117, %c0_118, %c0_119] : memref<18x18x32xf32, #tpu.memory_space<vmem>>, vector<16x16x32xf32>
    %84 = vector.shape_cast %83 : vector<16x16x32xf32> to vector<256x32xf32>
    %c0_120 = arith.constant 0 : index
    %c0_121 = arith.constant 0 : index
    %c0_122 = arith.constant 0 : index
    %c0_123 = arith.constant 0 : index
    %85 = vector.load %arg4[%c0_120, %c0_121, %c0_122, %c0_123] : memref<3x3x32x32xf32, #tpu.memory_space<vmem>>, vector<1x1x32x32xf32>
    %86 = vector.shape_cast %85 : vector<1x1x32x32xf32> to vector<32x32xf32>
    %cst_124 = arith.constant dense<0.000000e+00> : vector<256x32xf32>
    %87 = tpu.matmul %84, %86, %cst_124 {dimension_numbers = #tpu.dot_dimension_numbers<[1], [0], [0], [1], [0, 0, 1, 1], [], []>} : vector<256x32xf32>, vector<32x32xf32>, vector<256x32xf32> -> vector<256x32xf32>
    %88 = arith.addf %82, %87 : vector<256x32xf32>
    %c0_125 = arith.constant 0 : index
    %c1_126 = arith.constant 1 : index
    %c0_127 = arith.constant 0 : index
    %89 = vector.load %arg11[%c0_125, %c1_126, %c0_127] : memref<18x18x32xf32, #tpu.memory_space<vmem>>, vector<16x16x32xf32>
    %90 = vector.shape_cast %89 : vector<16x16x32xf32> to vector<256x32xf32>
    %c0_128 = arith.constant 0 : index
    %c1_129 = arith.constant 1 : index
    %c0_130 = arith.constant 0 : index
    %c0_131 = arith.constant 0 : index
    %91 = vector.load %arg4[%c0_128, %c1_129, %c0_130, %c0_131] : memref<3x3x32x32xf32, #tpu.memory_space<vmem>>, vector<1x1x32x32xf32>
    %92 = vector.shape_cast %91 : vector<1x1x32x32xf32> to vector<32x32xf32>
    %cst_132 = arith.constant dense<0.000000e+00> : vector<256x32xf32>
    %93 = tpu.matmul %90, %92, %cst_132 {dimension_numbers = #tpu.dot_dimension_numbers<[1], [0], [0], [1], [0, 0, 1, 1], [], []>} : vector<256x32xf32>, vector<32x32xf32>, vector<256x32xf32> -> vector<256x32xf32>
    %94 = arith.addf %88, %93 : vector<256x32xf32>
    %c0_133 = arith.constant 0 : index
    %c2_134 = arith.constant 2 : index
    %c0_135 = arith.constant 0 : index
    %95 = vector.load %arg11[%c0_133, %c2_134, %c0_135] : memref<18x18x32xf32, #tpu.memory_space<vmem>>, vector<16x16x32xf32>
    %96 = vector.shape_cast %95 : vector<16x16x32xf32> to vector<256x32xf32>
    %c0_136 = arith.constant 0 : index
    %c2_137 = arith.constant 2 : index
    %c0_138 = arith.constant 0 : index
    %c0_139 = arith.constant 0 : index
    %97 = vector.load %arg4[%c0_136, %c2_137, %c0_138, %c0_139] : memref<3x3x32x32xf32, #tpu.memory_space<vmem>>, vector<1x1x32x32xf32>
    %98 = vector.shape_cast %97 : vector<1x1x32x32xf32> to vector<32x32xf32>
    %cst_140 = arith.constant dense<0.000000e+00> : vector<256x32xf32>
    %99 = tpu.matmul %96, %98, %cst_140 {dimension_numbers = #tpu.dot_dimension_numbers<[1], [0], [0], [1], [0, 0, 1, 1], [], []>} : vector<256x32xf32>, vector<32x32xf32>, vector<256x32xf32> -> vector<256x32xf32>
    %100 = arith.addf %94, %99 : vector<256x32xf32>
    %c1_141 = arith.constant 1 : index
    %c0_142 = arith.constant 0 : index
    %c0_143 = arith.constant 0 : index
    %101 = vector.load %arg11[%c1_141, %c0_142, %c0_143] : memref<18x18x32xf32, #tpu.memory_space<vmem>>, vector<16x16x32xf32>
    %102 = vector.shape_cast %101 : vector<16x16x32xf32> to vector<256x32xf32>
    %c1_144 = arith.constant 1 : index
    %c0_145 = arith.constant 0 : index
    %c0_146 = arith.constant 0 : index
    %c0_147 = arith.constant 0 : index
    %103 = vector.load %arg4[%c1_144, %c0_145, %c0_146, %c0_147] : memref<3x3x32x32xf32, #tpu.memory_space<vmem>>, vector<1x1x32x32xf32>
    %104 = vector.shape_cast %103 : vector<1x1x32x32xf32> to vector<32x32xf32>
    %cst_148 = arith.constant dense<0.000000e+00> : vector<256x32xf32>
    %105 = tpu.matmul %102, %104, %cst_148 {dimension_numbers = #tpu.dot_dimension_numbers<[1], [0], [0], [1], [0, 0, 1, 1], [], []>} : vector<256x32xf32>, vector<32x32xf32>, vector<256x32xf32> -> vector<256x32xf32>
    %106 = arith.addf %100, %105 : vector<256x32xf32>
    %c1_149 = arith.constant 1 : index
    %c1_150 = arith.constant 1 : index
    %c0_151 = arith.constant 0 : index
    %107 = vector.load %arg11[%c1_149, %c1_150, %c0_151] : memref<18x18x32xf32, #tpu.memory_space<vmem>>, vector<16x16x32xf32>
    %108 = vector.shape_cast %107 : vector<16x16x32xf32> to vector<256x32xf32>
    %c1_152 = arith.constant 1 : index
    %c1_153 = arith.constant 1 : index
    %c0_154 = arith.constant 0 : index
    %c0_155 = arith.constant 0 : index
    %109 = vector.load %arg4[%c1_152, %c1_153, %c0_154, %c0_155] : memref<3x3x32x32xf32, #tpu.memory_space<vmem>>, vector<1x1x32x32xf32>
    %110 = vector.shape_cast %109 : vector<1x1x32x32xf32> to vector<32x32xf32>
    %cst_156 = arith.constant dense<0.000000e+00> : vector<256x32xf32>
    %111 = tpu.matmul %108, %110, %cst_156 {dimension_numbers = #tpu.dot_dimension_numbers<[1], [0], [0], [1], [0, 0, 1, 1], [], []>} : vector<256x32xf32>, vector<32x32xf32>, vector<256x32xf32> -> vector<256x32xf32>
    %112 = arith.addf %106, %111 : vector<256x32xf32>
    %c1_157 = arith.constant 1 : index
    %c2_158 = arith.constant 2 : index
    %c0_159 = arith.constant 0 : index
    %113 = vector.load %arg11[%c1_157, %c2_158, %c0_159] : memref<18x18x32xf32, #tpu.memory_space<vmem>>, vector<16x16x32xf32>
    %114 = vector.shape_cast %113 : vector<16x16x32xf32> to vector<256x32xf32>
    %c1_160 = arith.constant 1 : index
    %c2_161 = arith.constant 2 : index
    %c0_162 = arith.constant 0 : index
    %c0_163 = arith.constant 0 : index
    %115 = vector.load %arg4[%c1_160, %c2_161, %c0_162, %c0_163] : memref<3x3x32x32xf32, #tpu.memory_space<vmem>>, vector<1x1x32x32xf32>
    %116 = vector.shape_cast %115 : vector<1x1x32x32xf32> to vector<32x32xf32>
    %cst_164 = arith.constant dense<0.000000e+00> : vector<256x32xf32>
    %117 = tpu.matmul %114, %116, %cst_164 {dimension_numbers = #tpu.dot_dimension_numbers<[1], [0], [0], [1], [0, 0, 1, 1], [], []>} : vector<256x32xf32>, vector<32x32xf32>, vector<256x32xf32> -> vector<256x32xf32>
    %118 = arith.addf %112, %117 : vector<256x32xf32>
    %c2_165 = arith.constant 2 : index
    %c0_166 = arith.constant 0 : index
    %c0_167 = arith.constant 0 : index
    %119 = vector.load %arg11[%c2_165, %c0_166, %c0_167] : memref<18x18x32xf32, #tpu.memory_space<vmem>>, vector<16x16x32xf32>
    %120 = vector.shape_cast %119 : vector<16x16x32xf32> to vector<256x32xf32>
    %c2_168 = arith.constant 2 : index
    %c0_169 = arith.constant 0 : index
    %c0_170 = arith.constant 0 : index
    %c0_171 = arith.constant 0 : index
    %121 = vector.load %arg4[%c2_168, %c0_169, %c0_170, %c0_171] : memref<3x3x32x32xf32, #tpu.memory_space<vmem>>, vector<1x1x32x32xf32>
    %122 = vector.shape_cast %121 : vector<1x1x32x32xf32> to vector<32x32xf32>
    %cst_172 = arith.constant dense<0.000000e+00> : vector<256x32xf32>
    %123 = tpu.matmul %120, %122, %cst_172 {dimension_numbers = #tpu.dot_dimension_numbers<[1], [0], [0], [1], [0, 0, 1, 1], [], []>} : vector<256x32xf32>, vector<32x32xf32>, vector<256x32xf32> -> vector<256x32xf32>
    %124 = arith.addf %118, %123 : vector<256x32xf32>
    %c2_173 = arith.constant 2 : index
    %c1_174 = arith.constant 1 : index
    %c0_175 = arith.constant 0 : index
    %125 = vector.load %arg11[%c2_173, %c1_174, %c0_175] : memref<18x18x32xf32, #tpu.memory_space<vmem>>, vector<16x16x32xf32>
    %126 = vector.shape_cast %125 : vector<16x16x32xf32> to vector<256x32xf32>
    %c2_176 = arith.constant 2 : index
    %c1_177 = arith.constant 1 : index
    %c0_178 = arith.constant 0 : index
    %c0_179 = arith.constant 0 : index
    %127 = vector.load %arg4[%c2_176, %c1_177, %c0_178, %c0_179] : memref<3x3x32x32xf32, #tpu.memory_space<vmem>>, vector<1x1x32x32xf32>
    %128 = vector.shape_cast %127 : vector<1x1x32x32xf32> to vector<32x32xf32>
    %cst_180 = arith.constant dense<0.000000e+00> : vector<256x32xf32>
    %129 = tpu.matmul %126, %128, %cst_180 {dimension_numbers = #tpu.dot_dimension_numbers<[1], [0], [0], [1], [0, 0, 1, 1], [], []>} : vector<256x32xf32>, vector<32x32xf32>, vector<256x32xf32> -> vector<256x32xf32>
    %130 = arith.addf %124, %129 : vector<256x32xf32>
    %c2_181 = arith.constant 2 : index
    %c2_182 = arith.constant 2 : index
    %c0_183 = arith.constant 0 : index
    %131 = vector.load %arg11[%c2_181, %c2_182, %c0_183] : memref<18x18x32xf32, #tpu.memory_space<vmem>>, vector<16x16x32xf32>
    %132 = vector.shape_cast %131 : vector<16x16x32xf32> to vector<256x32xf32>
    %c2_184 = arith.constant 2 : index
    %c2_185 = arith.constant 2 : index
    %c0_186 = arith.constant 0 : index
    %c0_187 = arith.constant 0 : index
    %133 = vector.load %arg4[%c2_184, %c2_185, %c0_186, %c0_187] : memref<3x3x32x32xf32, #tpu.memory_space<vmem>>, vector<1x1x32x32xf32>
    %134 = vector.shape_cast %133 : vector<1x1x32x32xf32> to vector<32x32xf32>
    %cst_188 = arith.constant dense<0.000000e+00> : vector<256x32xf32>
    %135 = tpu.matmul %132, %134, %cst_188 {dimension_numbers = #tpu.dot_dimension_numbers<[1], [0], [0], [1], [0, 0, 1, 1], [], []>} : vector<256x32xf32>, vector<32x32xf32>, vector<256x32xf32> -> vector<256x32xf32>
    %136 = arith.addf %130, %135 : vector<256x32xf32>
    %c0_189 = arith.constant 0 : index
    %c0_190 = arith.constant 0 : index
    %137 = vector.load %arg5[%c0_189, %c0_190] : memref<1x32xf32, #tpu.memory_space<vmem>>, vector<1x32xf32>
    %138 = vector.broadcast %137 : vector<1x32xf32> to vector<256x32xf32>
    %139 = arith.addf %136, %138 : vector<256x32xf32>
    %cst_191 = arith.constant dense<0.000000e+00> : vector<32xf32>
    %140 = vector.multi_reduction <add>, %139, %cst_191 [0] : vector<256x32xf32> to vector<32xf32>
    %141 = vector.shape_cast %140 : vector<32xf32> to vector<1x32xf32>
    %cst_192 = arith.constant 2.560000e+02 : f32
    %142 = vector.broadcast %cst_192 : f32 to vector<1x32xf32>
    %143 = arith.divf %141, %142 : vector<1x32xf32>
    %c0_193 = arith.constant 0 : index
    %c0_194 = arith.constant 0 : index
    %144 = vector.load %arg6[%c0_193, %c0_194] : memref<32x2xf32, #tpu.memory_space<vmem>>, vector<32x2xf32>
    %cst_195 = arith.constant dense<0.000000e+00> : vector<1x2xf32>
    %145 = tpu.matmul %143, %144, %cst_195 {dimension_numbers = #tpu.dot_dimension_numbers<[1], [0], [0], [1], [0, 0, 1, 1], [], []>} : vector<1x32xf32>, vector<32x2xf32>, vector<1x2xf32> -> vector<1x2xf32>
    %c0_196 = arith.constant 0 : index
    %c0_197 = arith.constant 0 : index
    %146 = vector.load %arg7[%c0_196, %c0_197] : memref<1x2xf32, #tpu.memory_space<vmem>>, vector<1x2xf32>
    %147 = arith.addf %145, %146 : vector<1x2xf32>
    %cst_198 = arith.constant 0.000000e+00 : f32
    %148 = vector.broadcast %cst_198 : f32 to vector<1x2xf32>
    %149 = arith.maximumf %147, %148 : vector<1x2xf32>
    %c0_199 = arith.constant 0 : index
    %c0_200 = arith.constant 0 : index
    %150 = vector.load %arg8[%c0_199, %c0_200] : memref<2x32xf32, #tpu.memory_space<vmem>>, vector<2x32xf32>
    %cst_201 = arith.constant dense<0.000000e+00> : vector<1x32xf32>
    %151 = tpu.matmul %149, %150, %cst_201 {dimension_numbers = #tpu.dot_dimension_numbers<[1], [0], [0], [1], [0, 0, 1, 1], [], []>} : vector<1x2xf32>, vector<2x32xf32>, vector<1x32xf32> -> vector<1x32xf32>
    %c0_202 = arith.constant 0 : index
    %c0_203 = arith.constant 0 : index
    %152 = vector.load %arg9[%c0_202, %c0_203] : memref<1x32xf32, #tpu.memory_space<vmem>>, vector<1x32xf32>
    %153 = arith.addf %151, %152 : vector<1x32xf32>
    %cst_204 = arith.constant 0.000000e+00 : f32
    %154 = vector.broadcast %cst_204 : f32 to vector<1x32xf32>
    %155 = arith.subf %154, %153 : vector<1x32xf32>
    %156 = math.exp %155 : vector<1x32xf32>
    %cst_205 = arith.constant 1.000000e+00 : f32
    %157 = vector.broadcast %cst_205 : f32 to vector<1x32xf32>
    %158 = arith.addf %157, %156 : vector<1x32xf32>
    %cst_206 = arith.constant 1.000000e+00 : f32
    %159 = vector.broadcast %cst_206 : f32 to vector<1x32xf32>
    %160 = arith.divf %159, %158 : vector<1x32xf32>
    %161 = vector.broadcast %160 : vector<1x32xf32> to vector<256x32xf32>
    %162 = arith.mulf %139, %161 : vector<256x32xf32>
    %163 = vector.shape_cast %1 : vector<16x16x32xf32> to vector<256x32xf32>
    %164 = arith.addf %162, %163 : vector<256x32xf32>
    %165 = vector.shape_cast %164 : vector<256x32xf32> to vector<16x16x32xf32>
    %c0_207 = arith.constant 0 : index
    %c0_208 = arith.constant 0 : index
    %c0_209 = arith.constant 0 : index
    %c0_210 = arith.constant 0 : index
    %166 = vector.load %arg10[%c0_207, %c0_208, %c0_209, %c0_210] : memref<1x16x16x32xf32, #tpu.memory_space<vmem>>, vector<1x16x16x32xf32>
    %167 = vector.shape_cast %166 : vector<1x16x16x32xf32> to vector<16x16x32xf32>
    %168 = vector.shape_cast %165 : vector<16x16x32xf32> to vector<1x16x16x32xf32>
    tpu.vector_store %arg10[%c0_207, %c0_208, %c0_209, %c0_210], %168 {strides = array<i32>} : memref<1x16x16x32xf32, #tpu.memory_space<vmem>>, vector<1x16x16x32xf32>,
    return
  }
  func.func @transform_0(%arg0: i32) -> (i32, i32, i32, i32) {
    %c0_i32 = arith.constant 0 : i32
    %c0_i32_0 = arith.constant 0 : i32
    %c0_i32_1 = arith.constant 0 : i32
    %c0_i32_2 = arith.constant 0 : i32
    return %arg0, %c0_i32, %c0_i32_0, %c0_i32_1 : i32, i32, i32, i32
  }
  func.func @transform_1(%arg0: i32) -> (i32, i32, i32, i32) {
    %c0_i32 = arith.constant 0 : i32
    %c0_i32_0 = arith.constant 0 : i32
    %c0_i32_1 = arith.constant 0 : i32
    %c0_i32_2 = arith.constant 0 : i32
    %c0_i32_3 = arith.constant 0 : i32
    return %c0_i32, %c0_i32_0, %c0_i32_1, %c0_i32_2 : i32, i32, i32, i32
  }
  func.func @transform_2(%arg0: i32) -> (i32, i32) {
    %c0_i32 = arith.constant 0 : i32
    %c0_i32_0 = arith.constant 0 : i32
    %c0_i32_1 = arith.constant 0 : i32
    return %c0_i32, %c0_i32_0 : i32, i32
  }
  func.func @transform_3(%arg0: i32) -> (i32, i32, i32, i32) {
    %c0_i32 = arith.constant 0 : i32
    %c0_i32_0 = arith.constant 0 : i32
    %c0_i32_1 = arith.constant 0 : i32
    %c0_i32_2 = arith.constant 0 : i32
    %c0_i32_3 = arith.constant 0 : i32
    return %c0_i32, %c0_i32_0, %c0_i32_1, %c0_i32_2 : i32, i32, i32, i32
  }
  func.func @transform_4(%arg0: i32) -> (i32, i32) {
    %c0_i32 = arith.constant 0 : i32
    %c0_i32_0 = arith.constant 0 : i32
    %c0_i32_1 = arith.constant 0 : i32
    return %c0_i32, %c0_i32_0 : i32, i32
  }
  func.func @transform_5(%arg0: i32) -> (i32, i32) {
    %c0_i32 = arith.constant 0 : i32
    %c0_i32_0 = arith.constant 0 : i32
    %c0_i32_1 = arith.constant 0 : i32
    return %c0_i32, %c0_i32_0 : i32, i32
  }
  func.func @transform_6(%arg0: i32) -> (i32, i32) {
    %c0_i32 = arith.constant 0 : i32
    %c0_i32_0 = arith.constant 0 : i32
    %c0_i32_1 = arith.constant 0 : i32
    return %c0_i32, %c0_i32_0 : i32, i32
  }
  func.func @transform_7(%arg0: i32) -> (i32, i32) {
    %c0_i32 = arith.constant 0 : i32
    %c0_i32_0 = arith.constant 0 : i32
    %c0_i32_1 = arith.constant 0 : i32
    return %c0_i32, %c0_i32_0 : i32, i32
  }
  func.func @transform_8(%arg0: i32) -> (i32, i32) {
    %c0_i32 = arith.constant 0 : i32
    %c0_i32_0 = arith.constant 0 : i32
    %c0_i32_1 = arith.constant 0 : i32
    return %c0_i32, %c0_i32_0 : i32, i32
  }
  func.func @transform_9(%arg0: i32) -> (i32, i32, i32, i32) {
    %c0_i32 = arith.constant 0 : i32
    %c0_i32_0 = arith.constant 0 : i32
    %c0_i32_1 = arith.constant 0 : i32
    %c0_i32_2 = arith.constant 0 : i32
    return %arg0, %c0_i32, %c0_i32_0, %c0_i32_1 : i32, i32, i32, i32
  }
}

</mosaic_0001>

<bundles_post_ra>
// kernel: res_forward_nchw.1
= control target key start
LH: loop header
LB: loop body
LE: loop exit
PB: predicated region body
PF: predicated region fallthrough
CT: control target
= control target key end

     0   :  { %14 = vsyncpa [#allocation4], 0  ;;  %s13640_s0 = inlined_call_operand.vmem [shape: f32[2,16,16,32], index: 0, kind: input, shape index: {}]   ;;  %s13641_s1 = inlined_call_operand.vmem [shape: f32[3,3,32,32], index: 1, kind: input, shape index: {}]   ;;  %s13642_s2 = inlined_call_operand.vmem [shape: f32[1,32], index: 2, kind: input, shape index: {}]   ;;  %s13643_s3 = inlined_call_operand.vmem [shape: f32[3,3,32,32], index: 3, kind: input, shape index: {}]   ;;  %s13644_s4 = inlined_call_operand.vmem [shape: f32[1,32], index: 4, kind: input, shape index: {}]   ;;  %s13645_s5 = inlined_call_operand.vmem [shape: f32[32,2], index: 5, kind: input, shape index: {}]   ;;  %s13646_s6 = inlined_call_operand.vmem [shape: f32[1,2], index: 6, kind: input, shape index: {}]   ;;  %s13647_s7 = inlined_call_operand.vmem [shape: f32[2,32], index: 7, kind: input, shape index: {}]   ;;  %s13648_s8 = inlined_call_operand.vmem [shape: f32[1,32], index: 8, kind: input, shape index: {}]   ;;  %s13649_s9 = inlined_call_operand.hbm [shape: f32[2,16,16,32], index: 9, kind: output, shape index: {}]  }
   0x1   :  { %16 = vsyncpa [#allocation4 + $0x1], 0  ;;  %s11196_s30 = smov 0   ;;  %s11198_s10 = smov 0  }
   0x2   :  { %s11200_s11 = smov 0   ;;  %s11202_s12 = smov 0  }
   0x3 LB: > { %s11217_s13 = sadd.s32 4294967295, %s11138_s12   ;;  %s8028_s14 = sadd.s32 4294967294, %s11138_s12   ;;  %s11138_s12 = sphi %s11202_s12, %s14022_s12   ;;  %s11134_s11 = sphi %s11200_s11, %s14021_s11   ;;  %s11130_s10 = sphi %s11198_s10, %s14020_s10   ;;  %s11126_s30 = sphi %s11196_s30, %s14019_s30  }
   0x4   : > { %s11221_s15 = sadd.s32 1, %s11138_s12   ;;  %s223_s16 = sadd.s32 1, %s11134_s11 }
   0x5   : > { %s220_s17 = ssub.s32 %s11138_s12, %s11221_s15  ;;  %p233_p0 = scmp.ne.s32.totalorder %s11134_s11, %s11130_s10 }
   0x6   : > { %p221_p1 = scmp.eq.s32.totalorder %s220_s17, 0  ;;  %p234_p2 = scmp.eq.s32.totalorder %s11217_s13, 1 }
   0x7   : > { %p239_p3 = scmp.ne.s32.totalorder %s11130_s10, %s11126_s30  ;;  %p240_p4 = scmp.eq.s32.totalorder %s8028_s14, 1 }
   0x8   : > { %s11232_s18 = scalar_select %p221_p1, %s11134_s11, %s223_s16  }
   0x9   : > { %p11234_p5 = por %p234_p2, %p233_p0  ;;  %p11238_p6 = por %p240_p4, %p239_p3 }
   0xa   : > { %p8031_p7 = scmp.ge.s32.totalorder %s11138_s12, 1  ;;  %p290_p8 = scmp.lt.s32.totalorder %s11138_s12, 3 }
   0xc   : > { %p291_p9 = pnand %p8031_p7, %p290_p8 }
   0xe   : > { %294 = sbr.rel (%p291_p9) target bundleno = 2091 (0x82b), region = 56 }
  0x15   : > { %v8035_v0 = vld [vmem:[%s13641_s1 + $0x20] sm:$0xff]  ;;  %v8036_v1 = vld [vmem:[%s13641_s1 + $0x28] sm:$0xff]  ;;  %v8037_v2 = vld [vmem:[%s13641_s1 + $0x30] sm:$0xff]  ;;  %p326_p10 = scmp.lt.s32.totalorder %s11217_s13, 1  ;;  %vm364_vm0 = vcmask 261120   ;;  %vm420_vm1 = vcmask 253952  }
  0x16   : > { %v10366_v3 = vpack.c.bf16 %v8036_v1, %v8035_v0  ;;  %v8038_v4 = vld [vmem:[%s13641_s1 + $0x38] sm:$0xff]  ;;  %v507_v6 = vld [vmem:[%s13641_s1] sm:$0xff]  ;;  %v508_v7 = vld [vmem:[%s13641_s1 + $0x8] sm:$0xff]  ;;  %vm11141_vm2 = vmmov 0   ;;  %vm7772_vm3 = vcmask 1041408   ;;  %vm7768_vm4 = vcmask 15360  }
  0x17   : > { %v10370_v5 = vpack.c.bf16 %v8038_v4, %v8037_v2  ;;  %s327_s29 = scalar_select %p326_p10, %s11217_s13, 1  ;;  %v11269_v8 = vpack.c.bf16 %v508_v7, %v507_v6  ;;  %v509_v21 = vld [vmem:[%s13641_s1 + $0x10] sm:$0xff]  ;;  %v510_v22 = vld [vmem:[%s13641_s1 + $0x18] sm:$0xff]  ;;  %v8103_v39 = vld [vmem:[%s13641_s1 + $0x40] sm:$0xff] }
  0x18   : > { %10367 = vmatprep.subr.bf16.mxu0 %v10366_v3  ;;  %v10378_v38 = vpack.c.bf16 %v510_v22, %v509_v21  ;;  %v8104_v40 = vld [vmem:[%s13641_s1 + $0x48] sm:$0xff]  ;;  %s323_s17 = sand.u32 1, %s11130_s10   ;;  %s8686_s23 = sshll.u32 %s11217_s13, 12 }
  0x19   : > { %10369 = vmatpush3.bf16.msra.mxu0 %v10366_v3  ;;  %s8685_s22 = sshll.u32 %s327_s29, 8  ;;  %v11419_v43 = vpack.c.bf16 %v8104_v40, %v8103_v39  ;;  %s8032_s21 = sshll.u32 %s323_s17, 8 }
  0x1a   : > { %10371 = vmatprep.subr.bf16.mxu0 %v10370_v5  ;;  %s11267_s25 = scalar_lea.vmem %s13640_s0, %s8685_s22  ;;  %s13502_s22 = scalar_lea.vmem [#allocation3], %s8032_s21 }
  0x1b   : > { %v11272_v9 = vld [vmem:[%s11267_s25 + $0x10] sm:$0xff]  ;;  %v11275_v10 = vld [vmem:[%s11267_s25 + $0x18] sm:$0xff]  ;;  %v11278_v11 = vld [vmem:[%s11267_s25] sm:$0xff]  ;;  %s7966_s24 = sshll.u32 %s13502_s22, 4  ;;  %s13565_s27 = scalar_lea.hbm %s13649_s9, %s8686_s23  ;;  %s13567_s24 = int_to_ptr.vmem [resolvable:$true] %s7966_s24 }
  0x1c   : > { %13809 = vst [vmem:[#allocation6_spill] sm:$0xff] %v11272_v9  ;;  %13810 = vst [vmem:[#allocation7_spill] sm:$0xff] %v11275_v10  ;;  %v11291_v12 = vld [vmem:[%s11267_s25 + $0x8] sm:$0xff]  ;;  %v11294_v13 = vld [vmem:[%s11267_s25 + $0x20] sm:$0xff]  ;;  %s13599_s28 = scalar_lea.sflag [#allocation4], %s323_s17  ;;  %s11076_s29 = scalar_lea.vmem %s13567_s24, 4096 }
  0x1d   : > { %13811 = vst [vmem:[#allocation8_spill] sm:$0xff] %v11278_v11  ;;  %397 = vst.msk [vmem:[#allocation2 + $0x1] sm:$0xff] %vm364_vm0, %v11272_v9  ;;  %v11297_v14 = vld [vmem:[%s11267_s25 + $0x28] sm:$0xff]  ;;  %10373 = vmatpush3.bf16.msra.mxu0 %v10370_v5  ;;  %v11306_v15 = vld [vmem:[%s11267_s25 + $0x30] sm:$0xff]  ;;  %p11077_p11 = scmp.ne.s32.totalorder %s13567_s24, %s11076_s29  ;;  %s11143_s14 = smov [#allocation3]  }
  0x1e   : > { %367 = vst.msk [vmem:[#allocation2 + $0x31] sm:$0xff] %vm364_vm0, %v11272_v9  ;;  %398 = vst.msk [vmem:[#allocation2 + $0x9] sm:$0xff] %vm364_vm0, %v11275_v10  ;;  %v11309_v16 = vld [vmem:[%s11267_s25 + $0x38] sm:$0xff]  ;;  %v11312_v17 = vld [vmem:[%s11267_s25 + $0x40] sm:$0xff]  ;;  %10375 = vmatprep.subr.bf16.mxu0 %v11269_v8 }
  0x1f   : > { %368 = vst.msk [vmem:[#allocation2 + $0x39] sm:$0xff] %vm364_vm0, %v11275_v10  ;;  %365 = vst.msk [vmem:[#allocation2 + $0x19] sm:$0xff] %vm364_vm0, %v11278_v11  ;;  %v11322_v18 = vld [vmem:[%s11267_s25 + $0x48] sm:$0xff]  ;;  %v11325_v19 = vld [vmem:[%s11267_s25 + $0x50] sm:$0xff]  ;;  %p11078_p12 = pnand %p11077_p11, %p11234_p5 }
  0x20   : > { %13812 = vst [vmem:[#allocation9_spill] sm:$0xff] %v11291_v12  ;;  %13813 = vst [vmem:[#allocation10_spill] sm:$0xff] %v11294_v13  ;;  %v11328_v20 = vld [vmem:[%s11267_s25 + $0x58] sm:$0xff]  ;;  %v11343_v23 = vld [vmem:[%s11267_s25 + $0x60] sm:$0xff] }
  0x21   : > { %13814 = vst [vmem:[#allocation11_spill] sm:$0xff] %v11297_v14  ;;  %366 = vst.msk [vmem:[#allocation2 + $0x21] sm:$0xff] %vm364_vm0, %v11291_v12  ;;  %v11346_v24 = vld [vmem:[%s11267_s25 + $0x68] sm:$0xff]  ;;  %v11349_v25 = vld [vmem:[%s11267_s25 + $0x70] sm:$0xff]  ;;  %p11079_p13 = pneg %p11078_p12 }
  0x22   : > { %369 = vst.msk [vmem:[#allocation2 + $0x49] sm:$0xff] %vm364_vm0, %v11294_v13  ;;  %370 = vst.msk [vmem:[#allocation2 + $0x51] sm:$0xff] %vm364_vm0, %v11297_v14  ;;  %v11358_v26 = vld [vmem:[%s11267_s25 + $0x78] sm:$0xff]  ;;  %v11361_v27 = vld [vmem:[%s11267_s25 + $0x80] sm:$0xff] }
  0x23   : > { %13815 = vst [vmem:[#allocation12_spill] sm:$0xff] %v11306_v15  ;;  %13816 = vst [vmem:[#allocation13_spill] sm:$0xff] %v11309_v16  ;;  %v11364_v28 = vld [vmem:[%s11267_s25 + $0x88] sm:$0xff]  ;;  %v11373_v29 = vld [vmem:[%s11267_s25 + $0x90] sm:$0xff] }
  0x24   : > { %13817 = vst [vmem:[#allocation14_spill] sm:$0xff] %v11312_v17  ;;  %371 = vst.msk [vmem:[#allocation2 + $0x61] sm:$0xff] %vm364_vm0, %v11306_v15  ;;  %v11376_v30 = vld [vmem:[%s11267_s25 + $0x98] sm:$0xff]  ;;  %v11379_v31 = vld [vmem:[%s11267_s25 + $0xa0] sm:$0xff] }
  0x25   : > { %372 = vst.msk [vmem:[#allocation2 + $0x69] sm:$0xff] %vm364_vm0, %v11309_v16  ;;  %373 = vst.msk [vmem:[#allocation2 + $0x79] sm:$0xff] %vm364_vm0, %v11312_v17  ;;  %v11388_v32 = vld [vmem:[%s11267_s25 + $0xa8] sm:$0xff]  ;;  %v11391_v33 = vld [vmem:[%s11267_s25 + $0xb0] sm:$0xff] }
  0x26   : > { %13818 = vst [vmem:[#allocation15_spill] sm:$0xff] %v11322_v18  ;;  %13819 = vst [vmem:[#allocation16_spill] sm:$0xff] %v11325_v19  ;;  %v11394_v34 = vld [vmem:[%s11267_s25 + $0xb8] sm:$0xff]  ;;  %v511_v35 = vld [vmem:[#allocation2 + $0x1] sm:$0xff] }
  0x27   : > { %13820 = vst [vmem:[#allocation17_spill] sm:$0xff] %v11328_v20  ;;  %374 = vst.msk [vmem:[#allocation2 + $0x81] sm:$0xff] %vm364_vm0, %v11322_v18  ;;  %v512_v36 = vld [vmem:[#allocation2 + $0x9] sm:$0xff]  ;;  %v11396_v37 = vld [vmem:[#allocation2 + $0x19] sm:$0xff]  ;;  %9350 = vmatprep.mubr.msk.f32.mxu0 %vm364_vm0, %v511_v35 }
  0x28   : > { %375 = vst.msk [vmem:[#allocation2 + $0x91] sm:$0xff] %vm364_vm0, %v11325_v19  ;;  %376 = vst.msk [vmem:[#allocation2 + $0x99] sm:$0xff] %vm364_vm0, %v11328_v20  ;;  %9351 = vmatmul.mubr.msk.f32.vlgmr.msra.gmra.mrb[0].mxu0 %vm364_vm0, %v512_v36  ;;  %v11415_v41 = vld [vmem:[#allocation2 + $0x21] sm:$0xff]  ;;  %v11417_v42 = vld [vmem:[#allocation2 + $0x31] sm:$0xff] }
  0x29   : > { %13821 = vst [vmem:[#allocation18_spill] sm:$0xff] %v11343_v23  ;;  %13822 = vst [vmem:[#allocation19_spill] sm:$0xff] %v11346_v24  ;;  %10377 = vmatpush3.bf16.msra.mxu0 %v11269_v8  ;;  %9353 = vmatprep.mubr.msk.f32.mxu0 %vm364_vm0, %v11396_v37  ;;  %v11425_v44 = vld [vmem:[#allocation2 + $0x39] sm:$0xff]  ;;  %v11427_v45 = vld [vmem:[#allocation2 + $0x49] sm:$0xff] }
  0x2a   : > { %13823 = vst [vmem:[#allocation20_spill] sm:$0xff] %v11349_v25  ;;  %377 = vst.msk [vmem:[#allocation2 + $0xa9] sm:$0xff] %vm364_vm0, %v11343_v23  ;;  %10379 = vmatprep.subr.bf16.mxu0 %v10378_v38  ;;  %v11430_v46 = vld [vmem:[%s11267_s25 + $0xc0] sm:$0xff]  ;;  %v11436_v47 = vld [vmem:[%s11267_s25 + $0xc8] sm:$0xff] }
  0x2b   : > { %378 = vst.msk [vmem:[#allocation2 + $0xb1] sm:$0xff] %vm364_vm0, %v11346_v24  ;;  %379 = vst.msk [vmem:[#allocation2 + $0xc1] sm:$0xff] %vm364_vm0, %v11349_v25  ;;  %v11439_v48 = vld [vmem:[%s11267_s25 + $0xd0] sm:$0xff]  ;;  %v11442_v49 = vld [vmem:[%s11267_s25 + $0xd8] sm:$0xff] }
  0x2c   : > { %13824 = vst [vmem:[#allocation21_spill] sm:$0xff] %v11358_v26  ;;  %13825 = vst [vmem:[#allocation22_spill] sm:$0xff] %v11361_v27  ;;  %9354 = vmatmul.mubr.msk.f32.gmra.mrb[2].mxu0 %vm364_vm0, %v11415_v41  ;;  %v11453_v50 = vld [vmem:[%s11267_s25 + $0xe0] sm:$0xff]  ;;  %v11456_v51 = vld [vmem:[%s11267_s25 + $0xe8] sm:$0xff] }
  0x2d   : > { %13826 = vst [vmem:[#allocation23_spill] sm:$0xff] %v11364_v28  ;;  %380 = vst.msk [vmem:[#allocation2 + $0xc9] sm:$0xff] %vm364_vm0, %v11358_v26  ;;  %9356 = vmatprep.mubr.msk.f32.mxu0 %vm364_vm0, %v11417_v42  ;;  %10381 = vmatpush3.bf16.msra.mxu0 %v10378_v38  ;;  %v402_v52 = vld [vmem:[#allocation2 + $0x2] sm:$0x1]  ;;  %v11460_v53 = vld [vmem:[#allocation2 + $0x51] sm:$0xff] }
  0x2e   : > { %381 = vst.msk [vmem:[#allocation2 + $0xd9] sm:$0xff] %vm364_vm0, %v11361_v27  ;;  %382 = vst.msk [vmem:[#allocation2 + $0xe1] sm:$0xff] %vm364_vm0, %v11364_v28  ;;  %10383 = vmatprep.subr.bf16.mxu0 %v11419_v43  ;;  %v403_v54 = vld [vmem:[#allocation2 + $0x1a] sm:$0x1]  ;;  %v11471_v55 = vld [vmem:[#allocation2 + $0x61] sm:$0xff] }
  0x2f   : > { %13827 = vst [vmem:[#allocation24_spill] sm:$0xff] %v11373_v29  ;;  %13828 = vst [vmem:[#allocation25_spill] sm:$0xff] %v11376_v30  ;;  %v404_v56 = vld [vmem:[#allocation2 + $0x32] sm:$0x1]  ;;  %v405_v57 = vld [vmem:[#allocation2 + $0x4a] sm:$0x1] }
  0x30   : > { %13829 = vst [vmem:[#allocation26_spill] sm:$0xff] %v11379_v31  ;;  %383 = vst.msk [vmem:[#allocation2 + $0xf1] sm:$0xff] %vm364_vm0, %v11373_v29  ;;  %9357 = vmatmul.mubr.msk.f32.gmra.mrb[4].mxu0 %vm364_vm0, %v11425_v44  ;;  %v406_v58 = vld [vmem:[#allocation2 + $0x62] sm:$0x1]  ;;  %v407_v59 = vld [vmem:[#allocation2 + $0x7a] sm:$0x1] }
  0x31   : > { %384 = vst.msk [vmem:[#allocation2 + $0xf9] sm:$0xff] %vm364_vm0, %v11376_v30  ;;  %385 = vst.msk [vmem:[#allocation2 + $0x109] sm:$0xff] %vm364_vm0, %v11379_v31  ;;  %9359 = vmatprep.mubr.msk.f32.mxu0 %vm364_vm0, %v11427_v45  ;;  %v408_v60 = vld [vmem:[#allocation2 + $0x92] sm:$0x1]  ;;  %v11481_v61 = vld [vmem:[#allocation2 + $0x69] sm:$0xff] }
  0x32   : > { %13830 = vst [vmem:[#allocation27_spill] sm:$0xff] %v11388_v32  ;;  %13831 = vst [vmem:[#allocation28_spill] sm:$0xff] %v11391_v33  ;;  %v409_v62 = vld [vmem:[#allocation2 + $0xaa] sm:$0x1]  ;;  %v11485_v63 = vld [vmem:[#allocation2 + $0x79] sm:$0xff] }
  0x33   : > { %13832 = vst [vmem:[#allocation29_spill] sm:$0xff] %v11394_v34  ;;  %386 = vst.msk [vmem:[#allocation2 + $0x111] sm:$0xff] %vm364_vm0, %v11388_v32  ;;  %v410_v0 = vld [vmem:[#allocation2 + $0xc2] sm:$0x1]  ;;  %v11495_v3 = vld [vmem:[#allocation2 + $0x91] sm:$0xff] }
  0x34   : > { %387 = vst.msk [vmem:[#allocation2 + $0x121] sm:$0xff] %vm364_vm0, %v11391_v33  ;;  %388 = vst.msk [vmem:[#allocation2 + $0x129] sm:$0xff] %vm364_vm0, %v11394_v34  ;;  %9360 = vmatmul.mubr.msk.f32.gmra.mrb[6].mxu0 %vm364_vm0, %v11460_v53  ;;  %v11493_v1 = vld [vmem:[#allocation2 + $0x81] sm:$0xff]  ;;  %v11504_v6 = vld [vmem:[#allocation2 + $0x99] sm:$0xff] }
  0x35   : > { %13833 = vst [vmem:[#allocation30_spill] sm:$0xff] %v11430_v46  ;;  %389 = vst.msk [vmem:[#allocation2 + $0x139] sm:$0xff] %vm364_vm0, %v11430_v46  ;;  %9362 = vmatprep.mubr.msk.f32.mxu0 %vm364_vm0, %v11471_v55  ;;  %v411_v2 = vld [vmem:[#allocation2 + $0xda] sm:$0x1]  ;;  %v11506_v8 = vld [vmem:[#allocation2 + $0xa9] sm:$0xff] }
  0x36   : > { %13834 = vst [vmem:[#allocation31_spill] sm:$0xff] %v11436_v47  ;;  %13835 = vst [vmem:[#allocation32_spill] sm:$0xff] %v11439_v48  ;;  %v11516_v36 = vld [vmem:[#allocation2 + $0xb1] sm:$0xff]  ;;  %v439_v38 = vld [vmem:[#allocation2 + $0xf] sm:$0x1] }
  0x37   : > { %13836 = vst [vmem:[#allocation33_spill] sm:$0xff] %v11442_v49  ;;  %390 = vst.msk [vmem:[#allocation2 + $0x141] sm:$0xff] %vm364_vm0, %v11436_v47  ;;  %v412_v4 = vld [vmem:[#allocation2 + $0xf2] sm:$0x1]  ;;  %v11518_v39 = vld [vmem:[#allocation2 + $0xc1] sm:$0xff] }
  0x38   : > { %391 = vst.msk [vmem:[#allocation2 + $0x151] sm:$0xff] %vm364_vm0, %v11439_v48  ;;  %392 = vst.msk [vmem:[#allocation2 + $0x159] sm:$0xff] %vm364_vm0, %v11442_v49  ;;  %9363 = vmatmul.mubr.msk.f32.gmra.mrb[8].mxu0 %vm364_vm0, %v11481_v61  ;;  %v413_v5 = vld [vmem:[#allocation2 + $0x10a] sm:$0x1]  ;;  %v440_v40 = vld [vmem:[#allocation2 + $0x27] sm:$0x1] }
  0x39   : > { %13837 = vst [vmem:[#allocation34_spill] sm:$0xff] %v11453_v50  ;;  %13838 = vst [vmem:[#allocation35_spill] sm:$0xff] %v11456_v51  ;;  %9365 = vmatprep.mubr.msk.f32.mxu0 %vm364_vm0, %v11485_v63  ;;  %v8139_v48 = vld [vmem:[%s13641_s1 + $0x60] sm:$0xff]  ;;  %v8140_v47 = vld [vmem:[%s13641_s1 + $0x68] sm:$0xff] }
  0x3a   : > { %393 = vst.msk [vmem:[#allocation2 + $0x169] sm:$0xff] %vm364_vm0, %v11453_v50  ;;  %400 = vst.msk [vmem:[#allocation2 + $0x199] sm:$0xff] %vm364_vm0, %v11453_v50  ;;  %v11654_v34 = vld [vmem:[#allocation2 + $0x80] sm:$0xff]  ;;  %v11662_v32 = vld [vmem:[#allocation2 + $0x98] sm:$0xff] }
  0x3b   : > { %394 = vst.msk [vmem:[#allocation2 + $0x171] sm:$0xff] %vm364_vm0, %v11456_v51  ;;  %401 = vst.msk [vmem:[#allocation2 + $0x1a1] sm:$0xff] %vm364_vm0, %v11456_v51  ;;  %v414_v7 = vld [vmem:[#allocation2 + $0x122] sm:$0x1]  ;;  %v476_v51 = vld [vmem:[#allocation2 + $0x8] sm:$0xff] }
  0x3c   : > { %421 = vst.msk [vmem:[#allocation2] sm:$0x1] %vm420_vm1, %v402_v52  ;;  %422 = vst.msk [vmem:[#allocation2 + $0x18] sm:$0x1] %vm420_vm1, %v403_v54  ;;  %9366 = vmatmul.mubr.msk.f32.gmra.mrb[10].mxu0 %vm364_vm0, %v11493_v1  ;;  %v415_v21 = vld [vmem:[#allocation2 + $0x13a] sm:$0x1] }
  0x3d   : > { %423 = vst.msk [vmem:[#allocation2 + $0x30] sm:$0x1] %vm420_vm1, %v404_v56  ;;  %424 = vst.msk [vmem:[#allocation2 + $0x48] sm:$0x1] %vm420_vm1, %v405_v57  ;;  %9368 = vmatprep.mubr.msk.f32.mxu0 %vm364_vm0, %v11495_v3  ;;  %v441_v52 = vld [vmem:[#allocation2 + $0x3f] sm:$0x1] }
  0x3e   : > { %425 = vst.msk [vmem:[#allocation2 + $0x60] sm:$0x1] %vm420_vm1, %v406_v58  ;;  %426 = vst.msk [vmem:[#allocation2 + $0x78] sm:$0x1] %vm420_vm1, %v407_v59  ;;  %v442_v54 = vld [vmem:[#allocation2 + $0x57] sm:$0x1] }
  0x3f   : > { %427 = vst.msk [vmem:[#allocation2 + $0x90] sm:$0x1] %vm420_vm1, %v408_v60  ;;  %428 = vst.msk [vmem:[#allocation2 + $0xa8] sm:$0x1] %vm420_vm1, %v409_v62  ;;  %v416_v22 = vld [vmem:[#allocation2 + $0x152] sm:$0x1] }
  0x40   : > { %429 = vst.msk [vmem:[#allocation2 + $0xc0] sm:$0x1] %vm420_vm1, %v410_v0  ;;  %430 = vst.msk [vmem:[#allocation2 + $0xd8] sm:$0x1] %vm420_vm1, %v411_v2  ;;  %9369 = vmatmul.mubr.msk.f32.gmra.mrb[12].mxu0 %vm364_vm0, %v11504_v6  ;;  %v11527_v56 = vld [vmem:[#allocation2 + $0xc9] sm:$0xff]  ;;  %v11530_v58 = vld [vmem:[#allocation2 + $0xd9] sm:$0xff] }
  0x41   : > { %431 = vst.msk [vmem:[#allocation2 + $0xf0] sm:$0x1] %vm420_vm1, %v412_v4  ;;  %432 = vst.msk [vmem:[#allocation2 + $0x108] sm:$0x1] %vm420_vm1, %v413_v5  ;;  %v417_v35 = vld [vmem:[#allocation2 + $0x16a] sm:$0x1]  ;;  %9371 = vmatprep.mubr.msk.f32.mxu0 %vm364_vm0, %v11506_v8 }
  0x42   : > { %433 = vst.msk [vmem:[#allocation2 + $0x120] sm:$0x1] %vm420_vm1, %v414_v7  ;;  %434 = vst.msk [vmem:[#allocation2 + $0x138] sm:$0x1] %vm420_vm1, %v415_v21  ;;  %v443_v57 = vld [vmem:[#allocation2 + $0x6f] sm:$0x1] }
  0x43   : > { %435 = vst.msk [vmem:[#allocation2 + $0x150] sm:$0x1] %vm420_vm1, %v416_v22  ;;  %436 = vst.msk [vmem:[#allocation2 + $0x168] sm:$0x1] %vm420_vm1, %v417_v35  ;;  %v444_v59 = vld [vmem:[#allocation2 + $0x87] sm:$0x1] }
  0x44   : > { %457 = vst.msk [vmem:[#allocation2 + $0x11] sm:$0x1] %vm420_vm1, %v439_v38  ;;  %458 = vst.msk [vmem:[#allocation2 + $0x29] sm:$0x1] %vm420_vm1, %v440_v40  ;;  %9372 = vmatmul.mubr.msk.f32.gmra.mrb[14].mxu0 %vm364_vm0, %v11516_v36  ;;  %v445_v60 = vld [vmem:[#allocation2 + $0x9f] sm:$0x1] }
  0x45   : > { %459 = vst.msk [vmem:[#allocation2 + $0x41] sm:$0x1] %vm420_vm1, %v441_v52  ;;  %9374 = vmatprep.mubr.msk.f32.mxu0 %vm364_vm0, %v11518_v39  ;;  %460 = vst.msk [vmem:[#allocation2 + $0x59] sm:$0x1] %vm420_vm1, %v442_v54  ;;  %v446_v62 = vld [vmem:[#allocation2 + $0xb7] sm:$0x1] }
  0x46   : > { %461 = vst.msk [vmem:[#allocation2 + $0x71] sm:$0x1] %vm420_vm1, %v443_v57  ;;  %462 = vst.msk [vmem:[#allocation2 + $0x89] sm:$0x1] %vm420_vm1, %v444_v59  ;;  %v11539_v0 = vld [vmem:[#allocation2 + $0xe1] sm:$0xff]  ;;  %v11542_v2 = vld [vmem:[#allocation2 + $0xf1] sm:$0xff] }
  0x47   : > { %463 = vst.msk [vmem:[#allocation2 + $0xa1] sm:$0x1] %vm420_vm1, %v445_v60  ;;  %464 = vst.msk [vmem:[#allocation2 + $0xb9] sm:$0x1] %vm420_vm1, %v446_v62  ;;  %v447_v4 = vld [vmem:[#allocation2 + $0xcf] sm:$0x1] }
  0x48   : > { %9375 = vmatmul.mubr.msk.f32.gmra.mrb[16].mxu0 %vm364_vm0, %v11527_v56  ;;  %465 = vst.msk [vmem:[#allocation2 + $0xd1] sm:$0x1] %vm420_vm1, %v447_v4  ;;  %v448_v5 = vld [vmem:[#allocation2 + $0xe7] sm:$0x1]  ;;  %v449_v7 = vld [vmem:[#allocation2 + $0xff] sm:$0x1] }
  0x49   : > { %9377 = vmatprep.mubr.msk.f32.mxu0 %vm364_vm0, %v11530_v58  ;;  %466 = vst.msk [vmem:[#allocation2 + $0xe9] sm:$0x1] %vm420_vm1, %v448_v5  ;;  %467 = vst.msk [vmem:[#allocation2 + $0x101] sm:$0x1] %vm420_vm1, %v449_v7  ;;  %v450_v21 = vld [vmem:[#allocation2 + $0x117] sm:$0x1] }
  0x4a   : > { %v11551_v22 = vld [vmem:[#allocation2 + $0xf9] sm:$0xff]  ;;  %468 = vst.msk [vmem:[#allocation2 + $0x119] sm:$0x1] %vm420_vm1, %v450_v21  ;;  %v11554_v35 = vld [vmem:[#allocation2 + $0x109] sm:$0xff]  ;;  %v11561_v40 = vld [vmem:[#allocation2 + $0x111] sm:$0xff] }
  0x4b   : > { %v451_v38 = vld [vmem:[#allocation2 + $0x12f] sm:$0x1]  ;;  %v11563_v52 = vld [vmem:[#allocation2 + $0x121] sm:$0xff]  ;;  %v11572_v59 = vld [vmem:[#allocation2 + $0x139] sm:$0xff] }
  0x4c   : > { %9378 = vmatmul.mubr.msk.f32.gmra.mrb[18].mxu0 %vm364_vm0, %v11539_v0  ;;  %469 = vst.msk [vmem:[#allocation2 + $0x131] sm:$0x1] %vm420_vm1, %v451_v38  ;;  %v452_v54 = vld [vmem:[#allocation2 + $0x147] sm:$0x1]  ;;  %v11570_v57 = vld [vmem:[#allocation2 + $0x129] sm:$0xff]  ;;  %13839 = vst [vmem:[#allocation36_spill] sm:$0xff] %v11572_v59 }
  0x4d   : > { %9380 = vmatprep.mubr.msk.f32.mxu0 %vm364_vm0, %v11542_v2  ;;  %470 = vst.msk [vmem:[#allocation2 + $0x149] sm:$0x1] %vm420_vm1, %v452_v54  ;;  %v453_v60 = vld [vmem:[#allocation2 + $0x15f] sm:$0x1]  ;;  %v11579_v62 = vld [vmem:[#allocation2 + $0x141] sm:$0xff]  ;;  %v11581_v4 = vld [vmem:[#allocation2 + $0x151] sm:$0xff] }
  0x4e   : > { %471 = vst.msk [vmem:[#allocation2 + $0x161] sm:$0x1] %vm420_vm1, %v453_v60  ;;  %13840 = vst [vmem:[#allocation37_spill] sm:$0xff] %v11579_v62  ;;  %v454_v5 = vld [vmem:[#allocation2 + $0x177] sm:$0x1]  ;;  %v11588_v7 = vld [vmem:[#allocation2 + $0x159] sm:$0xff] }
  0x4f   : > { %13841 = vst [vmem:[#allocation38_spill] sm:$0xff] %v11581_v4  ;;  %472 = vst.msk [vmem:[#allocation2 + $0x179] sm:$0x1] %vm420_vm1, %v454_v5  ;;  %v11590_v21 = vld [vmem:[#allocation2 + $0x169] sm:$0xff]  ;;  %v11596_v38 = vld [vmem:[#allocation2 + $0x171] sm:$0xff] }
  0x50   : > { %9381 = vmatmul.mubr.msk.f32.gmra.mrb[20].mxu0 %vm364_vm0, %v11551_v22  ;;  %13842 = vst [vmem:[#allocation39_spill] sm:$0xff] %v11588_v7  ;;  %13843 = vst [vmem:[#allocation40_spill] sm:$0xff] %v11590_v21  ;;  %v475_v54 = vld [vmem:[#allocation2] sm:$0xff]  ;;  %v8105_v60 = vld [vmem:[%s13641_s1 + $0x50] sm:$0xff] }
  0x51   : > { %9383 = vmatprep.mubr.msk.f32.mxu0 %vm364_vm0, %v11554_v35  ;;  %13844 = vst [vmem:[#allocation41_spill] sm:$0xff] %v11596_v38  ;;  %v8106_v5 = vld [vmem:[%s13641_s1 + $0x58] sm:$0xff]  ;;  %v11621_v46 = vld [vmem:[#allocation2 + $0x30] sm:$0xff]  ;;  %v11664_v31 = vld [vmem:[#allocation2 + $0xa8] sm:$0xff] }
  0x52   : > { %v11607_v50 = vld [vmem:[#allocation2 + $0x18] sm:$0xff]  ;;  %v10386_v49 = vpack.c.bf16 %v8106_v5, %v8105_v60  ;;  %v11623_v60 = vpack.c.bf16 %v8140_v47, %v8139_v48  ;;  %v11638_v47 = vld [vmem:[#allocation2 + $0x50] sm:$0xff]  ;;  %v11640_v48 = vld [vmem:[#allocation2 + $0x60] sm:$0xff] }
  0x53   : > { %v11629_v5 = vld [vmem:[#allocation2 + $0x38] sm:$0xff]  ;;  %v11656_v33 = vld [vmem:[#allocation2 + $0x90] sm:$0xff]  ;;  %v11672_v29 = vld [vmem:[#allocation2 + $0xc0] sm:$0xff] }
  0x54   : > { %9384 = vmatmul.mubr.msk.f32.gmra.mrb[22].mxu0 %vm364_vm0, %v11561_v40  ;;  %v11670_v30 = vld [vmem:[#allocation2 + $0xb0] sm:$0xff]  ;;  %v11678_v28 = vld [vmem:[#allocation2 + $0xc8] sm:$0xff]  ;;  %v11680_v27 = vld [vmem:[#allocation2 + $0xd8] sm:$0xff] }
  0x55   : > { %9386 = vmatprep.mubr.msk.f32.mxu0 %vm364_vm0, %v11563_v52  ;;  %v11686_v26 = vld [vmem:[#allocation2 + $0xe0] sm:$0xff]  ;;  %v11688_v25 = vld [vmem:[#allocation2 + $0xf0] sm:$0xff]  ;;  %v11694_v24 = vld [vmem:[#allocation2 + $0xf8] sm:$0xff] }
  0x56   : > { %v11696_v23 = vld [vmem:[#allocation2 + $0x108] sm:$0xff]  ;;  %v11702_v20 = vld [vmem:[#allocation2 + $0x110] sm:$0xff]  ;;  %v11704_v19 = vld [vmem:[#allocation2 + $0x120] sm:$0xff] }
  0x57   : > { %v11707_v18 = vld [vmem:[%s11267_s25 + $0xf0] sm:$0xff]  ;;  %v11715_v17 = vld [vmem:[#allocation2 + $0x128] sm:$0xff]  ;;  %v11717_v16 = vld [vmem:[#allocation2 + $0x138] sm:$0xff] }
  0x58   : > { %9387 = vmatmul.mubr.msk.f32.gmra.mrb[24].mxu0 %vm364_vm0, %v11570_v57  ;;  %13845 = vst [vmem:[#allocation42_spill] sm:$0xff] %v11707_v18  ;;  %395 = vst.msk [vmem:[#allocation2 + $0x181] sm:$0xff] %vm364_vm0, %v11707_v18  ;;  %v11723_v15 = vld [vmem:[#allocation2 + $0x140] sm:$0xff]  ;;  %v11725_v14 = vld [vmem:[#allocation2 + $0x150] sm:$0xff] }
  0x59   : > { %9389 = vmatprep.mubr.msk.f32.mxu0 %vm364_vm0, %v11572_v59  ;;  %v11729_v13 = vld [vmem:[%s11267_s25 + $0xf8] sm:$0xff]  ;;  %v11739_v9 = vld [vmem:[#allocation2 + $0x168] sm:$0xff]  ;;  %s11080_s25 = sshll.u32 %s11143_s14, 4  ;;  %s11081_s25 = int_to_ptr.vmem [resolvable:$false] %s11080_s25 }
  0x5a   : > { %13846 = vst [vmem:[#allocation43_spill] sm:$0xff] %v11729_v13  ;;  %396 = vst.msk [vmem:[#allocation2 + $0x189] sm:$0xff] %vm364_vm0, %v11729_v13  ;;  %v11737_v10 = vld [vmem:[#allocation2 + $0x158] sm:$0xff]  ;;  %v1190_v12 = vld [vmem:[#allocation2 + $0x2] sm:$0xff]  ;;  %s11082_s16 = scalar_lea.vmem %s11081_s25, 8192  ;;  %p11083_p0 = scmp.lt.s32.totalorder %s13567_s24, %s11081_s25 }
  0x5b   : > { %v8141_v13 = vld [vmem:[%s13641_s1 + $0x70] sm:$0xff]  ;;  %v8142_v11 = vld [vmem:[%s13641_s1 + $0x78] sm:$0xff]  ;;  %p11084_p1 = scmp.lt.s32.totalorder %s11082_s16, %s11076_s29 }
  0x5c   : > { %9390 = vmatmul.mubr.msk.f32.gmra.mrb[26].mxu0 %vm364_vm0, %v11579_v62  ;;  %v8176_v62 = vld [vmem:[%s13641_s1 + $0x88] sm:$0xff]  ;;  %v11770_v59 = vld [vmem:[#allocation2 + $0x32] sm:$0xff] }
  0x5d   : > { %9392 = vmatprep.mubr.msk.f32.mxu0 %vm364_vm0, %v11581_v4  ;;  %v8175_v4 = vld [vmem:[%s13641_s1 + $0x80] sm:$0xff]  ;;  %p11085_p2 = por %p11084_p1, %p11083_p0 }
  0x5f   : > { %v418_v18 = vld [vmem:[#allocation2 + $0x182] sm:$0x1]  ;;  %p11086_p3 = pnand %p11085_p2, %p11079_p13 }
  0x60   : > { %9393 = vmatmul.mubr.msk.f32.gmra.mrb[28].mxu0 %vm364_vm0, %v11588_v7  ;;  %437 = vst.msk [vmem:[#allocation2 + $0x180] sm:$0x1] %vm420_vm1, %v418_v18  ;;  %v11745_v18 = vld [vmem:[#allocation2 + $0x170] sm:$0xff]  ;;  %v10394_v7 = vpack.c.bf16 %v8142_v11, %v8141_v13  ;;  %v11772_v11 = vpack.c.bf16 %v8176_v62, %v8175_v4  ;;  %v11778_v13 = vld [vmem:[#allocation2 + $0x3a] sm:$0xff]  ;;  %v11789_v4 = vld [vmem:[#allocation2 + $0x62] sm:$0xff] }
  0x61   : > { %9395 = vmatprep.mubr.msk.f32.mxu0 %vm364_vm0, %v11590_v21  ;;  %v11756_v21 = vld [vmem:[#allocation2 + $0x1a] sm:$0xff]  ;;  %13847 = vst [vmem:[#allocation44_spill] sm:$0xff] %v11778_v13  ;;  %v11787_v62 = vld [vmem:[#allocation2 + $0x52] sm:$0xff]  ;;  %13850 = vst [vmem:[#allocation47_spill] sm:$0xff] %v11789_v4 }
  0x62   : > { %13849 = vst [vmem:[#allocation46_spill] sm:$0xff] %v11787_v62 }
  0x64   : > { %9396 = vmatmul.mubr.msk.f32.gmra.mrb[30].mxu0 %vm364_vm0, %v11596_v38  ;;  %v1191_v38 = vld [vmem:[#allocation2 + $0xa] sm:$0xff] }
  0x65   : > { %9406 = vmatprep.mubr.msk.f32.mxu0 %vm364_vm0, %v475_v54  ;;  %v11619_v54 = vld [vmem:[#allocation2 + $0x20] sm:$0xff] }
  0x68   : > { %9407 = vmatmul.mubr.msk.f32.vlgmr.msra.gmra.mrb[0].mxu0 %vm364_vm0, %v476_v51  ;;  %v11648_v51 = vld [vmem:[#allocation2 + $0x78] sm:$0xff] }
  0x69   : > { %10385 = vmatpush3.bf16.msra.mxu0 %v11419_v43  ;;  %9409 = vmatprep.mubr.msk.f32.mxu0 %vm364_vm0, %v11607_v50  ;;  %v11631_v43 = vld [vmem:[#allocation2 + $0x48] sm:$0xff] }
  0x6a   : > { %10387 = vmatprep.subr.bf16.mxu0 %v10386_v49 }
  0x6c   : > { %9410 = vmatmul.mubr.msk.f32.gmra.mrb[2].mxu0 %vm364_vm0, %v11619_v54 }
  0x6d   : > { %9412 = vmatprep.mubr.msk.f32.mxu0 %vm364_vm0, %v11621_v46  ;;  %10389 = vmatpush3.bf16.msra.mxu0 %v10386_v49  ;;  %v11646_v49 = vld [vmem:[#allocation2 + $0x68] sm:$0xff] }
  0x6e   : > { %10391 = vmatprep.subr.bf16.mxu0 %v11623_v60 }
  0x70   : > { %9413 = vmatmul.mubr.msk.f32.gmra.mrb[4].mxu0 %vm364_vm0, %v11629_v5 }
  0x71   : > { %9415 = vmatprep.mubr.msk.f32.mxu0 %vm364_vm0, %v11631_v43 }
  0x74   : > { %9416 = vmatmul.mubr.msk.f32.gmra.mrb[6].mxu0 %vm364_vm0, %v11638_v47 }
  0x75   : > { %9418 = vmatprep.mubr.msk.f32.mxu0 %vm364_vm0, %v11640_v48 }
  0x78   : > { %9419 = vmatmul.mubr.msk.f32.gmra.mrb[8].mxu0 %vm364_vm0, %v11646_v49 }
  0x79   : > { %9421 = vmatprep.mubr.msk.f32.mxu0 %vm364_vm0, %v11648_v51 }
  0x7c   : > { %9422 = vmatmul.mubr.msk.f32.gmra.mrb[10].mxu0 %vm364_vm0, %v11654_v34 }
  0x7d   : > { %9424 = vmatprep.mubr.msk.f32.mxu0 %vm364_vm0, %v11656_v33 }
  0x80   : > { %9425 = vmatmul.mubr.msk.f32.gmra.mrb[12].mxu0 %vm364_vm0, %v11662_v32 }
  0x81   : > { %9427 = vmatprep.mubr.msk.f32.mxu0 %vm364_vm0, %v11664_v31 }
  0x84   : > { %9428 = vmatmul.mubr.msk.f32.gmra.mrb[14].mxu0 %vm364_vm0, %v11670_v30 }
  0x85   : > { %9430 = vmatprep.mubr.msk.f32.mxu0 %vm364_vm0, %v11672_v29 }
  0x88   : > { %9431 = vmatmul.mubr.msk.f32.gmra.mrb[16].mxu0 %vm364_vm0, %v11678_v28 }
  0x89   : > { %9433 = vmatprep.mubr.msk.f32.mxu0 %vm364_vm0, %v11680_v27 }
  0x8c   : > { %9434 = vmatmul.mubr.msk.f32.gmra.mrb[18].mxu0 %vm364_vm0, %v11686_v26 }
  0x8d   : > { %9436 = vmatprep.mubr.msk.f32.mxu0 %vm364_vm0, %v11688_v25 }
  0x90   : > { %9437 = vmatmul.mubr.msk.f32.gmra.mrb[20].mxu0 %vm364_vm0, %v11694_v24 }
  0x91   : > { %9439 = vmatprep.mubr.msk.f32.mxu0 %vm364_vm0, %v11696_v23 }
  0x94   : > { %9440 = vmatmul.mubr.msk.f32.gmra.mrb[22].mxu0 %vm364_vm0, %v11702_v20 }
  0x95   : > { %9442 = vmatprep.mubr.msk.f32.mxu0 %vm364_vm0, %v11704_v19 }
  0x98   : > { %9443 = vmatmul.mubr.msk.f32.gmra.mrb[24].mxu0 %vm364_vm0, %v11715_v17 }
  0x99   : > { %9445 = vmatprep.mubr.msk.f32.mxu0 %vm364_vm0, %v11717_v16 }
  0x9c   : > { %9446 = vmatmul.mubr.msk.f32.gmra.mrb[26].mxu0 %vm364_vm0, %v11723_v15 }
  0x9d   : > { %9448 = vmatprep.mubr.msk.f32.mxu0 %vm364_vm0, %v11725_v14 }
  0xa0   : > { %9449 = vmatmul.mubr.msk.f32.gmra.mrb[28].mxu0 %vm364_vm0, %v11737_v10 }
  0xa1   : > { %9451 = vmatprep.mubr.msk.f32.mxu0 %vm364_vm0, %v11739_v9 }
  0xa4   : > { %9452 = vmatmul.mubr.msk.f32.gmra.mrb[30].mxu0 %vm364_vm0, %v11745_v18 }
  0xa5   : > { %9462 = vmatprep.mubr.msk.f32.mxu0 %vm364_vm0, %v1190_v12  ;;  %v11768_v12 = vld [vmem:[#allocation2 + $0x22] sm:$0xff] }
  0xa8   : > { %9463 = vmatmul.mubr.msk.f32.vlgmr.msra.gmra.mrb[0].mxu0 %vm364_vm0, %v1191_v38  ;;  %v11780_v38 = vld [vmem:[#allocation2 + $0x4a] sm:$0xff] }
  0xa9   : > { %10393 = vmatpush3.bf16.msra.mxu0 %v11623_v60  ;;  %9465 = vmatprep.mubr.msk.f32.mxu0 %vm364_vm0, %v11756_v21  ;;  %13848 = vst [vmem:[#allocation45_spill] sm:$0xff] %v11780_v38  ;;  %v11797_v60 = vld [vmem:[#allocation2 + $0x7a] sm:$0xff] }
  0xaa   : > { %10395 = vmatprep.subr.bf16.mxu0 %v10394_v7  ;;  %13852 = vst [vmem:[#allocation49_spill] sm:$0xff] %v11797_v60 }
  0xac   : > { %9466 = vmatmul.mubr.msk.f32.gmra.mrb[2].mxu0 %vm364_vm0, %v11768_v12 }
  0xad   : > { %9468 = vmatprep.mubr.msk.f32.mxu0 %vm364_vm0, %v11770_v59  ;;  %10397 = vmatpush3.bf16.msra.mxu0 %v10394_v7  ;;  %v11795_v7 = vld [vmem:[#allocation2 + $0x6a] sm:$0xff] }
  0xae   : > { %10399 = vmatprep.subr.bf16.mxu0 %v11772_v11  ;;  %13851 = vst [vmem:[#allocation48_spill] sm:$0xff] %v11795_v7 }
  0xb0   : > { %9469 = vmatmul.mubr.msk.f32.gmra.mrb[4].mxu0 %vm364_vm0, %v11778_v13  ;;  %v11805_v13 = vld [vmem:[#allocation2 + $0x92] sm:$0xff] }
  0xb1   : > { %9471 = vmatprep.mubr.msk.f32.mxu0 %vm364_vm0, %v11780_v38  ;;  %v11803_v38 = vld [vmem:[#allocation2 + $0x82] sm:$0xff]  ;;  %13854 = vst [vmem:[#allocation51_spill] sm:$0xff] %v11805_v13 }
  0xb2   : > { %13853 = vst [vmem:[#allocation50_spill] sm:$0xff] %v11803_v38 }
  0xb4   : > { %9472 = vmatmul.mubr.msk.f32.gmra.mrb[6].mxu0 %vm364_vm0, %v11787_v62  ;;  %v11813_v62 = vld [vmem:[#allocation2 + $0xaa] sm:$0xff] }
  0xb5   : > { %9474 = vmatprep.mubr.msk.f32.mxu0 %vm364_vm0, %v11789_v4  ;;  %v11811_v4 = vld [vmem:[#allocation2 + $0x9a] sm:$0xff]  ;;  %13856 = vst [vmem:[#allocation53_spill] sm:$0xff] %v11813_v62 }
  0xb6   : > { %13855 = vst [vmem:[#allocation52_spill] sm:$0xff] %v11811_v4 }
  0xb8   : > { %9475 = vmatmul.mubr.msk.f32.gmra.mrb[8].mxu0 %vm364_vm0, %v11795_v7  ;;  %v11821_v7 = vld [vmem:[#allocation2 + $0xc2] sm:$0xff] }
  0xb9   : > { %9477 = vmatprep.mubr.msk.f32.mxu0 %vm364_vm0, %v11797_v60  ;;  %v11819_v60 = vld [vmem:[#allocation2 + $0xb2] sm:$0xff]  ;;  %13858 = vst [vmem:[#allocation55_spill] sm:$0xff] %v11821_v7 }
  0xba   : > { %13857 = vst [vmem:[#allocation54_spill] sm:$0xff] %v11819_v60 }
  0xbc   : > { %9478 = vmatmul.mubr.msk.f32.gmra.mrb[10].mxu0 %vm364_vm0, %v11803_v38  ;;  %v11829_v38 = vld [vmem:[#allocation2 + $0xda] sm:$0xff] }
  0xbd   : > { %9480 = vmatprep.mubr.msk.f32.mxu0 %vm364_vm0, %v11805_v13  ;;  %v11827_v13 = vld [vmem:[#allocation2 + $0xca] sm:$0xff]  ;;  %13860 = vst [vmem:[#allocation57_spill] sm:$0xff] %v11829_v38 }
  0xbe   : > { %13859 = vst [vmem:[#allocation56_spill] sm:$0xff] %v11827_v13 }
  0xc0   : > { %9481 = vmatmul.mubr.msk.f32.gmra.mrb[12].mxu0 %vm364_vm0, %v11811_v4  ;;  %v11837_v4 = vld [vmem:[#allocation2 + $0xf2] sm:$0xff] }
  0xc1   : > { %9483 = vmatprep.mubr.msk.f32.mxu0 %vm364_vm0, %v11813_v62  ;;  %v11835_v62 = vld [vmem:[#allocation2 + $0xe2] sm:$0xff]  ;;  %13862 = vst [vmem:[#allocation59_spill] sm:$0xff] %v11837_v4 }
  0xc2   : > { %13861 = vst [vmem:[#allocation58_spill] sm:$0xff] %v11835_v62 }
  0xc4   : > { %9484 = vmatmul.mubr.msk.f32.gmra.mrb[14].mxu0 %vm364_vm0, %v11819_v60  ;;  %v11845_v60 = vld [vmem:[#allocation2 + $0x10a] sm:$0xff] }
  0xc5   : > { %9486 = vmatprep.mubr.msk.f32.mxu0 %vm364_vm0, %v11821_v7  ;;  %v11843_v7 = vld [vmem:[#allocation2 + $0xfa] sm:$0xff]  ;;  %13864 = vst [vmem:[#allocation61_spill] sm:$0xff] %v11845_v60 }
  0xc6   : > { %13863 = vst [vmem:[#allocation60_spill] sm:$0xff] %v11843_v7 }
  0xc8   : > { %9487 = vmatmul.mubr.msk.f32.gmra.mrb[16].mxu0 %vm364_vm0, %v11827_v13  ;;  %v11853_v13 = vld [vmem:[#allocation2 + $0x122] sm:$0xff] }
  0xc9   : > { %9489 = vmatprep.mubr.msk.f32.mxu0 %vm364_vm0, %v11829_v38  ;;  %v11851_v38 = vld [vmem:[#allocation2 + $0x112] sm:$0xff]  ;;  %13866 = vst [vmem:[#allocation63_spill] sm:$0xff] %v11853_v13 }
  0xca   : > { %13865 = vst [vmem:[#allocation62_spill] sm:$0xff] %v11851_v38 }
  0xcc   : > { %9490 = vmatmul.mubr.msk.f32.gmra.mrb[18].mxu0 %vm364_vm0, %v11835_v62  ;;  %v11861_v62 = vld [vmem:[#allocation2 + $0x13a] sm:$0xff] }
  0xcd   : > { %9492 = vmatprep.mubr.msk.f32.mxu0 %vm364_vm0, %v11837_v4  ;;  %v11859_v4 = vld [vmem:[#allocation2 + $0x12a] sm:$0xff]  ;;  %13868 = vst [vmem:[#allocation65_spill] sm:$0xff] %v11861_v62 }
  0xce   : > { %13867 = vst [vmem:[#allocation64_spill] sm:$0xff] %v11859_v4 }
  0xd0   : > { %9493 = vmatmul.mubr.msk.f32.gmra.mrb[20].mxu0 %vm364_vm0, %v11843_v7  ;;  %v11869_v7 = vld [vmem:[#allocation2 + $0x152] sm:$0xff] }
  0xd1   : > { %9495 = vmatprep.mubr.msk.f32.mxu0 %vm364_vm0, %v11845_v60  ;;  %v11867_v60 = vld [vmem:[#allocation2 + $0x142] sm:$0xff]  ;;  %13870 = vst [vmem:[#allocation67_spill] sm:$0xff] %v11869_v7 }
  0xd2   : > { %13869 = vst [vmem:[#allocation66_spill] sm:$0xff] %v11867_v60 }
  0xd4   : > { %9496 = vmatmul.mubr.msk.f32.gmra.mrb[22].mxu0 %vm364_vm0, %v11851_v38  ;;  %v11877_v38 = vld [vmem:[#allocation2 + $0x16a] sm:$0xff] }
  0xd5   : > { %9498 = vmatprep.mubr.msk.f32.mxu0 %vm364_vm0, %v11853_v13  ;;  %v11875_v13 = vld [vmem:[#allocation2 + $0x15a] sm:$0xff]  ;;  %13872 = vst [vmem:[#allocation69_spill] sm:$0xff] %v11877_v38 }
  0xd6   : > { %13871 = vst [vmem:[#allocation68_spill] sm:$0xff] %v11875_v13 }
  0xd8   : > { %9499 = vmatmul.mubr.msk.f32.gmra.mrb[24].mxu0 %vm364_vm0, %v11859_v4  ;;  %v8177_v4 = vld [vmem:[%s13641_s1 + $0x90] sm:$0xff] }
  0xd9   : > { %9501 = vmatprep.mubr.msk.f32.mxu0 %vm364_vm0, %v11861_v62  ;;  %v11883_v62 = vld [vmem:[#allocation2 + $0x172] sm:$0xff] }
  0xda   : > { %13873 = vst [vmem:[#allocation70_spill] sm:$0xff] %v11883_v62 }
  0xdc   : > { %9502 = vmatmul.mubr.msk.f32.gmra.mrb[26].mxu0 %vm364_vm0, %v11867_v60  ;;  %v8212_v60 = vld [vmem:[%s13641_s1 + $0xa8] sm:$0xff] }
  0xdd   : > { %9504 = vmatprep.mubr.msk.f32.mxu0 %vm364_vm0, %v11869_v7  ;;  %v8178_v7 = vld [vmem:[%s13641_s1 + $0x98] sm:$0xff] }
  0xe0   : > { %9505 = vmatmul.mubr.msk.f32.gmra.mrb[28].mxu0 %vm364_vm0, %v11875_v13  ;;  %v10402_v13 = vpack.c.bf16 %v8178_v7, %v8177_v4  ;;  %v8247_v7 = vld [vmem:[%s13641_s1 + $0xc0] sm:$0xff] }
  0xe1   : > { %9507 = vmatprep.mubr.msk.f32.mxu0 %vm364_vm0, %v11877_v38  ;;  %v8211_v38 = vld [vmem:[%s13641_s1 + $0xa0] sm:$0xff] }
  0xe4   : > { %9508 = vmatmul.mubr.msk.f32.gmra.mrb[30].mxu0 %vm364_vm0, %v11883_v62  ;;  %v10406_v62 = vpack.c.bf16 %v8212_v60, %v8211_v38  ;;  %v8214_v38 = vld [vmem:[%s13641_s1 + $0xb8] sm:$0xff]  ;;  %v8248_v60 = vld [vmem:[%s13641_s1 + $0xc8] sm:$0xff] }
  0xe5   : > { %9518 = vmatprep.mubr.msk.f32.mxu0 %vm364_vm0, %v11607_v50  ;;  %v455_v50 = vld [vmem:[#allocation2 + $0x18f] sm:$0x1] }
  0xe6   : > { %473 = vst.msk [vmem:[#allocation2 + $0x191] sm:$0x1] %vm420_vm1, %v455_v50  ;;  %v10414_v50 = vpack.c.bf16 %v8248_v60, %v8247_v7  ;;  %v13895_v7 = vld [vmem:[#allocation59_spill] sm:$0xff]  ;;  %v13896_v60 = vld [vmem:[#allocation60_spill] sm:$0xff] }
  0xe8   : > { %9519 = vmatmul.mubr.msk.f32.vlgmr.msra.gmra.mrb[0].mxu0 %vm364_vm0, %v11619_v54  ;;  %v11959_v54 = vld [vmem:[#allocation2 + $0x180] sm:$0xff] }
  0xe9   : > { %10401 = vmatpush3.bf16.msra.mxu0 %v11772_v11  ;;  %9521 = vmatprep.mubr.msk.f32.mxu0 %vm364_vm0, %v11621_v46  ;;  %v11965_v11 = vld [vmem:[#allocation2 + $0x188] sm:$0xff] }
  0xea   : > { %10403 = vmatprep.subr.bf16.mxu0 %v10402_v13 }
  0xec   : > { %9522 = vmatmul.mubr.msk.f32.gmra.mrb[2].mxu0 %vm364_vm0, %v11629_v5 }
  0xed   : > { %9524 = vmatprep.mubr.msk.f32.mxu0 %vm364_vm0, %v11631_v43  ;;  %10405 = vmatpush3.bf16.msra.mxu0 %v10402_v13  ;;  %v8213_v13 = vld [vmem:[%s13641_s1 + $0xb0] sm:$0xff] }
  0xee   : > { %10407 = vmatprep.subr.bf16.mxu0 %v10406_v62  ;;  %v10410_v4 = vpack.c.bf16 %v8214_v38, %v8213_v13  ;;  %v13892_v13 = vld [vmem:[#allocation56_spill] sm:$0xff]  ;;  %v13893_v38 = vld [vmem:[#allocation57_spill] sm:$0xff] }
  0xf0   : > { %9525 = vmatmul.mubr.msk.f32.gmra.mrb[4].mxu0 %vm364_vm0, %v11638_v47 }
  0xf1   : > { %9527 = vmatprep.mubr.msk.f32.mxu0 %vm364_vm0, %v11640_v48 }
  0xf4   : > { %9528 = vmatmul.mubr.msk.f32.gmra.mrb[6].mxu0 %vm364_vm0, %v11646_v49 }
  0xf5   : > { %9530 = vmatprep.mubr.msk.f32.mxu0 %vm364_vm0, %v11648_v51 }
  0xf8   : > { %9531 = vmatmul.mubr.msk.f32.gmra.mrb[8].mxu0 %vm364_vm0, %v11654_v34 }
  0xf9   : > { %9533 = vmatprep.mubr.msk.f32.mxu0 %vm364_vm0, %v11656_v33 }
  0xfc   : > { %9534 = vmatmul.mubr.msk.f32.gmra.mrb[10].mxu0 %vm364_vm0, %v11662_v32 }
  0xfd   : > { %9536 = vmatprep.mubr.msk.f32.mxu0 %vm364_vm0, %v11664_v31 }
 0x100   : > { %9537 = vmatmul.mubr.msk.f32.gmra.mrb[12].mxu0 %vm364_vm0, %v11670_v30 }
 0x101   : > { %9539 = vmatprep.mubr.msk.f32.mxu0 %vm364_vm0, %v11672_v29 }
 0x104   : > { %9540 = vmatmul.mubr.msk.f32.gmra.mrb[14].mxu0 %vm364_vm0, %v11678_v28 }
 0x105   : > { %9542 = vmatprep.mubr.msk.f32.mxu0 %vm364_vm0, %v11680_v27 }
 0x108   : > { %9543 = vmatmul.mubr.msk.f32.gmra.mrb[16].mxu0 %vm364_vm0, %v11686_v26 }
 0x109   : > { %9545 = vmatprep.mubr.msk.f32.mxu0 %vm364_vm0, %v11688_v25 }
 0x10c   : > { %9546 = vmatmul.mubr.msk.f32.gmra.mrb[18].mxu0 %vm364_vm0, %v11694_v24 }
 0x10d   : > { %9548 = vmatprep.mubr.msk.f32.mxu0 %vm364_vm0, %v11696_v23 }
 0x110   : > { %9549 = vmatmul.mubr.msk.f32.gmra.mrb[20].mxu0 %vm364_vm0, %v11702_v20 }
 0x111   : > { %9551 = vmatprep.mubr.msk.f32.mxu0 %vm364_vm0, %v11704_v19 }
 0x114   : > { %9552 = vmatmul.mubr.msk.f32.gmra.mrb[22].mxu0 %vm364_vm0, %v11715_v17 }
 0x115   : > { %9554 = vmatprep.mubr.msk.f32.mxu0 %vm364_vm0, %v11717_v16 }
 0x118   : > { %9555 = vmatmul.mubr.msk.f32.gmra.mrb[24].mxu0 %vm364_vm0, %v11723_v15 }
 0x119   : > { %9557 = vmatprep.mubr.msk.f32.mxu0 %vm364_vm0, %v11725_v14 }
 0x11c   : > { %9558 = vmatmul.mubr.msk.f32.gmra.mrb[26].mxu0 %vm364_vm0, %v11737_v10 }
 0x11d   : > { %9560 = vmatprep.mubr.msk.f32.mxu0 %vm364_vm0, %v11739_v9 }
 0x120   : > { %9561 = vmatmul.mubr.msk.f32.gmra.mrb[28].mxu0 %vm364_vm0, %v11745_v18 }
 0x121   : > { %9563 = vmatprep.mubr.msk.f32.mxu0 %vm364_vm0, %v11959_v54 }
 0x124   : > { %9564 = vmatmul.mubr.msk.f32.gmra.mrb[30].mxu0 %vm364_vm0, %v11965_v11 }
 0x125   : > { %9574 = vmatprep.mubr.msk.f32.mxu0 %vm364_vm0, %v11396_v37  ;;  %v13874_v37 = vld [vmem:[#allocation36_spill] sm:$0xff] }
 0x128   : > { %9575 = vmatmul.mubr.msk.f32.vlgmr.msra.gmra.mrb[0].mxu0 %vm364_vm0, %v11415_v41  ;;  %v13875_v41 = vld [vmem:[#allocation37_spill] sm:$0xff] }
 0x129   : > { %10409 = vmatpush3.bf16.msra.mxu0 %v10406_v62  ;;  %9577 = vmatprep.mubr.msk.f32.mxu0 %vm364_vm0, %v11417_v42  ;;  %v13876_v42 = vld [vmem:[#allocation38_spill] sm:$0xff]  ;;  %v13891_v62 = vld [vmem:[#allocation55_spill] sm:$0xff] }
 0x12a   : > { %10411 = vmatprep.subr.bf16.mxu0 %v10410_v4 }
 0x12c   : > { %9578 = vmatmul.mubr.msk.f32.gmra.mrb[2].mxu0 %vm364_vm0, %v11425_v44  ;;  %v419_v44 = vld [vmem:[#allocation2 + $0x19a] sm:$0x1] }
 0x12d   : > { %9580 = vmatprep.mubr.msk.f32.mxu0 %vm364_vm0, %v11427_v45  ;;  %10413 = vmatpush3.bf16.msra.mxu0 %v10410_v4  ;;  %438 = vst.msk [vmem:[#allocation2 + $0x198] sm:$0x1] %vm420_vm1, %v419_v44  ;;  %v13877_v45 = vld [vmem:[#allocation39_spill] sm:$0xff]  ;;  %v13894_v4 = vld [vmem:[#allocation58_spill] sm:$0xff]  ;;  %v13901_v44 = vld [vmem:[#allocation65_spill] sm:$0xff] }
 0x12e   : > { %10415 = vmatprep.subr.bf16.mxu0 %v10414_v50 }
 0x130   : > { %9581 = vmatmul.mubr.msk.f32.gmra.mrb[4].mxu0 %vm364_vm0, %v11460_v53  ;;  %v13878_v53 = vld [vmem:[#allocation40_spill] sm:$0xff] }
 0x131   : > { %9583 = vmatprep.mubr.msk.f32.mxu0 %vm364_vm0, %v11471_v55  ;;  %v12040_v55 = vld [vmem:[#allocation2 + $0x181] sm:$0xff] }
 0x134   : > { %9584 = vmatmul.mubr.msk.f32.gmra.mrb[6].mxu0 %vm364_vm0, %v11481_v61  ;;  %v13879_v61 = vld [vmem:[#allocation41_spill] sm:$0xff] }
 0x135   : > { %9586 = vmatprep.mubr.msk.f32.mxu0 %vm364_vm0, %v11485_v63  ;;  %v12046_v63 = vld [vmem:[#allocation2 + $0x189] sm:$0xff] }
 0x138   : > { %9587 = vmatmul.mubr.msk.f32.gmra.mrb[8].mxu0 %vm364_vm0, %v11493_v1  ;;  %v8249_v1 = vld [vmem:[%s13641_s1 + $0xd0] sm:$0xff] }
 0x139   : > { %9589 = vmatprep.mubr.msk.f32.mxu0 %vm364_vm0, %v11495_v3  ;;  %v8250_v3 = vld [vmem:[%s13641_s1 + $0xd8] sm:$0xff] }
 0x13c   : > { %9590 = vmatmul.mubr.msk.f32.gmra.mrb[10].mxu0 %vm364_vm0, %v11504_v6  ;;  %v10418_v6 = vpack.c.bf16 %v8250_v3, %v8249_v1  ;;  %v13905_v1 = vld [vmem:[#allocation69_spill] sm:$0xff] }
 0x13d   : > { %9592 = vmatprep.mubr.msk.f32.mxu0 %vm364_vm0, %v11506_v8  ;;  %v8283_v8 = vld [vmem:[%s13641_s1 + $0xe0] sm:$0xff] }
 0x13e   : > { %v12120_v3 = vld [vmem:[#allocation2 + $0x182] sm:$0xff] }
 0x13f   : > { %13906 = vst [vmem:[#allocation36_spill] sm:$0xff] %v12120_v3 }
 0x140   : > { %9593 = vmatmul.mubr.msk.f32.gmra.mrb[12].mxu0 %vm364_vm0, %v11516_v36  ;;  %v8284_v36 = vld [vmem:[%s13641_s1 + $0xe8] sm:$0xff] }
 0x141   : > { %9595 = vmatprep.mubr.msk.f32.mxu0 %vm364_vm0, %v11518_v39  ;;  %v10422_v39 = vpack.c.bf16 %v8284_v36, %v8283_v8  ;;  %v12126_v8 = vld [vmem:[#allocation2 + $0x18a] sm:$0xff] }
 0x142   : > { %13908 = vst [vmem:[#allocation37_spill] sm:$0xff] %v12126_v8  ;;  %v8285_v36 = vld [vmem:[%s13641_s1 + $0xf0] sm:$0xff] }
 0x144   : > { %9596 = vmatmul.mubr.msk.f32.gmra.mrb[14].mxu0 %vm364_vm0, %v11527_v56  ;;  %v13880_v56 = vld [vmem:[#allocation44_spill] sm:$0xff] }
 0x145   : > { %9598 = vmatprep.mubr.msk.f32.mxu0 %vm364_vm0, %v11530_v58  ;;  %v13881_v58 = vld [vmem:[#allocation45_spill] sm:$0xff] }
 0x148   : > { %9599 = vmatmul.mubr.msk.f32.gmra.mrb[16].mxu0 %vm364_vm0, %v11539_v0  ;;  %v13882_v0 = vld [vmem:[#allocation46_spill] sm:$0xff] }
 0x149   : > { %9601 = vmatprep.mubr.msk.f32.mxu0 %vm364_vm0, %v11542_v2  ;;  %v13883_v2 = vld [vmem:[#allocation47_spill] sm:$0xff] }
 0x14c   : > { %9602 = vmatmul.mubr.msk.f32.gmra.mrb[18].mxu0 %vm364_vm0, %v11551_v22  ;;  %v13884_v22 = vld [vmem:[#allocation48_spill] sm:$0xff] }
 0x14d   : > { %9604 = vmatprep.mubr.msk.f32.mxu0 %vm364_vm0, %v11554_v35  ;;  %v13885_v35 = vld [vmem:[#allocation49_spill] sm:$0xff] }
 0x150   : > { %9605 = vmatmul.mubr.msk.f32.gmra.mrb[20].mxu0 %vm364_vm0, %v11561_v40  ;;  %v13886_v40 = vld [vmem:[#allocation50_spill] sm:$0xff] }
 0x151   : > { %9607 = vmatprep.mubr.msk.f32.mxu0 %vm364_vm0, %v11563_v52  ;;  %v13887_v52 = vld [vmem:[#allocation51_spill] sm:$0xff] }
 0x154   : > { %9608 = vmatmul.mubr.msk.f32.gmra.mrb[22].mxu0 %vm364_vm0, %v11570_v57  ;;  %v13888_v57 = vld [vmem:[#allocation52_spill] sm:$0xff] }
 0x155   : > { %9610 = vmatprep.mubr.msk.f32.mxu0 %vm364_vm0, %v13874_v37  ;;  %v13898_v37 = vld [vmem:[#allocation62_spill] sm:$0xff] }
 0x158   : > { %9611 = vmatmul.mubr.msk.f32.gmra.mrb[24].mxu0 %vm364_vm0, %v13875_v41  ;;  %v13899_v41 = vld [vmem:[#allocation63_spill] sm:$0xff] }
 0x159   : > { %9613 = vmatprep.mubr.msk.f32.mxu0 %vm364_vm0, %v13876_v42  ;;  %v13900_v42 = vld [vmem:[#allocation64_spill] sm:$0xff] }
 0x15c   : > { %9614 = vmatmul.mubr.msk.f32.gmra.mrb[26].mxu0 %vm364_vm0, %v13877_v45  ;;  %v13902_v45 = vld [vmem:[#allocation66_spill] sm:$0xff] }
 0x15d   : > { %9616 = vmatprep.mubr.msk.f32.mxu0 %vm364_vm0, %v13878_v53  ;;  %v13903_v53 = vld [vmem:[#allocation67_spill] sm:$0xff] }
 0x160   : > { %9617 = vmatmul.mubr.msk.f32.gmra.mrb[28].mxu0 %vm364_vm0, %v13879_v61  ;;  %v13904_v61 = vld [vmem:[#allocation68_spill] sm:$0xff] }
 0x161   : > { %9619 = vmatprep.mubr.msk.f32.mxu0 %vm364_vm0, %v12040_v55 }
 0x164   : > { %9620 = vmatmul.mubr.msk.f32.gmra.mrb[30].mxu0 %vm364_vm0, %v12046_v63 }
 0x165   : > { %9630 = vmatprep.mubr.msk.f32.mxu0 %vm364_vm0, %v11756_v21  ;;  %v13889_v21 = vld [vmem:[#allocation53_spill] sm:$0xff] }
 0x168   : > { %9631 = vmatmul.mubr.msk.f32.vlgmr.msra.gmra.mrb[0].mxu0 %vm364_vm0, %v11768_v12  ;;  %v13890_v12 = vld [vmem:[#allocation54_spill] sm:$0xff] }
 0x169   : > { %10417 = vmatpush3.bf16.msra.mxu0 %v10414_v50  ;;  %9633 = vmatprep.mubr.msk.f32.mxu0 %vm364_vm0, %v11770_v59  ;;  %v13897_v50 = vld [vmem:[#allocation61_spill] sm:$0xff] }
 0x16a   : > { %10419 = vmatprep.subr.bf16.mxu0 %v10418_v6 }
 0x16c   : > { %9634 = vmatmul.mubr.msk.f32.gmra.mrb[2].mxu0 %vm364_vm0, %v13880_v56 }
 0x16d   : > { %9636 = vmatprep.mubr.msk.f32.mxu0 %vm364_vm0, %v13881_v58  ;;  %10421 = vmatpush3.bf16.msra.mxu0 %v10418_v6  ;;  %v13907_v6 = vld [vmem:[#allocation70_spill] sm:$0xff] }
 0x16e   : > { %10423 = vmatprep.subr.bf16.mxu0 %v10422_v39 }
 0x170   : > { %9637 = vmatmul.mubr.msk.f32.gmra.mrb[4].mxu0 %vm364_vm0, %v13882_v0 }
 0x171   : > { %9639 = vmatprep.mubr.msk.f32.mxu0 %vm364_vm0, %v13883_v2 }
 0x174   : > { %9640 = vmatmul.mubr.msk.f32.gmra.mrb[6].mxu0 %vm364_vm0, %v13884_v22 }
 0x175   : > { %9642 = vmatprep.mubr.msk.f32.mxu0 %vm364_vm0, %v13885_v35 }
 0x178   : > { %9643 = vmatmul.mubr.msk.f32.gmra.mrb[8].mxu0 %vm364_vm0, %v13886_v40 }
 0x179   : > { %9645 = vmatprep.mubr.msk.f32.mxu0 %vm364_vm0, %v13887_v52 }
 0x17c   : > { %9646 = vmatmul.mubr.msk.f32.gmra.mrb[10].mxu0 %vm364_vm0, %v13888_v57 }
 0x17d   : > { %9648 = vmatprep.mubr.msk.f32.mxu0 %vm364_vm0, %v13889_v21 }
 0x180   : > { %9649 = vmatmul.mubr.msk.f32.gmra.mrb[12].mxu0 %vm364_vm0, %v13890_v12 }
 0x181   : > { %9651 = vmatprep.mubr.msk.f32.mxu0 %vm364_vm0, %v13891_v62 }
 0x184   : > { %9652 = vmatmul.mubr.msk.f32.gmra.mrb[14].mxu0 %vm364_vm0, %v13892_v13 }
 0x185   : > { %9654 = vmatprep.mubr.msk.f32.mxu0 %vm364_vm0, %v13893_v38 }
 0x188   : > { %9655 = vmatmul.mubr.msk.f32.gmra.mrb[16].mxu0 %vm364_vm0, %v13894_v4 }
 0x189   : > { %9657 = vmatprep.mubr.msk.f32.mxu0 %vm364_vm0, %v13895_v7 }
 0x18c   : > { %9658 = vmatmul.mubr.msk.f32.gmra.mrb[18].mxu0 %vm364_vm0, %v13896_v60 }
 0x18d   : > { %9660 = vmatprep.mubr.msk.f32.mxu0 %vm364_vm0, %v13897_v50 }
 0x190   : > { %9661 = vmatmul.mubr.msk.f32.gmra.mrb[20].mxu0 %vm364_vm0, %v13898_v37 }
 0x191   : > { %9663 = vmatprep.mubr.msk.f32.mxu0 %vm364_vm0, %v13899_v41 }
 0x194   : > { %9664 = vmatmul.mubr.msk.f32.gmra.mrb[22].mxu0 %vm364_vm0, %v13900_v42 }
 0x195   : > { %9666 = vmatprep.mubr.msk.f32.mxu0 %vm364_vm0, %v13901_v44 }
 0x198   : > { %9667 = vmatmul.mubr.msk.f32.gmra.mrb[24].mxu0 %vm364_vm0, %v13902_v45 }
 0x199   : > { %9669 = vmatprep.mubr.msk.f32.mxu0 %vm364_vm0, %v13903_v53 }
 0x19c   : > { %9670 = vmatmul.mubr.msk.f32.gmra.mrb[26].mxu0 %vm364_vm0, %v13904_v61  ;;  %v8286_v61 = vld [vmem:[%s13641_s1 + $0xf8] sm:$0xff] }
 0x19d   : > { %9672 = vmatprep.mubr.msk.f32.mxu0 %vm364_vm0, %v13905_v1  ;;  %v8320_v1 = vld [vmem:[%s13641_s1 + $0x108] sm:$0xff] }
 0x1a0   : > { %9673 = vmatmul.mubr.msk.f32.gmra.mrb[28].mxu0 %vm364_vm0, %v13907_v6  ;;  %v10426_v6 = vpack.c.bf16 %v8286_v61, %v8285_v36  ;;  %v3166_v61 = vld [vmem:[#allocation2 + $0x159] sm:$0xff] }
 0x1a1   : > { %9675 = vmatprep.mubr.msk.f32.mxu0 %vm364_vm0, %v12120_v3  ;;  %v8319_v3 = vld [vmem:[%s13641_s1 + $0x100] sm:$0xff] }
 0x1a4   : > { %9676 = vmatmul.mubr.msk.f32.gmra.mrb[30].mxu0 %vm364_vm0, %v12126_v8  ;;  %v10430_v8 = vpack.c.bf16 %v8320_v1, %v8319_v3  ;;  %v3167_v1 = vld [vmem:[#allocation2 + $0x169] sm:$0xff]  ;;  %v3168_v3 = vld [vmem:[#allocation2 + $0x171] sm:$0xff] }
 0x1a5   : > { %9686 = vmatprep.mubr.msk.f32.mxu0 %vm364_vm0, %v11621_v46  ;;  %v3155_v46 = vld [vmem:[#allocation2 + $0xd9] sm:$0xff] }
 0x1a8   : > { %9687 = vmatmul.mubr.msk.f32.vlgmr.msra.gmra.mrb[0].mxu0 %vm364_vm0, %v11629_v5  ;;  %v3156_v5 = vld [vmem:[#allocation2 + $0xe1] sm:$0xff] }
 0x1a9   : > { %10425 = vmatpush3.bf16.msra.mxu0 %v10422_v39  ;;  %9689 = vmatprep.mubr.msk.f32.mxu0 %vm364_vm0, %v11631_v43  ;;  %v3157_v43 = vld [vmem:[#allocation2 + $0xf1] sm:$0xff] }
 0x1aa   : > { %10427 = vmatprep.subr.bf16.mxu0 %v10426_v6  ;;  %v3165_v39 = vld [vmem:[#allocation2 + $0x151] sm:$0xff] }
 0x1ac   : > { %9690 = vmatmul.mubr.msk.f32.gmra.mrb[2].mxu0 %vm364_vm0, %v11638_v47  ;;  %v3158_v47 = vld [vmem:[#allocation2 + $0xf9] sm:$0xff] }
 0x1ad   : > { %9692 = vmatprep.mubr.msk.f32.mxu0 %vm364_vm0, %v11640_v48  ;;  %10429 = vmatpush3.bf16.msra.mxu0 %v10426_v6  ;;  %v3159_v48 = vld [vmem:[#allocation2 + $0x109] sm:$0xff]  ;;  %v3171_v6 = vld [vmem:[#allocation2 + $0x199] sm:$0xff] }
 0x1ae   : > { %10431 = vmatprep.subr.bf16.mxu0 %v10430_v8 }
 0x1b0   : > { %9693 = vmatmul.mubr.msk.f32.gmra.mrb[4].mxu0 %vm364_vm0, %v11646_v49  ;;  %v3160_v49 = vld [vmem:[#allocation2 + $0x111] sm:$0xff] }
 0x1b1   : > { %9695 = vmatprep.mubr.msk.f32.mxu0 %vm364_vm0, %v11648_v51  ;;  %v3161_v51 = vld [vmem:[#allocation2 + $0x121] sm:$0xff] }
 0x1b4   : > { %9696 = vmatmul.mubr.msk.f32.gmra.mrb[6].mxu0 %vm364_vm0, %v11654_v34  ;;  %v3154_v34 = vld [vmem:[#allocation2 + $0xc9] sm:$0xff] }
 0x1b5   : > { %9698 = vmatprep.mubr.msk.f32.mxu0 %vm364_vm0, %v11656_v33  ;;  %v3153_v33 = vld [vmem:[#allocation2 + $0xc1] sm:$0xff] }
 0x1b8   : > { %9699 = vmatmul.mubr.msk.f32.gmra.mrb[8].mxu0 %vm364_vm0, %v11662_v32  ;;  %v3152_v32 = vld [vmem:[#allocation2 + $0xb1] sm:$0xff] }
 0x1b9   : > { %9701 = vmatprep.mubr.msk.f32.mxu0 %vm364_vm0, %v11664_v31  ;;  %v3151_v31 = vld [vmem:[#allocation2 + $0xa9] sm:$0xff] }
 0x1bc   : > { %9702 = vmatmul.mubr.msk.f32.gmra.mrb[10].mxu0 %vm364_vm0, %v11670_v30  ;;  %v3150_v30 = vld [vmem:[#allocation2 + $0x99] sm:$0xff] }
 0x1bd   : > { %9704 = vmatprep.mubr.msk.f32.mxu0 %vm364_vm0, %v11672_v29  ;;  %v3149_v29 = vld [vmem:[#allocation2 + $0x91] sm:$0xff] }
 0x1c0   : > { %9705 = vmatmul.mubr.msk.f32.gmra.mrb[12].mxu0 %vm364_vm0, %v11678_v28  ;;  %v3148_v28 = vld [vmem:[#allocation2 + $0x81] sm:$0xff] }
 0x1c1   : > { %9707 = vmatprep.mubr.msk.f32.mxu0 %vm364_vm0, %v11680_v27  ;;  %v3147_v27 = vld [vmem:[#allocation2 + $0x79] sm:$0xff] }
 0x1c4   : > { %9708 = vmatmul.mubr.msk.f32.gmra.mrb[14].mxu0 %vm364_vm0, %v11686_v26  ;;  %v3146_v26 = vld [vmem:[#allocation2 + $0x69] sm:$0xff] }
 0x1c5   : > { %9710 = vmatprep.mubr.msk.f32.mxu0 %vm364_vm0, %v11688_v25  ;;  %v3145_v25 = vld [vmem:[#allocation2 + $0x61] sm:$0xff] }
 0x1c8   : > { %9711 = vmatmul.mubr.msk.f32.gmra.mrb[16].mxu0 %vm364_vm0, %v11694_v24  ;;  %v3144_v24 = vld [vmem:[#allocation2 + $0x51] sm:$0xff] }
 0x1c9   : > { %9713 = vmatprep.mubr.msk.f32.mxu0 %vm364_vm0, %v11696_v23 }
 0x1cc   : > { %9714 = vmatmul.mubr.msk.f32.gmra.mrb[18].mxu0 %vm364_vm0, %v11702_v20  ;;  %v456_v20 = vld [vmem:[#allocation2 + $0x1a7] sm:$0x1] }
 0x1cd   : > { %9716 = vmatprep.mubr.msk.f32.mxu0 %vm364_vm0, %v11704_v19  ;;  %474 = vst.msk [vmem:[#allocation2 + $0x1a9] sm:$0x1] %vm420_vm1, %v456_v20  ;;  %v3143_v19 = vld [vmem:[#allocation2 + $0x49] sm:$0xff] }
 0x1d0   : > { %9717 = vmatmul.mubr.msk.f32.gmra.mrb[20].mxu0 %vm364_vm0, %v11715_v17  ;;  %v3142_v17 = vld [vmem:[#allocation2 + $0x39] sm:$0xff] }
 0x1d1   : > { %9719 = vmatprep.mubr.msk.f32.mxu0 %vm364_vm0, %v11717_v16  ;;  %v2781_v16 = vld [vmem:[#allocation2 + $0x198] sm:$0xff] }
 0x1d4   : > { %9720 = vmatmul.mubr.msk.f32.gmra.mrb[22].mxu0 %vm364_vm0, %v11723_v15  ;;  %v8322_v15 = vld [vmem:[%s13641_s1 + $0x118] sm:$0xff] }
 0x1d5   : > { %9722 = vmatprep.mubr.msk.f32.mxu0 %vm364_vm0, %v11725_v14  ;;  %v2782_v14 = vld [vmem:[#allocation2 + $0x1a0] sm:$0xff] }
 0x1d8   : > { %9723 = vmatmul.mubr.msk.f32.gmra.mrb[24].mxu0 %vm364_vm0, %v11737_v10  ;;  %v3141_v10 = vld [vmem:[#allocation2 + $0x31] sm:$0xff] }
 0x1d9   : > { %9725 = vmatprep.mubr.msk.f32.mxu0 %vm364_vm0, %v11739_v9  ;;  %v8321_v9 = vld [vmem:[%s13641_s1 + $0x110] sm:$0xff] }
 0x1da   : > { %v10434_v23 = vpack.c.bf16 %v8322_v15, %v8321_v9 }
 0x1dc   : > { %9726 = vmatmul.mubr.msk.f32.gmra.mrb[26].mxu0 %vm364_vm0, %v11745_v18  ;;  %v3162_v18 = vld [vmem:[#allocation2 + $0x129] sm:$0xff] }
 0x1dd   : > { %9728 = vmatprep.mubr.msk.f32.mxu0 %vm364_vm0, %v11959_v54  ;;  %v3163_v54 = vld [vmem:[#allocation2 + $0x139] sm:$0xff] }
 0x1e0   : > { %9729 = vmatmul.mubr.msk.f32.gmra.mrb[28].mxu0 %vm364_vm0, %v11965_v11  ;;  %v3164_v11 = vld [vmem:[#allocation2 + $0x141] sm:$0xff] }
 0x1e1   : > { %9731 = vmatprep.mubr.msk.f32.mxu0 %vm364_vm0, %v2781_v16 }
 0x1e4   : > { %9732 = vmatmul.mubr.msk.f32.gmra.mrb[30].mxu0 %vm364_vm0, %v2782_v14 }
 0x1e5   : > { %9742 = vmatprep.mubr.msk.f32.mxu0 %vm364_vm0, %v3141_v10 }
 0x1e8   : > { %9743 = vmatmul.mubr.msk.f32.vlgmr.msra.gmra.mrb[0].mxu0 %vm364_vm0, %v3142_v17 }
 0x1e9   : > { %10433 = vmatpush3.bf16.msra.mxu0 %v10430_v8  ;;  %9745 = vmatprep.mubr.msk.f32.mxu0 %vm364_vm0, %v3143_v19  ;;  %v3172_v8 = vld [vmem:[#allocation2 + $0x1a1] sm:$0xff] }
 0x1ea   : > { %10435 = vmatprep.subr.bf16.mxu0 %v10434_v23 }
 0x1ec   : > { %9746 = vmatmul.mubr.msk.f32.gmra.mrb[2].mxu0 %vm364_vm0, %v3144_v24 }
 0x1ed   : > { %9748 = vmatprep.mubr.msk.f32.mxu0 %vm364_vm0, %v3145_v25  ;;  %10437 = vmatpush3.bf16.msra.mxu0 %v10434_v23 }
 0x1f0   : > { %9749 = vmatmul.mubr.msk.f32.gmra.mrb[4].mxu0 %vm364_vm0, %v3146_v26 }
 0x1f1   : > { %9751 = vmatprep.mubr.msk.f32.mxu0 %vm364_vm0, %v3147_v27 }
 0x1f4   : > { %9752 = vmatmul.mubr.msk.f32.gmra.mrb[6].mxu0 %vm364_vm0, %v3148_v28 }
 0x1f5   : > { %9754 = vmatprep.mubr.msk.f32.mxu0 %vm364_vm0, %v3149_v29 }
 0x1f8   : > { %9755 = vmatmul.mubr.msk.f32.gmra.mrb[8].mxu0 %vm364_vm0, %v3150_v30 }
 0x1f9   : > { %9757 = vmatprep.mubr.msk.f32.mxu0 %vm364_vm0, %v3151_v31 }
 0x1fc   : > { %9758 = vmatmul.mubr.msk.f32.gmra.mrb[10].mxu0 %vm364_vm0, %v3152_v32 }
 0x1fd   : > { %9760 = vmatprep.mubr.msk.f32.mxu0 %vm364_vm0, %v3153_v33 }
 0x200   : > { %9761 = vmatmul.mubr.msk.f32.gmra.mrb[12].mxu0 %vm364_vm0, %v3154_v34 }
 0x201   : > { %9763 = vmatprep.mubr.msk.f32.mxu0 %vm364_vm0, %v3155_v46 }
 0x204   : > { %9764 = vmatmul.mubr.msk.f32.gmra.mrb[14].mxu0 %vm364_vm0, %v3156_v5 }
 0x205   : > { %9766 = vmatprep.mubr.msk.f32.mxu0 %vm364_vm0, %v3157_v43  ;;  %v4166_v43 = vld [vmem:[%s13643_s3 + $0x10] sm:$0xff] }
 0x208   : > { %9767 = vmatmul.mubr.msk.f32.gmra.mrb[16].mxu0 %vm364_vm0, %v3158_v47  ;;  %v4167_v47 = vld [vmem:[%s13643_s3 + $0x18] sm:$0xff] }
 0x209   : > { %9769 = vmatprep.mubr.msk.f32.mxu0 %vm364_vm0, %v3159_v48 }
 0x20c   : > { %9770 = vmatmul.mubr.msk.f32.gmra.mrb[18].mxu0 %vm364_vm0, %v3160_v49 }
 0x20d   : > { %9772 = vmatprep.mubr.msk.f32.mxu0 %vm364_vm0, %v3161_v51 }
 0x210   : > { %9773 = vmatmul.mubr.msk.f32.gmra.mrb[20].mxu0 %vm364_vm0, %v3162_v18 }
 0x211   : > { %9775 = vmatprep.mubr.msk.f32.mxu0 %vm364_vm0, %v3163_v54 }
 0x214   : > { %9776 = vmatmul.mubr.msk.f32.gmra.mrb[22].mxu0 %vm364_vm0, %v3164_v11  ;;  %v8424_v11 = vld [vmem:[%s13643_s3 + $0x40] sm:$0xff] }
 0x215   : > { %9778 = vmatprep.mubr.msk.f32.mxu0 %vm364_vm0, %v3165_v39 }
 0x218   : > { %9779 = vmatmul.mubr.msk.f32.gmra.mrb[24].mxu0 %vm364_vm0, %v3166_v61 }
 0x219   : > { %9781 = vmatprep.mubr.msk.f32.mxu0 %vm364_vm0, %v3167_v1  ;;  %v10450_v1 = vpack.c.bf16 %v4167_v47, %v4166_v43 }
 0x21c   : > { %9782 = vmatmul.mubr.msk.f32.gmra.mrb[26].mxu0 %vm364_vm0, %v3168_v3 }
 0x21d   : > { %9784 = vmatprep.mubr.msk.f32.mxu0 %vm364_vm0, %v12040_v55  ;;  %v13910_v55 = vld [vmem:[#allocation69_spill] sm:$0xff] }
 0x220   : > { %9785 = vmatmul.mubr.msk.f32.gmra.mrb[28].mxu0 %vm364_vm0, %v12046_v63  ;;  %v13911_v63 = vld [vmem:[#allocation70_spill] sm:$0xff] }
 0x221   : > { %9787 = vmatprep.mubr.msk.f32.mxu0 %vm364_vm0, %v3171_v6  ;;  %v8425_v6 = vld [vmem:[%s13643_s3 + $0x48] sm:$0xff] }
 0x224   : > { %9788 = vmatmul.mubr.msk.f32.gmra.mrb[30].mxu0 %vm364_vm0, %v3172_v8 }
 0x225   : > { %9798 = vmatprep.mubr.msk.f32.mxu0 %vm364_vm0, %v11770_v59  ;;  %v13909_v59 = vld [vmem:[#allocation68_spill] sm:$0xff] }
 0x228   : > { %9799 = vmatmul.mubr.msk.f32.vlgmr.msra.gmra.mrb[0].mxu0 %vm364_vm0, %v13880_v56  ;;  %v13912_v56 = vld [vmem:[#allocation36_spill] sm:$0xff] }
 0x229   : > { %9801 = vmatprep.mubr.msk.f32.mxu0 %vm364_vm0, %v13881_v58  ;;  %v3561_v58 = vld [vmem:[#allocation2 + $0x19a] sm:$0xff] }
 0x22c   : > { %9802 = vmatmul.mubr.msk.f32.gmra.mrb[2].mxu0 %vm364_vm0, %v13882_v0  ;;  %v13913_v0 = vld [vmem:[#allocation37_spill] sm:$0xff] }
 0x22d   : > { %9804 = vmatprep.mubr.msk.f32.mxu0 %vm364_vm0, %v13883_v2  ;;  %v3562_v2 = vld [vmem:[#allocation2 + $0x1a2] sm:$0xff] }
 0x230   : > { %9805 = vmatmul.mubr.msk.f32.gmra.mrb[4].mxu0 %vm364_vm0, %v13884_v22  ;;  %v8356_v22 = vld [vmem:[%s13643_s3 + $0x20] sm:$0xff] }
 0x231   : > { %9807 = vmatprep.mubr.msk.f32.mxu0 %vm364_vm0, %v13885_v35  ;;  %v8357_v35 = vld [vmem:[%s13643_s3 + $0x28] sm:$0xff] }
 0x234   : > { %9808 = vmatmul.mubr.msk.f32.gmra.mrb[6].mxu0 %vm364_vm0, %v13886_v40  ;;  %v10438_v40 = vpack.c.bf16 %v8357_v35, %v8356_v22 }
 0x235   : > { %9810 = vmatprep.mubr.msk.f32.mxu0 %vm364_vm0, %v13887_v52  ;;  %v8358_v52 = vld [vmem:[%s13643_s3 + $0x30] sm:$0xff] }
 0x236   : > { %10439 = vmatprep.subr.bf16.mxu1 %v10438_v40 }
 0x237   : > { %10441 = vmatpush3.bf16.msra.mxu1 %v10438_v40 }
 0x238   : > { %9811 = vmatmul.mubr.msk.f32.gmra.mrb[8].mxu0 %vm364_vm0, %v13888_v57  ;;  %v8359_v57 = vld [vmem:[%s13643_s3 + $0x38] sm:$0xff] }
 0x239   : > { %9813 = vmatprep.mubr.msk.f32.mxu0 %vm364_vm0, %v13889_v21  ;;  %v10442_v21 = vpack.c.bf16 %v8359_v57, %v8358_v52  ;;  %v12379_v57 = vpack.c.bf16 %v8425_v6, %v8424_v11 }
 0x23b   : > { %10443 = vmatprep.subr.bf16.mxu1 %v10442_v21 }
 0x23c   : > { %9814 = vmatmul.mubr.msk.f32.gmra.mrb[10].mxu0 %vm364_vm0, %v13890_v12  ;;  %10445 = vmatpush3.bf16.msra.mxu1 %v10442_v21  ;;  %v4164_v12 = vld [vmem:[%s13643_s3] sm:$0xff] }
 0x23d   : > { %9816 = vmatprep.mubr.msk.f32.mxu0 %vm364_vm0, %v13891_v62  ;;  %v4165_v62 = vld [vmem:[%s13643_s3 + $0x8] sm:$0xff] }
 0x240   : > { %9817 = vmatmul.mubr.msk.f32.gmra.mrb[12].mxu0 %vm364_vm0, %v13892_v13  ;;  %v12325_v13 = vpack.c.bf16 %v4165_v62, %v4164_v12 }
 0x241   : > { %9819 = vmatprep.mubr.msk.f32.mxu0 %vm364_vm0, %v13893_v38  ;;  %v12331_v38 = vld [vmem:[%s13642_s2] ss:$0 sm:$0xff] }
 0x242   : > { %10447 = vmatprep.subr.bf16.mxu1 %v12325_v13 }
 0x244   : > { %9820 = vmatmul.mubr.msk.f32.gmra.mrb[14].mxu0 %vm364_vm0, %v13894_v4 }
 0x245   : > { %9822 = vmatprep.mubr.msk.f32.mxu0 %vm364_vm0, %v13895_v7 }
 0x248   : > { %9823 = vmatmul.mubr.msk.f32.gmra.mrb[16].mxu0 %vm364_vm0, %v13896_v60 }
 0x249   : > { %9825 = vmatprep.mubr.msk.f32.mxu0 %vm364_vm0, %v13897_v50 }
 0x24c   : > { %9826 = vmatmul.mubr.msk.f32.gmra.mrb[18].mxu0 %vm364_vm0, %v13898_v37 }
 0x24d   : > { %9828 = vmatprep.mubr.msk.f32.mxu0 %vm364_vm0, %v13899_v41 }
 0x250   : > { %9829 = vmatmul.mubr.msk.f32.gmra.mrb[20].mxu0 %vm364_vm0, %v13900_v42 }
 0x251   : > { %9831 = vmatprep.mubr.msk.f32.mxu0 %vm364_vm0, %v13901_v44 }
 0x254   : > { %9832 = vmatmul.mubr.msk.f32.gmra.mrb[22].mxu0 %vm364_vm0, %v13902_v45 }
 0x255   : > { %9834 = vmatprep.mubr.msk.f32.mxu0 %vm364_vm0, %v13903_v53 }
 0x258   : > { %9835 = vmatmul.mubr.msk.f32.gmra.mrb[24].mxu0 %vm364_vm0, %v13909_v59 }
 0x259   : > { %9837 = vmatprep.mubr.msk.f32.mxu0 %vm364_vm0, %v13910_v55 }
 0x25c   : > { %9838 = vmatmul.mubr.msk.f32.gmra.mrb[26].mxu0 %vm364_vm0, %v13911_v63 }
 0x25d   : > { %9840 = vmatprep.mubr.msk.f32.mxu0 %vm364_vm0, %v13912_v56 }
 0x260   : > { %9841 = vmatmul.mubr.msk.f32.gmra.mrb[28].mxu0 %vm364_vm0, %v13913_v0 }
 0x261   : > { %9843 = vmatprep.mubr.msk.f32.mxu0 %vm364_vm0, %v3561_v58 }
 0x264   : > { %9844 = vmatmul.mubr.msk.f32.gmra.mrb[30].mxu0 %vm364_vm0, %v3562_v2 }
 0x2fb   : > { %v9800_v4 = vpop.f32.mrb[0].mxu0 }
 0x2fc   : > { %v3929_v7 = vadd.f32 %v9800_v4, %v12331_v38  ;;  %v3730_v60 = vpop.f32.mrb[1].mxu0 }
 0x2fd   : > { %v3928_v50 = vadd.f32 %v12331_v38, %v3730_v60 }
 0x2fe   : > { %v3961_v37 = vmul.f32 0.2, %v3929_v7 }
 0x2ff   : > { %v3960_v41 = vmul.f32 0.2, %v3928_v50  ;;  %v9803_v42 = vpop.f32.mrb[2].mxu0 }
 0x300   : > { %v3993_v44 = vmax.f32 %v3929_v7, %v3961_v37  ;;  %v3931_v45 = vadd.f32 %v9803_v42, %v12331_v38  ;;  %v3740_v53 = vpop.f32.mrb[3].mxu0 }
 0x301   : > { %v3992_v36 = vmax.f32 %v3928_v50, %v3960_v41  ;;  %v3930_v20 = vadd.f32 %v12331_v38, %v3740_v53 }
 0x302   : > { %4025 = vst.msk [vmem:[#allocation2 + $0x21] sm:$0xff] %vm364_vm0, %v3993_v44  ;;  %v3963_v16 = vmul.f32 0.2, %v3931_v45 }
 0x303   : > { %4024 = vst.msk [vmem:[#allocation2 + $0x19] sm:$0xff] %vm364_vm0, %v3992_v36  ;;  %v3962_v14 = vmul.f32 0.2, %v3930_v20  ;;  %v9806_v10 = vpop.f32.mrb[4].mxu0 }
 0x304   : > { %v3995_v9 = vmax.f32 %v3931_v45, %v3963_v16  ;;  %v3933_v15 = vadd.f32 %v9806_v10, %v12331_v38  ;;  %v3750_v17 = vpop.f32.mrb[5].mxu0 }
 0x305   : > { %v3994_v19 = vmax.f32 %v3930_v20, %v3962_v14  ;;  %v3932_v23 = vadd.f32 %v12331_v38, %v3750_v17 }
 0x306   : > { %4057 = vst.msk [vmem:[#allocation2 + $0x9] sm:$0xff] %vm364_vm0, %v3995_v9  ;;  %4027 = vst.msk [vmem:[#allocation2 + $0x39] sm:$0xff] %vm364_vm0, %v3995_v9  ;;  %v3965_v24 = vmul.f32 0.2, %v3933_v15 }
 0x307   : > { %4026 = vst.msk [vmem:[#allocation2 + $0x31] sm:$0xff] %vm364_vm0, %v3994_v19  ;;  %4056 = vst.msk [vmem:[#allocation2 + $0x1] sm:$0xff] %vm364_vm0, %v3994_v19  ;;  %v3964_v25 = vmul.f32 0.2, %v3932_v23  ;;  %v9809_v26 = vpop.f32.mrb[6].mxu0 }
 0x308   : > { %v3997_v27 = vmax.f32 %v3933_v15, %v3965_v24  ;;  %v3935_v28 = vadd.f32 %v9809_v26, %v12331_v38  ;;  %v3760_v29 = vpop.f32.mrb[7].mxu0 }
 0x309   : > { %v3996_v30 = vmax.f32 %v3932_v23, %v3964_v25  ;;  %v3934_v31 = vadd.f32 %v12331_v38, %v3760_v29  ;;  %v4097_v32 = vld [vmem:[#allocation2 + $0x27] sm:$0x1] }
 0x30a   : > { %4029 = vst.msk [vmem:[#allocation2 + $0x51] sm:$0xff] %vm364_vm0, %v3997_v27  ;;  %v3967_v33 = vmul.f32 0.2, %v3935_v28  ;;  %v4061_v34 = vld [vmem:[#allocation2 + $0x1a] sm:$0x1]  ;;  %v12383_v4 = vld [vmem:[#allocation2 + $0x21] sm:$0xff] }
 0x30b   : > { %4115 = vst.msk [vmem:[#allocation2 + $0x29] sm:$0x1] %vm420_vm1, %v4097_v32  ;;  %v3966_v46 = vmul.f32 0.2, %v3934_v31  ;;  %v9812_v5 = vpop.f32.mrb[8].mxu0  ;;  %v12371_v2 = vld [vmem:[#allocation2 + $0x19] sm:$0xff] }
 0x30c   : > { %4028 = vst.msk [vmem:[#allocation2 + $0x49] sm:$0xff] %vm364_vm0, %v3996_v30  ;;  %v3999_v48 = vmax.f32 %v3935_v28, %v3967_v33  ;;  %v3937_v49 = vadd.f32 %v9812_v5, %v12331_v38  ;;  %v3770_v51 = vpop.f32.mrb[9].mxu0 }
 0x30d   : > { %4079 = vst.msk [vmem:[#allocation2 + $0x18] sm:$0x1] %vm420_vm1, %v4061_v34  ;;  %v3998_v18 = vmax.f32 %v3934_v31, %v3966_v46  ;;  %v3936_v54 = vadd.f32 %v12331_v38, %v3770_v51  ;;  %v4169_v55 = vld [vmem:[#allocation2 + $0x9] sm:$0xff]  ;;  %v4098_v37 = vld [vmem:[#allocation2 + $0x3f] sm:$0x1] }
 0x30e   : > { %4031 = vst.msk [vmem:[#allocation2 + $0x69] sm:$0xff] %vm364_vm0, %v3999_v48  ;;  %v3969_v39 = vmul.f32 0.2, %v3937_v49  ;;  %v4168_v61 = vld [vmem:[#allocation2 + $0x1] sm:$0xff]  ;;  %v4062_v63 = vld [vmem:[#allocation2 + $0x32] sm:$0x1] }
 0x30f   : > { %v4060_v3 = vld [vmem:[#allocation2 + $0x2] sm:$0x1]  ;;  %4030 = vst.msk [vmem:[#allocation2 + $0x61] sm:$0xff] %vm364_vm0, %v3998_v18  ;;  %v3968_v8 = vmul.f32 0.2, %v3936_v54  ;;  %v9815_v59 = vpop.f32.mrb[10].mxu0  ;;  %9854 = vmatprep.mubr.msk.f32.mxu1 %vm364_vm0, %v4168_v61 }
 0x310   : > { %4078 = vst.msk [vmem:[#allocation2] sm:$0x1] %vm420_vm1, %v4060_v3  ;;  %v4001_v56 = vmax.f32 %v3937_v49, %v3969_v39  ;;  %v3939_v58 = vadd.f32 %v9815_v59, %v12331_v38  ;;  %v3780_v0 = vpop.f32.mrb[11].mxu0  ;;  %9855 = vmatmul.mubr.msk.f32.vlgmr.msra.gmra.mrb[0].mxu1 %vm364_vm0, %v4169_v55  ;;  %4080 = vst.msk [vmem:[#allocation2 + $0x30] sm:$0x1] %vm420_vm1, %v4062_v63  ;;  %v12389_v50 = vld [vmem:[#allocation2 + $0x31] sm:$0xff] }
 0x311   : > { %v4000_v22 = vmax.f32 %v3936_v54, %v3968_v8  ;;  %v3938_v35 = vadd.f32 %v12331_v38, %v3780_v0  ;;  %10449 = vmatpush3.bf16.msra.mxu1 %v12325_v13  ;;  %9857 = vmatprep.mubr.msk.f32.mxu1 %vm364_vm0, %v12371_v2  ;;  %v4096_v40 = vld [vmem:[#allocation2 + $0xf] sm:$0x1]  ;;  %v4099_v41 = vld [vmem:[#allocation2 + $0x57] sm:$0x1]  ;;  %4116 = vst.msk [vmem:[#allocation2 + $0x41] sm:$0x1] %vm420_vm1, %v4098_v37 }
 0x312   : > { %4033 = vst.msk [vmem:[#allocation2 + $0x81] sm:$0xff] %vm364_vm0, %v4001_v56  ;;  %v3971_v52 = vmul.f32 0.2, %v3939_v58  ;;  %10451 = vmatprep.subr.bf16.mxu1 %v10450_v1  ;;  %v12400_v14 = vld [vmem:[#allocation2 + $0x39] sm:$0xff]  ;;  %v12414_v29 = vld [vmem:[#allocation2 + $0x51] sm:$0xff] }
 0x313   : > { %v4063_v21 = vld [vmem:[#allocation2 + $0x4a] sm:$0x1]  ;;  %4114 = vst.msk [vmem:[#allocation2 + $0x11] sm:$0x1] %vm420_vm1, %v4096_v40  ;;  %v3970_v12 = vmul.f32 0.2, %v3938_v35 }
 0x314   : > { %4032 = vst.msk [vmem:[#allocation2 + $0x79] sm:$0xff] %vm364_vm0, %v4000_v22  ;;  %v9818_v62 = vpop.f32.mrb[12].mxu0  ;;  %v4003_v13 = vmax.f32 %v3939_v58, %v3971_v52  ;;  %9858 = vmatmul.mubr.msk.f32.gmra.mrb[2].mxu1 %vm364_vm0, %v12383_v4  ;;  %v12406_v17 = vld [vmem:[#allocation2 + $0x49] sm:$0xff] }
 0x315   : > { %4081 = vst.msk [vmem:[#allocation2 + $0x48] sm:$0x1] %vm420_vm1, %v4063_v21  ;;  %v3941_v7 = vadd.f32 %v9818_v62, %v12331_v38  ;;  %v3790_v60 = vpop.f32.mrb[13].mxu0  ;;  %v4002_v42 = vmax.f32 %v3938_v35, %v3970_v12  ;;  %9860 = vmatprep.mubr.msk.f32.mxu1 %vm364_vm0, %v12389_v50  ;;  %10453 = vmatpush3.bf16.msra.mxu1 %v10450_v1  ;;  %4117 = vst.msk [vmem:[#allocation2 + $0x59] sm:$0x1] %vm420_vm1, %v4099_v41  ;;  %v12428_v51 = vld [vmem:[#allocation2 + $0x69] sm:$0xff] }
 0x316   : > { %v3940_v44 = vadd.f32 %v12331_v38, %v3790_v60  ;;  %v4100_v45 = vld [vmem:[#allocation2 + $0x6f] sm:$0x1]  ;;  %4035 = vst.msk [vmem:[#allocation2 + $0x99] sm:$0xff] %vm364_vm0, %v4003_v13  ;;  %10455 = vmatprep.subr.bf16.mxu1 %v12379_v57  ;;  %v4064_v36 = vld [vmem:[#allocation2 + $0x62] sm:$0x1] }
 0x317   : > { %v3973_v53 = vmul.f32 0.2, %v3941_v7  ;;  %4118 = vst.msk [vmem:[#allocation2 + $0x71] sm:$0x1] %vm420_vm1, %v4100_v45  ;;  %v9821_v16 = vpop.f32.mrb[14].mxu0  ;;  %v12420_v33 = vld [vmem:[#allocation2 + $0x61] sm:$0xff] }
 0x318   : > { %4034 = vst.msk [vmem:[#allocation2 + $0x91] sm:$0xff] %vm364_vm0, %v4002_v42  ;;  %v3972_v20 = vmul.f32 0.2, %v3940_v44  ;;  %v3943_v9 = vadd.f32 %v9821_v16, %v12331_v38  ;;  %v3800_v15 = vpop.f32.mrb[15].mxu0  ;;  %9861 = vmatmul.mubr.msk.f32.gmra.mrb[4].mxu1 %vm364_vm0, %v12400_v14 }
 0x319   : > { %4082 = vst.msk [vmem:[#allocation2 + $0x60] sm:$0x1] %vm420_vm1, %v4064_v36  ;;  %v4005_v10 = vmax.f32 %v3941_v7, %v3973_v53  ;;  %v3942_v23 = vadd.f32 %v12331_v38, %v3800_v15  ;;  %9863 = vmatprep.mubr.msk.f32.mxu1 %vm364_vm0, %v12406_v17  ;;  %v4101_v24 = vld [vmem:[#allocation2 + $0x87] sm:$0x1] }
 0x31a   : > { %v4004_v19 = vmax.f32 %v3940_v44, %v3972_v20  ;;  %v3975_v25 = vmul.f32 0.2, %v3943_v9  ;;  %4119 = vst.msk [vmem:[#allocation2 + $0x89] sm:$0x1] %vm420_vm1, %v4101_v24  ;;  %v12442_v63 = vld [vmem:[#allocation2 + $0x81] sm:$0xff] }
 0x31b   : > { %4037 = vst.msk [vmem:[#allocation2 + $0xb1] sm:$0xff] %vm364_vm0, %v4005_v10  ;;  %v4065_v26 = vld [vmem:[#allocation2 + $0x7a] sm:$0x1]  ;;  %v3974_v27 = vmul.f32 0.2, %v3942_v23  ;;  %v9824_v28 = vpop.f32.mrb[16].mxu0 }
 0x31c   : > { %4036 = vst.msk [vmem:[#allocation2 + $0xa9] sm:$0xff] %vm364_vm0, %v4004_v19  ;;  %v4007_v30 = vmax.f32 %v3943_v9, %v3975_v25  ;;  %v3945_v31 = vadd.f32 %v9824_v28, %v12331_v38  ;;  %v3810_v32 = vpop.f32.mrb[17].mxu0  ;;  %9864 = vmatmul.mubr.msk.f32.gmra.mrb[6].mxu1 %vm364_vm0, %v12414_v29  ;;  %v12434_v39 = vld [vmem:[#allocation2 + $0x79] sm:$0xff] }
 0x31d   : > { %4083 = vst.msk [vmem:[#allocation2 + $0x78] sm:$0x1] %vm420_vm1, %v4065_v26  ;;  %v4006_v34 = vmax.f32 %v3942_v23, %v3974_v27  ;;  %v3944_v46 = vadd.f32 %v12331_v38, %v3810_v32  ;;  %9866 = vmatprep.mubr.msk.f32.mxu1 %vm364_vm0, %v12420_v33  ;;  %v4102_v5 = vld [vmem:[#allocation2 + $0x9f] sm:$0x1] }
 0x31e   : > { %4039 = vst.msk [vmem:[#allocation2 + $0xc9] sm:$0xff] %vm364_vm0, %v4007_v30  ;;  %v3977_v43 = vmul.f32 0.2, %v3945_v31  ;;  %v12456_v7 = vld [vmem:[#allocation2 + $0x99] sm:$0xff] }
 0x31f   : > { %v4066_v47 = vld [vmem:[#allocation2 + $0x92] sm:$0x1]  ;;  %4120 = vst.msk [vmem:[#allocation2 + $0xa1] sm:$0x1] %vm420_vm1, %v4102_v5  ;;  %v3976_v48 = vmul.f32 0.2, %v3944_v46 }
 0x320   : > { %4038 = vst.msk [vmem:[#allocation2 + $0xc1] sm:$0xff] %vm364_vm0, %v4006_v34  ;;  %v9827_v49 = vpop.f32.mrb[18].mxu0  ;;  %v4009_v18 = vmax.f32 %v3945_v31, %v3977_v43  ;;  %9867 = vmatmul.mubr.msk.f32.gmra.mrb[8].mxu1 %vm364_vm0, %v12428_v51  ;;  %v12448_v22 = vld [vmem:[#allocation2 + $0x91] sm:$0xff] }
 0x321   : > { %4084 = vst.msk [vmem:[#allocation2 + $0x90] sm:$0x1] %vm420_vm1, %v4066_v47  ;;  %v3947_v54 = vadd.f32 %v9827_v49, %v12331_v38  ;;  %v3820_v11 = vpop.f32.mrb[19].mxu0  ;;  %v4008_v61 = vmax.f32 %v3944_v46, %v3976_v48  ;;  %9869 = vmatprep.mubr.msk.f32.mxu1 %vm364_vm0, %v12434_v39 }
 0x322   : > { %v3946_v1 = vadd.f32 %v12331_v38, %v3820_v11  ;;  %v4103_v3 = vld [vmem:[#allocation2 + $0xb7] sm:$0x1]  ;;  %4041 = vst.msk [vmem:[#allocation2 + $0xe1] sm:$0xff] %vm364_vm0, %v4009_v18 }
 0x323   : > { %v3979_v6 = vmul.f32 0.2, %v3947_v54  ;;  %v4067_v8 = vld [vmem:[#allocation2 + $0xaa] sm:$0x1]  ;;  %4121 = vst.msk [vmem:[#allocation2 + $0xb9] sm:$0x1] %vm420_vm1, %v4103_v3 }
 0x324   : > { %4040 = vst.msk [vmem:[#allocation2 + $0xd9] sm:$0xff] %vm364_vm0, %v4008_v61  ;;  %v3978_v59 = vmul.f32 0.2, %v3946_v1  ;;  %v9830_v55 = vpop.f32.mrb[20].mxu0  ;;  %9870 = vmatmul.mubr.msk.f32.gmra.mrb[10].mxu1 %vm364_vm0, %v12442_v63  ;;  %v12462_v42 = vld [vmem:[#allocation2 + $0xa9] sm:$0xff]  ;;  %v12470_v9 = vld [vmem:[#allocation2 + $0xb1] sm:$0xff] }
 0x325   : > { %4085 = vst.msk [vmem:[#allocation2 + $0xa8] sm:$0x1] %vm420_vm1, %v4067_v8  ;;  %v4011_v56 = vmax.f32 %v3947_v54, %v3979_v6  ;;  %v3949_v58 = vadd.f32 %v9830_v55, %v12331_v38  ;;  %v3830_v0 = vpop.f32.mrb[21].mxu0  ;;  %9872 = vmatprep.mubr.msk.f32.mxu1 %vm364_vm0, %v12448_v22  ;;  %v4104_v52 = vld [vmem:[#allocation2 + $0xcf] sm:$0x1] }
 0x326   : > { %v4010_v35 = vmax.f32 %v3946_v1, %v3978_v59  ;;  %v3948_v40 = vadd.f32 %v12331_v38, %v3830_v0  ;;  %4122 = vst.msk [vmem:[#allocation2 + $0xd1] sm:$0x1] %vm420_vm1, %v4104_v52  ;;  %v12483_v32 = vld [vmem:[#allocation2 + $0xc9] sm:$0xff] }
 0x327   : > { %4043 = vst.msk [vmem:[#allocation2 + $0xf9] sm:$0xff] %vm364_vm0, %v4011_v56  ;;  %v3981_v21 = vmul.f32 0.2, %v3949_v58  ;;  %v4068_v12 = vld [vmem:[#allocation2 + $0xc2] sm:$0x1]  ;;  %v9833_v13 = vpop.f32.mrb[22].mxu0 }
 0x328   : > { %4042 = vst.msk [vmem:[#allocation2 + $0xf1] sm:$0xff] %vm364_vm0, %v4010_v35  ;;  %v3980_v62 = vmul.f32 0.2, %v3948_v40  ;;  %v3951_v37 = vadd.f32 %v9833_v13, %v12331_v38  ;;  %v3840_v41 = vpop.f32.mrb[23].mxu0  ;;  %9873 = vmatmul.mubr.msk.f32.gmra.mrb[12].mxu1 %vm364_vm0, %v12456_v7  ;;  %v12476_v24 = vld [vmem:[#allocation2 + $0xc1] sm:$0xff] }
 0x329   : > { %4086 = vst.msk [vmem:[#allocation2 + $0xc0] sm:$0x1] %vm420_vm1, %v4068_v12  ;;  %v4013_v60 = vmax.f32 %v3949_v58, %v3981_v21  ;;  %v3950_v45 = vadd.f32 %v12331_v38, %v3840_v41  ;;  %9875 = vmatprep.mubr.msk.f32.mxu1 %vm364_vm0, %v12462_v42  ;;  %v4105_v53 = vld [vmem:[#allocation2 + $0xe7] sm:$0x1] }
 0x32a   : > { %v4012_v44 = vmax.f32 %v3948_v40, %v3980_v62  ;;  %v3983_v36 = vmul.f32 0.2, %v3951_v37  ;;  %4123 = vst.msk [vmem:[#allocation2 + $0xe9] sm:$0x1] %vm420_vm1, %v4105_v53  ;;  %v12498_v3 = vld [vmem:[#allocation2 + $0xe1] sm:$0xff] }
 0x32b   : > { %4045 = vst.msk [vmem:[#allocation2 + $0x111] sm:$0xff] %vm364_vm0, %v4013_v60  ;;  %v4069_v20 = vld [vmem:[#allocation2 + $0xda] sm:$0x1]  ;;  %v3982_v16 = vmul.f32 0.2, %v3950_v45  ;;  %v9836_v10 = vpop.f32.mrb[24].mxu0 }
 0x32c   : > { %4044 = vst.msk [vmem:[#allocation2 + $0x109] sm:$0xff] %vm364_vm0, %v4012_v44  ;;  %v4015_v15 = vmax.f32 %v3951_v37, %v3983_v36  ;;  %v3953_v19 = vadd.f32 %v9836_v10, %v12331_v38  ;;  %v3850_v23 = vpop.f32.mrb[25].mxu0  ;;  %9876 = vmatmul.mubr.msk.f32.gmra.mrb[14].mxu1 %vm364_vm0, %v12470_v9  ;;  %v12489_v43 = vld [vmem:[#allocation2 + $0xd9] sm:$0xff] }
 0x32d   : > { %4087 = vst.msk [vmem:[#allocation2 + $0xd8] sm:$0x1] %vm420_vm1, %v4069_v20  ;;  %v4014_v25 = vmax.f32 %v3950_v45, %v3982_v16  ;;  %v3952_v26 = vadd.f32 %v12331_v38, %v3850_v23  ;;  %9878 = vmatprep.mubr.msk.f32.mxu1 %vm364_vm0, %v12476_v24 }
 0x32e   : > { %4047 = vst.msk [vmem:[#allocation2 + $0x129] sm:$0xff] %vm364_vm0, %v4015_v15  ;;  %v3985_v27 = vmul.f32 0.2, %v3953_v19  ;;  %v4106_v47 = vld [vmem:[#allocation2 + $0xff] sm:$0x1] }
 0x32f   : > { %v4070_v28 = vld [vmem:[#allocation2 + $0xf2] sm:$0x1]  ;;  %4046 = vst.msk [vmem:[#allocation2 + $0x121] sm:$0xff] %vm364_vm0, %v4014_v25  ;;  %v3984_v30 = vmul.f32 0.2, %v3952_v26  ;;  %v9839_v31 = vpop.f32.mrb[26].mxu0 }
 0x330   : > { %4088 = vst.msk [vmem:[#allocation2 + $0xf0] sm:$0x1] %vm420_vm1, %v4070_v28  ;;  %v4017_v34 = vmax.f32 %v3953_v19, %v3985_v27  ;;  %v3955_v46 = vadd.f32 %v9839_v31, %v12331_v38  ;;  %v3860_v5 = vpop.f32.mrb[27].mxu0  ;;  %9879 = vmatmul.mubr.msk.f32.gmra.mrb[16].mxu1 %vm364_vm0, %v12483_v32  ;;  %4124 = vst.msk [vmem:[#allocation2 + $0x101] sm:$0x1] %vm420_vm1, %v4106_v47  ;;  %v12504_v55 = vld [vmem:[#allocation2 + $0xf1] sm:$0xff] }
 0x331   : > { %v4016_v48 = vmax.f32 %v3952_v26, %v3984_v30  ;;  %v3954_v49 = vadd.f32 %v12331_v38, %v3860_v5  ;;  %9881 = vmatprep.mubr.msk.f32.mxu1 %vm364_vm0, %v12489_v43  ;;  %v12512_v12 = vld [vmem:[#allocation2 + $0xf9] sm:$0xff] }
 0x332   : > { %v4107_v18 = vld [vmem:[#allocation2 + $0x117] sm:$0x1]  ;;  %4049 = vst.msk [vmem:[#allocation2 + $0x141] sm:$0xff] %vm364_vm0, %v4017_v34  ;;  %v3987_v54 = vmul.f32 0.2, %v3955_v46 }
 0x333   : > { %v4071_v11 = vld [vmem:[#allocation2 + $0x10a] sm:$0x1]  ;;  %4125 = vst.msk [vmem:[#allocation2 + $0x119] sm:$0x1] %vm420_vm1, %v4107_v18  ;;  %v3986_v61 = vmul.f32 0.2, %v3954_v49 }
 0x334   : > { %4048 = vst.msk [vmem:[#allocation2 + $0x139] sm:$0xff] %vm364_vm0, %v4016_v48  ;;  %v9842_v1 = vpop.f32.mrb[28].mxu0  ;;  %v4019_v6 = vmax.f32 %v3955_v46, %v3987_v54  ;;  %9882 = vmatmul.mubr.msk.f32.gmra.mrb[18].mxu1 %vm364_vm0, %v12498_v3  ;;  %v12518_v37 = vld [vmem:[#allocation2 + $0x109] sm:$0xff]  ;;  %v12528_v16 = vld [vmem:[#allocation2 + $0x111] sm:$0xff] }
 0x335   : > { %4089 = vst.msk [vmem:[#allocation2 + $0x108] sm:$0x1] %vm420_vm1, %v4071_v11  ;;  %v3957_v8 = vadd.f32 %v9842_v1, %v12331_v38  ;;  %v3870_v59 = vpop.f32.mrb[29].mxu0  ;;  %v4018_v56 = vmax.f32 %v3954_v49, %v3986_v61  ;;  %9884 = vmatprep.mubr.msk.f32.mxu1 %vm364_vm0, %v12504_v55  ;;  %v4108_v0 = vld [vmem:[#allocation2 + $0x12f] sm:$0x1]  ;;  %v8426_v54 = vld [vmem:[%s13643_s3 + $0x50] sm:$0xff] }
 0x336   : > { %v3956_v58 = vadd.f32 %v12331_v38, %v3870_v59  ;;  %4051 = vst.msk [vmem:[#allocation2 + $0x159] sm:$0xff] %vm364_vm0, %v4019_v6  ;;  %v4072_v40 = vld [vmem:[#allocation2 + $0x122] sm:$0x1]  ;;  %v12540_v25 = vld [vmem:[#allocation2 + $0x129] sm:$0xff]  ;;  %v8427_v11 = vld [vmem:[%s13643_s3 + $0x58] sm:$0xff] }
 0x337   : > { %v3989_v35 = vmul.f32 0.2, %v3957_v8  ;;  %4126 = vst.msk [vmem:[#allocation2 + $0x131] sm:$0x1] %vm420_vm1, %v4108_v0  ;;  %v9845_v21 = vpop.f32.mrb[30].mxu0  ;;  %v12533_v10 = vld [vmem:[#allocation2 + $0x121] sm:$0xff]  ;;  %v10458_v1 = vpack.c.bf16 %v8427_v11, %v8426_v54 }
 0x338   : > { %4050 = vst.msk [vmem:[#allocation2 + $0x151] sm:$0xff] %vm364_vm0, %v4018_v56  ;;  %v3988_v52 = vmul.f32 0.2, %v3956_v58  ;;  %v3959_v13 = vadd.f32 %v9845_v21, %v12331_v38  ;;  %v3880_v60 = vpop.f32.mrb[31].mxu0  ;;  %9885 = vmatmul.mubr.msk.f32.gmra.mrb[20].mxu1 %vm364_vm0, %v12512_v12  ;;  %v4132_v61 = vld [vmem:[#allocation2] sm:$0xff]  ;;  %v4133_v6 = vld [vmem:[#allocation2 + $0x8] sm:$0xff] }
 0x339   : > { %4090 = vst.msk [vmem:[#allocation2 + $0x120] sm:$0x1] %vm420_vm1, %v4072_v40  ;;  %v4021_v62 = vmax.f32 %v3957_v8, %v3989_v35  ;;  %v3958_v44 = vadd.f32 %v12331_v38, %v3880_v60  ;;  %9887 = vmatprep.mubr.msk.f32.mxu1 %vm364_vm0, %v12518_v37  ;;  %v4109_v45 = vld [vmem:[#allocation2 + $0x147] sm:$0x1]  ;;  %v8461_v59 = vld [vmem:[%s13643_s3 + $0x68] sm:$0xff]  ;;  %v12589_v56 = vld [vmem:[#allocation2 + $0x18] sm:$0xff] }
 0x33a   : > { %v4020_v41 = vmax.f32 %v3956_v58, %v3988_v52  ;;  %v3991_v53 = vmul.f32 0.2, %v3959_v13  ;;  %4127 = vst.msk [vmem:[#allocation2 + $0x149] sm:$0x1] %vm420_vm1, %v4109_v45  ;;  %v12550_v30 = vld [vmem:[#allocation2 + $0x141] sm:$0xff]  ;;  %v12600_v35 = vld [vmem:[#allocation2 + $0x30] sm:$0xff] }
 0x33b   : > { %4059 = vst.msk [vmem:[#allocation2 + $0x1a1] sm:$0xff] %vm364_vm0, %v4021_v62  ;;  %4053 = vst.msk [vmem:[#allocation2 + $0x171] sm:$0xff] %vm364_vm0, %v4021_v62  ;;  %v4073_v36 = vld [vmem:[#allocation2 + $0x13a] sm:$0x1]  ;;  %v3990_v20 = vmul.f32 0.2, %v3958_v44 }
 0x33c   : > { %4058 = vst.msk [vmem:[#allocation2 + $0x199] sm:$0xff] %vm364_vm0, %v4020_v41  ;;  %4052 = vst.msk [vmem:[#allocation2 + $0x169] sm:$0xff] %vm364_vm0, %v4020_v41  ;;  %v4023_v38 = vmax.f32 %v3959_v13, %v3991_v53  ;;  %9888 = vmatmul.mubr.msk.f32.gmra.mrb[22].mxu1 %vm364_vm0, %v12528_v16  ;;  %v12545_v26 = vld [vmem:[#allocation2 + $0x139] sm:$0xff]  ;;  %v12609_v40 = vld [vmem:[#allocation2 + $0x48] sm:$0xff] }
 0x33d   : > { %4091 = vst.msk [vmem:[#allocation2 + $0x138] sm:$0x1] %vm420_vm1, %v4073_v36  ;;  %v4022_v15 = vmax.f32 %v3958_v44, %v3990_v20  ;;  %9890 = vmatprep.mubr.msk.f32.mxu1 %vm364_vm0, %v12533_v10  ;;  %v4110_v19 = vld [vmem:[#allocation2 + $0x15f] sm:$0x1]  ;;  %13914 = vst [vmem:[#allocation38_spill] sm:$0xff] %v12550_v30  ;;  %v8460_v8 = vld [vmem:[%s13643_s3 + $0x60] sm:$0xff] }
 0x33e   : > { %4055 = vst.msk [vmem:[#allocation2 + $0x189] sm:$0xff] %vm364_vm0, %v4023_v38  ;;  %v12561_v47 = vld [vmem:[#allocation2 + $0x159] sm:$0xff]  ;;  %v12594_v58 = vpack.c.bf16 %v8461_v59, %v8460_v8  ;;  %v12613_v52 = vld [vmem:[#allocation2 + $0x50] sm:$0xff]  ;;  %v12621_v62 = vld [vmem:[#allocation2 + $0x68] sm:$0xff] }
 0x33f   : > { %v4074_v23 = vld [vmem:[#allocation2 + $0x152] sm:$0x1]  ;;  %4128 = vst.msk [vmem:[#allocation2 + $0x161] sm:$0x1] %vm420_vm1, %v4110_v19  ;;  %13916 = vst [vmem:[#allocation40_spill] sm:$0xff] %v12561_v47  ;;  %v12596_v0 = vld [vmem:[#allocation2 + $0x20] sm:$0xff] }
 0x340   : > { %4054 = vst.msk [vmem:[#allocation2 + $0x181] sm:$0xff] %vm364_vm0, %v4022_v15  ;;  %9891 = vmatmul.mubr.msk.f32.gmra.mrb[24].mxu1 %vm364_vm0, %v12540_v25  ;;  %v12555_v34 = vld [vmem:[#allocation2 + $0x151] sm:$0xff]  ;;  %v12617_v21 = vld [vmem:[#allocation2 + $0x60] sm:$0xff]  ;;  %v12641_v45 = vld [vmem:[#allocation2 + $0xa8] sm:$0xff] }
 0x341   : > { %4092 = vst.msk [vmem:[#allocation2 + $0x150] sm:$0x1] %vm420_vm1, %v4074_v23  ;;  %9893 = vmatprep.mubr.msk.f32.mxu1 %vm364_vm0, %v12545_v26  ;;  %13915 = vst [vmem:[#allocation39_spill] sm:$0xff] %v12555_v34  ;;  %v12625_v13 = vld [vmem:[#allocation2 + $0x78] sm:$0xff]  ;;  %v12629_v60 = vld [vmem:[#allocation2 + $0x80] sm:$0xff] }
 0x342   : > { %v4111_v27 = vld [vmem:[#allocation2 + $0x177] sm:$0x1]  ;;  %v4113_v49 = vld [vmem:[#allocation2 + $0x1a7] sm:$0x1]  ;;  %v12637_v44 = vld [vmem:[#allocation2 + $0x98] sm:$0xff] }
 0x343   : > { %v4075_v28 = vld [vmem:[#allocation2 + $0x16a] sm:$0x1]  ;;  %4129 = vst.msk [vmem:[#allocation2 + $0x179] sm:$0x1] %vm420_vm1, %v4111_v27  ;;  %v4077_v31 = vld [vmem:[#allocation2 + $0x19a] sm:$0x1] }
 0x344   : > { %4093 = vst.msk [vmem:[#allocation2 + $0x168] sm:$0x1] %vm420_vm1, %v4075_v28  ;;  %9894 = vmatmul.mubr.msk.f32.gmra.mrb[26].mxu1 %vm364_vm0, %v12550_v30  ;;  %4095 = vst.msk [vmem:[#allocation2 + $0x198] sm:$0x1] %vm420_vm1, %v4077_v31  ;;  %v12566_v48 = vld [vmem:[#allocation2 + $0x169] sm:$0xff]  ;;  %v12571_v18 = vld [vmem:[#allocation2 + $0x171] sm:$0xff] }
 0x345   : > { %9896 = vmatprep.mubr.msk.f32.mxu1 %vm364_vm0, %v12555_v34  ;;  %v4112_v46 = vld [vmem:[#allocation2 + $0x18f] sm:$0x1]  ;;  %13917 = vst [vmem:[#allocation41_spill] sm:$0xff] %v12566_v48  ;;  %4131 = vst.msk [vmem:[#allocation2 + $0x1a9] sm:$0x1] %vm420_vm1, %v4113_v49  ;;  %v12633_v41 = vld [vmem:[#allocation2 + $0x90] sm:$0xff] }
 0x346   : > { %4130 = vst.msk [vmem:[#allocation2 + $0x191] sm:$0x1] %vm420_vm1, %v4112_v46  ;;  %13918 = vst [vmem:[#allocation44_spill] sm:$0xff] %v12571_v18  ;;  %v12645_v53 = vld [vmem:[#allocation2 + $0xb0] sm:$0xff]  ;;  %v12649_v36 = vld [vmem:[#allocation2 + $0xc0] sm:$0xff] }
 0x347   : > { %v4076_v5 = vld [vmem:[#allocation2 + $0x182] sm:$0x1]  ;;  %v12653_v20 = vld [vmem:[#allocation2 + $0xc8] sm:$0xff]  ;;  %v12657_v38 = vld [vmem:[#allocation2 + $0xd8] sm:$0xff] }
 0x348   : > { %4094 = vst.msk [vmem:[#allocation2 + $0x180] sm:$0x1] %vm420_vm1, %v4076_v5  ;;  %9897 = vmatmul.mubr.msk.f32.gmra.mrb[28].mxu1 %vm364_vm0, %v12561_v47  ;;  %v12661_v15 = vld [vmem:[#allocation2 + $0xe0] sm:$0xff]  ;;  %v12665_v19 = vld [vmem:[#allocation2 + $0xf0] sm:$0xff]  ;;  %v12669_v23 = vld [vmem:[#allocation2 + $0xf8] sm:$0xff] }
 0x349   : > { %9899 = vmatprep.mubr.msk.f32.mxu1 %vm364_vm0, %v12566_v48  ;;  %v12673_v27 = vld [vmem:[#allocation2 + $0x108] sm:$0xff]  ;;  %v12677_v28 = vld [vmem:[#allocation2 + $0x110] sm:$0xff]  ;;  %v12681_v31 = vld [vmem:[#allocation2 + $0x120] sm:$0xff] }
 0x34a   : > { %v12685_v46 = vld [vmem:[#allocation2 + $0x128] sm:$0xff]  ;;  %v12689_v5 = vld [vmem:[#allocation2 + $0x138] sm:$0xff]  ;;  %v12693_v49 = vld [vmem:[#allocation2 + $0x140] sm:$0xff] }
 0x34b   : > { %v12697_v54 = vld [vmem:[#allocation2 + $0x150] sm:$0xff]  ;;  %v12701_v11 = vld [vmem:[#allocation2 + $0x158] sm:$0xff]  ;;  %v4847_v59 = vld [vmem:[#allocation2 + $0x2] sm:$0xff] }
 0x34c   : > { %9900 = vmatmul.mubr.msk.f32.gmra.mrb[30].mxu1 %vm364_vm0, %v12571_v18  ;;  %v8463_v8 = vld [vmem:[%s13643_s3 + $0x78] sm:$0xff]  ;;  %v4848_v48 = vld [vmem:[#allocation2 + $0xa] sm:$0xff]  ;;  %v8496_v47 = vld [vmem:[%s13643_s3 + $0x80] sm:$0xff] }
 0x34d   : > { %9910 = vmatprep.mubr.msk.f32.mxu1 %vm364_vm0, %v4132_v61  ;;  %v12705_v61 = vld [vmem:[#allocation2 + $0x168] sm:$0xff]  ;;  %v12727_v30 = vld [vmem:[#allocation2 + $0x1a] sm:$0xff] }
 0x34e   : > { %v8497_v34 = vld [vmem:[%s13643_s3 + $0x88] sm:$0xff] }
 0x350   : > { %9911 = vmatmul.mubr.msk.f32.vlgmr.msra.gmra.mrb[0].mxu1 %vm364_vm0, %v4133_v6  ;;  %v8462_v6 = vld [vmem:[%s13643_s3 + $0x70] sm:$0xff] }
 0x351   : > { %10457 = vmatpush3.bf16.msra.mxu1 %v12379_v57  ;;  %9913 = vmatprep.mubr.msk.f32.mxu1 %vm364_vm0, %v12589_v56  ;;  %v12605_v57 = vld [vmem:[#allocation2 + $0x38] sm:$0xff]  ;;  %v10466_v18 = vpack.c.bf16 %v8463_v8, %v8462_v6  ;;  %v12732_v6 = vpack.c.bf16 %v8497_v34, %v8496_v47  ;;  %v12734_v8 = vld [vmem:[#allocation2 + $0x22] sm:$0xff]  ;;  %v12747_v34 = vld [vmem:[#allocation2 + $0x4a] sm:$0xff] }
 0x352   : > { %10459 = vmatprep.subr.bf16.mxu1 %v10458_v1  ;;  %13921 = vst [vmem:[#allocation47_spill] sm:$0xff] %v12747_v34  ;;  %v12751_v47 = vld [vmem:[#allocation2 + $0x52] sm:$0xff] }
 0x353   : > { %13922 = vst [vmem:[#allocation48_spill] sm:$0xff] %v12751_v47 }
 0x354   : > { %9914 = vmatmul.mubr.msk.f32.gmra.mrb[2].mxu1 %vm364_vm0, %v12596_v0 }
 0x355   : > { %9916 = vmatprep.mubr.msk.f32.mxu1 %vm364_vm0, %v12600_v35  ;;  %10461 = vmatpush3.bf16.msra.mxu1 %v10458_v1  ;;  %v12709_v1 = vld [vmem:[#allocation2 + $0x170] sm:$0xff] }
 0x356   : > { %10463 = vmatprep.subr.bf16.mxu1 %v12594_v58 }
 0x358   : > { %9917 = vmatmul.mubr.msk.f32.gmra.mrb[4].mxu1 %vm364_vm0, %v12605_v57 }
 0x359   : > { %9919 = vmatprep.mubr.msk.f32.mxu1 %vm364_vm0, %v12609_v40 }
 0x35c   : > { %9920 = vmatmul.mubr.msk.f32.gmra.mrb[6].mxu1 %vm364_vm0, %v12613_v52 }
 0x35d   : > { %9922 = vmatprep.mubr.msk.f32.mxu1 %vm364_vm0, %v12617_v21 }
 0x360   : > { %9923 = vmatmul.mubr.msk.f32.gmra.mrb[8].mxu1 %vm364_vm0, %v12621_v62 }
 0x361   : > { %9925 = vmatprep.mubr.msk.f32.mxu1 %vm364_vm0, %v12625_v13 }
 0x364   : > { %9926 = vmatmul.mubr.msk.f32.gmra.mrb[10].mxu1 %vm364_vm0, %v12629_v60 }
 0x365   : > { %9928 = vmatprep.mubr.msk.f32.mxu1 %vm364_vm0, %v12633_v41 }
 0x368   : > { %9929 = vmatmul.mubr.msk.f32.gmra.mrb[12].mxu1 %vm364_vm0, %v12637_v44 }
 0x369   : > { %9931 = vmatprep.mubr.msk.f32.mxu1 %vm364_vm0, %v12641_v45 }
 0x36c   : > { %9932 = vmatmul.mubr.msk.f32.gmra.mrb[14].mxu1 %vm364_vm0, %v12645_v53 }
 0x36d   : > { %9934 = vmatprep.mubr.msk.f32.mxu1 %vm364_vm0, %v12649_v36 }
 0x370   : > { %9935 = vmatmul.mubr.msk.f32.gmra.mrb[16].mxu1 %vm364_vm0, %v12653_v20 }
 0x371   : > { %9937 = vmatprep.mubr.msk.f32.mxu1 %vm364_vm0, %v12657_v38 }
 0x374   : > { %9938 = vmatmul.mubr.msk.f32.gmra.mrb[18].mxu1 %vm364_vm0, %v12661_v15 }
 0x375   : > { %9940 = vmatprep.mubr.msk.f32.mxu1 %vm364_vm0, %v12665_v19 }
 0x378   : > { %9941 = vmatmul.mubr.msk.f32.gmra.mrb[20].mxu1 %vm364_vm0, %v12669_v23 }
 0x379   : > { %9943 = vmatprep.mubr.msk.f32.mxu1 %vm364_vm0, %v12673_v27 }
 0x37c   : > { %9944 = vmatmul.mubr.msk.f32.gmra.mrb[22].mxu1 %vm364_vm0, %v12677_v28 }
 0x37d   : > { %9946 = vmatprep.mubr.msk.f32.mxu1 %vm364_vm0, %v12681_v31 }
 0x380   : > { %9947 = vmatmul.mubr.msk.f32.gmra.mrb[24].mxu1 %vm364_vm0, %v12685_v46 }
 0x381   : > { %9949 = vmatprep.mubr.msk.f32.mxu1 %vm364_vm0, %v12689_v5 }
 0x384   : > { %9950 = vmatmul.mubr.msk.f32.gmra.mrb[26].mxu1 %vm364_vm0, %v12693_v49 }
 0x385   : > { %9952 = vmatprep.mubr.msk.f32.mxu1 %vm364_vm0, %v12697_v54 }
 0x388   : > { %9953 = vmatmul.mubr.msk.f32.gmra.mrb[28].mxu1 %vm364_vm0, %v12701_v11 }
 0x389   : > { %9955 = vmatprep.mubr.msk.f32.mxu1 %vm364_vm0, %v12705_v61 }
 0x38c   : > { %9956 = vmatmul.mubr.msk.f32.gmra.mrb[30].mxu1 %vm364_vm0, %v12709_v1 }
 0x38d   : > { %9966 = vmatprep.mubr.msk.f32.mxu1 %vm364_vm0, %v4847_v59  ;;  %v12738_v59 = vld [vmem:[#allocation2 + $0x32] sm:$0xff] }
 0x38e   : > { %13919 = vst [vmem:[#allocation45_spill] sm:$0xff] %v12738_v59 }
 0x390   : > { %9967 = vmatmul.mubr.msk.f32.vlgmr.msra.gmra.mrb[0].mxu1 %vm364_vm0, %v4848_v48  ;;  %v12743_v48 = vld [vmem:[#allocation2 + $0x3a] sm:$0xff] }
 0x391   : > { %10465 = vmatpush3.bf16.msra.mxu1 %v12594_v58  ;;  %9969 = vmatprep.mubr.msk.f32.mxu1 %vm364_vm0, %v12727_v30  ;;  %13920 = vst [vmem:[#allocation46_spill] sm:$0xff] %v12743_v48  ;;  %v12755_v58 = vld [vmem:[#allocation2 + $0x62] sm:$0xff] }
 0x392   : > { %10467 = vmatprep.subr.bf16.mxu1 %v10466_v18  ;;  %13923 = vst [vmem:[#allocation49_spill] sm:$0xff] %v12755_v58 }
 0x394   : > { %9970 = vmatmul.mubr.msk.f32.gmra.mrb[2].mxu1 %vm364_vm0, %v12734_v8 }
 0x395   : > { %9972 = vmatprep.mubr.msk.f32.mxu1 %vm364_vm0, %v12738_v59  ;;  %10469 = vmatpush3.bf16.msra.mxu1 %v10466_v18  ;;  %v12759_v18 = vld [vmem:[#allocation2 + $0x6a] sm:$0xff] }
 0x396   : > { %10471 = vmatprep.subr.bf16.mxu1 %v12732_v6  ;;  %13924 = vst [vmem:[#allocation50_spill] sm:$0xff] %v12759_v18  ;;  %v8533_v59 = vld [vmem:[%s13643_s3 + $0xa8] sm:$0xff] }
 0x398   : > { %9973 = vmatmul.mubr.msk.f32.gmra.mrb[4].mxu1 %vm364_vm0, %v12743_v48  ;;  %v12763_v48 = vld [vmem:[#allocation2 + $0x7a] sm:$0xff] }
 0x399   : > { %9975 = vmatprep.mubr.msk.f32.mxu1 %vm364_vm0, %v12747_v34  ;;  %13925 = vst [vmem:[#allocation51_spill] sm:$0xff] %v12763_v48  ;;  %v12767_v34 = vld [vmem:[#allocation2 + $0x82] sm:$0xff] }
 0x39a   : > { %13926 = vst [vmem:[#allocation52_spill] sm:$0xff] %v12767_v34 }
 0x39c   : > { %9976 = vmatmul.mubr.msk.f32.gmra.mrb[6].mxu1 %vm364_vm0, %v12751_v47  ;;  %v12771_v47 = vld [vmem:[#allocation2 + $0x92] sm:$0xff] }
 0x39d   : > { %9978 = vmatprep.mubr.msk.f32.mxu1 %vm364_vm0, %v12755_v58  ;;  %13927 = vst [vmem:[#allocation53_spill] sm:$0xff] %v12771_v47  ;;  %v12775_v58 = vld [vmem:[#allocation2 + $0x9a] sm:$0xff] }
 0x39e   : > { %13928 = vst [vmem:[#allocation54_spill] sm:$0xff] %v12775_v58 }
 0x3a0   : > { %9979 = vmatmul.mubr.msk.f32.gmra.mrb[8].mxu1 %vm364_vm0, %v12759_v18  ;;  %v12779_v18 = vld [vmem:[#allocation2 + $0xaa] sm:$0xff] }
 0x3a1   : > { %9981 = vmatprep.mubr.msk.f32.mxu1 %vm364_vm0, %v12763_v48  ;;  %13929 = vst [vmem:[#allocation55_spill] sm:$0xff] %v12779_v18  ;;  %v12783_v48 = vld [vmem:[#allocation2 + $0xb2] sm:$0xff] }
 0x3a2   : > { %13930 = vst [vmem:[#allocation56_spill] sm:$0xff] %v12783_v48 }
 0x3a4   : > { %9982 = vmatmul.mubr.msk.f32.gmra.mrb[10].mxu1 %vm364_vm0, %v12767_v34  ;;  %v12787_v34 = vld [vmem:[#allocation2 + $0xc2] sm:$0xff] }
 0x3a5   : > { %9984 = vmatprep.mubr.msk.f32.mxu1 %vm364_vm0, %v12771_v47  ;;  %13931 = vst [vmem:[#allocation57_spill] sm:$0xff] %v12787_v34  ;;  %v12791_v47 = vld [vmem:[#allocation2 + $0xca] sm:$0xff] }
 0x3a6   : > { %13932 = vst [vmem:[#allocation58_spill] sm:$0xff] %v12791_v47 }
 0x3a8   : > { %9985 = vmatmul.mubr.msk.f32.gmra.mrb[12].mxu1 %vm364_vm0, %v12775_v58  ;;  %v12795_v58 = vld [vmem:[#allocation2 + $0xda] sm:$0xff] }
 0x3a9   : > { %9987 = vmatprep.mubr.msk.f32.mxu1 %vm364_vm0, %v12779_v18  ;;  %13933 = vst [vmem:[#allocation59_spill] sm:$0xff] %v12795_v58  ;;  %v12799_v18 = vld [vmem:[#allocation2 + $0xe2] sm:$0xff] }
 0x3aa   : > { %13934 = vst [vmem:[#allocation60_spill] sm:$0xff] %v12799_v18 }
 0x3ac   : > { %9988 = vmatmul.mubr.msk.f32.gmra.mrb[14].mxu1 %vm364_vm0, %v12783_v48  ;;  %v12803_v48 = vld [vmem:[#allocation2 + $0xf2] sm:$0xff] }
 0x3ad   : > { %9990 = vmatprep.mubr.msk.f32.mxu1 %vm364_vm0, %v12787_v34  ;;  %13935 = vst [vmem:[#allocation61_spill] sm:$0xff] %v12803_v48  ;;  %v12807_v34 = vld [vmem:[#allocation2 + $0xfa] sm:$0xff] }
 0x3ae   : > { %13936 = vst [vmem:[#allocation62_spill] sm:$0xff] %v12807_v34 }
 0x3b0   : > { %9991 = vmatmul.mubr.msk.f32.gmra.mrb[16].mxu1 %vm364_vm0, %v12791_v47  ;;  %v12811_v47 = vld [vmem:[#allocation2 + $0x10a] sm:$0xff] }
 0x3b1   : > { %9993 = vmatprep.mubr.msk.f32.mxu1 %vm364_vm0, %v12795_v58  ;;  %13937 = vst [vmem:[#allocation63_spill] sm:$0xff] %v12811_v47  ;;  %v12815_v58 = vld [vmem:[#allocation2 + $0x112] sm:$0xff] }
 0x3b2   : > { %13938 = vst [vmem:[#allocation64_spill] sm:$0xff] %v12815_v58 }
 0x3b4   : > { %9994 = vmatmul.mubr.msk.f32.gmra.mrb[18].mxu1 %vm364_vm0, %v12799_v18  ;;  %v12819_v18 = vld [vmem:[#allocation2 + $0x122] sm:$0xff] }
 0x3b5   : > { %9996 = vmatprep.mubr.msk.f32.mxu1 %vm364_vm0, %v12803_v48  ;;  %13939 = vst [vmem:[#allocation65_spill] sm:$0xff] %v12819_v18  ;;  %v12823_v48 = vld [vmem:[#allocation2 + $0x12a] sm:$0xff] }
 0x3b6   : > { %13940 = vst [vmem:[#allocation66_spill] sm:$0xff] %v12823_v48 }
 0x3b8   : > { %9997 = vmatmul.mubr.msk.f32.gmra.mrb[20].mxu1 %vm364_vm0, %v12807_v34  ;;  %v12827_v34 = vld [vmem:[#allocation2 + $0x13a] sm:$0xff] }
 0x3b9   : > { %9999 = vmatprep.mubr.msk.f32.mxu1 %vm364_vm0, %v12811_v47  ;;  %13941 = vst [vmem:[#allocation67_spill] sm:$0xff] %v12827_v34  ;;  %v12831_v47 = vld [vmem:[#allocation2 + $0x142] sm:$0xff] }
 0x3ba   : > { %13942 = vst [vmem:[#allocation68_spill] sm:$0xff] %v12831_v47 }
 0x3bc   : > { %10000 = vmatmul.mubr.msk.f32.gmra.mrb[22].mxu1 %vm364_vm0, %v12815_v58  ;;  %v12835_v58 = vld [vmem:[#allocation2 + $0x152] sm:$0xff] }
 0x3bd   : > { %10002 = vmatprep.mubr.msk.f32.mxu1 %vm364_vm0, %v12819_v18  ;;  %13943 = vst [vmem:[#allocation69_spill] sm:$0xff] %v12835_v58  ;;  %v12839_v18 = vld [vmem:[#allocation2 + $0x15a] sm:$0xff] }
 0x3be   : > { %13944 = vst [vmem:[#allocation70_spill] sm:$0xff] %v12839_v18 }
 0x3c0   : > { %10003 = vmatmul.mubr.msk.f32.gmra.mrb[24].mxu1 %vm364_vm0, %v12823_v48  ;;  %v12843_v48 = vld [vmem:[#allocation2 + $0x16a] sm:$0xff] }
 0x3c1   : > { %10005 = vmatprep.mubr.msk.f32.mxu1 %vm364_vm0, %v12827_v34  ;;  %13945 = vst [vmem:[#allocation36_spill] sm:$0xff] %v12843_v48  ;;  %v12847_v34 = vld [vmem:[#allocation2 + $0x172] sm:$0xff] }
 0x3c2   : > { %13946 = vst [vmem:[#allocation37_spill] sm:$0xff] %v12847_v34 }
 0x3c4   : > { %10006 = vmatmul.mubr.msk.f32.gmra.mrb[26].mxu1 %vm364_vm0, %v12831_v47  ;;  %v8498_v47 = vld [vmem:[%s13643_s3 + $0x90] sm:$0xff] }
 0x3c5   : > { %10008 = vmatprep.mubr.msk.f32.mxu1 %vm364_vm0, %v12835_v58  ;;  %v8499_v58 = vld [vmem:[%s13643_s3 + $0x98] sm:$0xff] }
 0x3c8   : > { %10009 = vmatmul.mubr.msk.f32.gmra.mrb[28].mxu1 %vm364_vm0, %v12839_v18  ;;  %v10474_v18 = vpack.c.bf16 %v8499_v58, %v8498_v47  ;;  %v8568_v47 = vld [vmem:[%s13643_s3 + $0xc0] sm:$0xff]  ;;  %v8569_v58 = vld [vmem:[%s13643_s3 + $0xc8] sm:$0xff] }
 0x3c9   : > { %10011 = vmatprep.mubr.msk.f32.mxu1 %vm364_vm0, %v12843_v48  ;;  %v8532_v48 = vld [vmem:[%s13643_s3 + $0xa0] sm:$0xff] }
 0x3cc   : > { %10012 = vmatmul.mubr.msk.f32.gmra.mrb[30].mxu1 %vm364_vm0, %v12847_v34  ;;  %v10478_v34 = vpack.c.bf16 %v8533_v59, %v8532_v48  ;;  %v8535_v59 = vld [vmem:[%s13643_s3 + $0xb8] sm:$0xff] }
 0x3cd   : > { %10022 = vmatprep.mubr.msk.f32.mxu1 %vm364_vm0, %v12589_v56  ;;  %v12924_v56 = vld [vmem:[#allocation2 + $0x180] sm:$0xff] }
 0x3d0   : > { %10023 = vmatmul.mubr.msk.f32.vlgmr.msra.gmra.mrb[0].mxu1 %vm364_vm0, %v12596_v0  ;;  %v12928_v0 = vld [vmem:[#allocation2 + $0x188] sm:$0xff] }
 0x3d1   : > { %10473 = vmatpush3.bf16.msra.mxu1 %v12732_v6  ;;  %10025 = vmatprep.mubr.msk.f32.mxu1 %vm364_vm0, %v12600_v35  ;;  %v8534_v6 = vld [vmem:[%s13643_s3 + $0xb0] sm:$0xff] }
 0x3d2   : > { %10475 = vmatprep.subr.bf16.mxu1 %v10474_v18  ;;  %v10482_v48 = vpack.c.bf16 %v8535_v59, %v8534_v6  ;;  %v13967_v6 = vld [vmem:[#allocation60_spill] sm:$0xff]  ;;  %v13968_v59 = vld [vmem:[#allocation61_spill] sm:$0xff] }
 0x3d4   : > { %10026 = vmatmul.mubr.msk.f32.gmra.mrb[2].mxu1 %vm364_vm0, %v12605_v57 }
 0x3d5   : > { %10028 = vmatprep.mubr.msk.f32.mxu1 %vm364_vm0, %v12609_v40  ;;  %10477 = vmatpush3.bf16.msra.mxu1 %v10474_v18  ;;  %v10486_v18 = vpack.c.bf16 %v8569_v58, %v8568_v47  ;;  %v13970_v47 = vld [vmem:[#allocation63_spill] sm:$0xff]  ;;  %v13971_v58 = vld [vmem:[#allocation64_spill] sm:$0xff] }
 0x3d6   : > { %10479 = vmatprep.subr.bf16.mxu1 %v10478_v34 }
 0x3d8   : > { %10029 = vmatmul.mubr.msk.f32.gmra.mrb[4].mxu1 %vm364_vm0, %v12613_v52 }
 0x3d9   : > { %10031 = vmatprep.mubr.msk.f32.mxu1 %vm364_vm0, %v12617_v21 }
 0x3dc   : > { %10032 = vmatmul.mubr.msk.f32.gmra.mrb[6].mxu1 %vm364_vm0, %v12621_v62 }
 0x3dd   : > { %10034 = vmatprep.mubr.msk.f32.mxu1 %vm364_vm0, %v12625_v13 }
 0x3e0   : > { %10035 = vmatmul.mubr.msk.f32.gmra.mrb[8].mxu1 %vm364_vm0, %v12629_v60 }
 0x3e1   : > { %10037 = vmatprep.mubr.msk.f32.mxu1 %vm364_vm0, %v12633_v41 }
 0x3e4   : > { %10038 = vmatmul.mubr.msk.f32.gmra.mrb[10].mxu1 %vm364_vm0, %v12637_v44 }
 0x3e5   : > { %10040 = vmatprep.mubr.msk.f32.mxu1 %vm364_vm0, %v12641_v45 }
 0x3e8   : > { %10041 = vmatmul.mubr.msk.f32.gmra.mrb[12].mxu1 %vm364_vm0, %v12645_v53 }
 0x3e9   : > { %10043 = vmatprep.mubr.msk.f32.mxu1 %vm364_vm0, %v12649_v36 }
 0x3ec   : > { %10044 = vmatmul.mubr.msk.f32.gmra.mrb[14].mxu1 %vm364_vm0, %v12653_v20 }
 0x3ed   : > { %10046 = vmatprep.mubr.msk.f32.mxu1 %vm364_vm0, %v12657_v38 }
 0x3f0   : > { %10047 = vmatmul.mubr.msk.f32.gmra.mrb[16].mxu1 %vm364_vm0, %v12661_v15 }
 0x3f1   : > { %10049 = vmatprep.mubr.msk.f32.mxu1 %vm364_vm0, %v12665_v19 }
 0x3f4   : > { %10050 = vmatmul.mubr.msk.f32.gmra.mrb[18].mxu1 %vm364_vm0, %v12669_v23 }
 0x3f5   : > { %10052 = vmatprep.mubr.msk.f32.mxu1 %vm364_vm0, %v12673_v27 }
 0x3f8   : > { %10053 = vmatmul.mubr.msk.f32.gmra.mrb[20].mxu1 %vm364_vm0, %v12677_v28 }
 0x3f9   : > { %10055 = vmatprep.mubr.msk.f32.mxu1 %vm364_vm0, %v12681_v31 }
 0x3fc   : > { %10056 = vmatmul.mubr.msk.f32.gmra.mrb[22].mxu1 %vm364_vm0, %v12685_v46 }
 0x3fd   : > { %10058 = vmatprep.mubr.msk.f32.mxu1 %vm364_vm0, %v12689_v5 }
 0x400   : > { %10059 = vmatmul.mubr.msk.f32.gmra.mrb[24].mxu1 %vm364_vm0, %v12693_v49 }
 0x401   : > { %10061 = vmatprep.mubr.msk.f32.mxu1 %vm364_vm0, %v12697_v54 }
 0x404   : > { %10062 = vmatmul.mubr.msk.f32.gmra.mrb[26].mxu1 %vm364_vm0, %v12701_v11 }
 0x405   : > { %10064 = vmatprep.mubr.msk.f32.mxu1 %vm364_vm0, %v12705_v61 }
 0x408   : > { %10065 = vmatmul.mubr.msk.f32.gmra.mrb[28].mxu1 %vm364_vm0, %v12709_v1 }
 0x409   : > { %10067 = vmatprep.mubr.msk.f32.mxu1 %vm364_vm0, %v12924_v56 }
 0x40c   : > { %10068 = vmatmul.mubr.msk.f32.gmra.mrb[30].mxu1 %vm364_vm0, %v12928_v0 }
 0x40d   : > { %10078 = vmatprep.mubr.msk.f32.mxu1 %vm364_vm0, %v12371_v2  ;;  %v13947_v2 = vld [vmem:[#allocation38_spill] sm:$0xff] }
 0x410   : > { %10079 = vmatmul.mubr.msk.f32.vlgmr.msra.gmra.mrb[0].mxu1 %vm364_vm0, %v12383_v4  ;;  %v13948_v4 = vld [vmem:[#allocation39_spill] sm:$0xff] }
 0x411   : > { %10481 = vmatpush3.bf16.msra.mxu1 %v10478_v34  ;;  %10081 = vmatprep.mubr.msk.f32.mxu1 %vm364_vm0, %v12389_v50  ;;  %v13949_v50 = vld [vmem:[#allocation40_spill] sm:$0xff]  ;;  %v13966_v34 = vld [vmem:[#allocation59_spill] sm:$0xff] }
 0x412   : > { %10483 = vmatprep.subr.bf16.mxu1 %v10482_v48 }
 0x414   : > { %10082 = vmatmul.mubr.msk.f32.gmra.mrb[2].mxu1 %vm364_vm0, %v12400_v14  ;;  %v13950_v14 = vld [vmem:[#allocation41_spill] sm:$0xff] }
 0x415   : > { %10084 = vmatprep.mubr.msk.f32.mxu1 %vm364_vm0, %v12406_v17  ;;  %10485 = vmatpush3.bf16.msra.mxu1 %v10482_v48  ;;  %v13951_v17 = vld [vmem:[#allocation44_spill] sm:$0xff]  ;;  %v13969_v48 = vld [vmem:[#allocation62_spill] sm:$0xff] }
 0x416   : > { %10487 = vmatprep.subr.bf16.mxu1 %v10486_v18 }
 0x418   : > { %10085 = vmatmul.mubr.msk.f32.gmra.mrb[4].mxu1 %vm364_vm0, %v12414_v29  ;;  %v13004_v29 = vld [vmem:[#allocation2 + $0x181] sm:$0xff] }
 0x419   : > { %10087 = vmatprep.mubr.msk.f32.mxu1 %vm364_vm0, %v12420_v33  ;;  %v13008_v33 = vld [vmem:[#allocation2 + $0x189] sm:$0xff] }
 0x41c   : > { %10088 = vmatmul.mubr.msk.f32.gmra.mrb[6].mxu1 %vm364_vm0, %v12428_v51  ;;  %v8570_v51 = vld [vmem:[%s13643_s3 + $0xd0] sm:$0xff] }
 0x41d   : > { %10090 = vmatprep.mubr.msk.f32.mxu1 %vm364_vm0, %v12434_v39  ;;  %v8571_v39 = vld [vmem:[%s13643_s3 + $0xd8] sm:$0xff] }
 0x420   : > { %10091 = vmatmul.mubr.msk.f32.gmra.mrb[8].mxu1 %vm364_vm0, %v12442_v63  ;;  %v10490_v63 = vpack.c.bf16 %v8571_v39, %v8570_v51  ;;  %v13978_v51 = vld [vmem:[#allocation36_spill] sm:$0xff]  ;;  %v13979_v39 = vld [vmem:[#allocation37_spill] sm:$0xff] }
 0x421   : > { %10093 = vmatprep.mubr.msk.f32.mxu1 %vm364_vm0, %v12448_v22  ;;  %v8604_v22 = vld [vmem:[%s13643_s3 + $0xe0] sm:$0xff] }
 0x424   : > { %10094 = vmatmul.mubr.msk.f32.gmra.mrb[10].mxu1 %vm364_vm0, %v12456_v7  ;;  %v8605_v7 = vld [vmem:[%s13643_s3 + $0xe8] sm:$0xff] }
 0x425   : > { %10096 = vmatprep.mubr.msk.f32.mxu1 %vm364_vm0, %v12462_v42  ;;  %v13952_v42 = vld [vmem:[#allocation45_spill] sm:$0xff] }
 0x428   : > { %10097 = vmatmul.mubr.msk.f32.gmra.mrb[12].mxu1 %vm364_vm0, %v12470_v9  ;;  %v10494_v9 = vpack.c.bf16 %v8605_v7, %v8604_v22  ;;  %v13088_v22 = vld [vmem:[#allocation2 + $0x18a] sm:$0xff] }
 0x429   : > { %10099 = vmatprep.mubr.msk.f32.mxu1 %vm364_vm0, %v12476_v24  ;;  %v13953_v24 = vld [vmem:[#allocation46_spill] sm:$0xff]  ;;  %13981 = vst [vmem:[#allocation39_spill] sm:$0xff] %v13088_v22 }
 0x42a   : > { %v8606_v7 = vld [vmem:[%s13643_s3 + $0xf0] sm:$0xff] }
 0x42c   : > { %10100 = vmatmul.mubr.msk.f32.gmra.mrb[14].mxu1 %vm364_vm0, %v12483_v32  ;;  %v13954_v32 = vld [vmem:[#allocation47_spill] sm:$0xff] }
 0x42d   : > { %10102 = vmatprep.mubr.msk.f32.mxu1 %vm364_vm0, %v12489_v43  ;;  %v13955_v43 = vld [vmem:[#allocation48_spill] sm:$0xff] }
 0x430   : > { %10103 = vmatmul.mubr.msk.f32.gmra.mrb[16].mxu1 %vm364_vm0, %v12498_v3  ;;  %v13956_v3 = vld [vmem:[#allocation49_spill] sm:$0xff] }
 0x431   : > { %10105 = vmatprep.mubr.msk.f32.mxu1 %vm364_vm0, %v12504_v55  ;;  %v13957_v55 = vld [vmem:[#allocation50_spill] sm:$0xff] }
 0x434   : > { %10106 = vmatmul.mubr.msk.f32.gmra.mrb[18].mxu1 %vm364_vm0, %v12512_v12  ;;  %v13958_v12 = vld [vmem:[#allocation51_spill] sm:$0xff] }
 0x435   : > { %10108 = vmatprep.mubr.msk.f32.mxu1 %vm364_vm0, %v12518_v37  ;;  %v13959_v37 = vld [vmem:[#allocation52_spill] sm:$0xff] }
 0x438   : > { %10109 = vmatmul.mubr.msk.f32.gmra.mrb[20].mxu1 %vm364_vm0, %v12528_v16  ;;  %v13960_v16 = vld [vmem:[#allocation53_spill] sm:$0xff] }
 0x439   : > { %10111 = vmatprep.mubr.msk.f32.mxu1 %vm364_vm0, %v12533_v10  ;;  %v13961_v10 = vld [vmem:[#allocation54_spill] sm:$0xff] }
 0x43c   : > { %10112 = vmatmul.mubr.msk.f32.gmra.mrb[22].mxu1 %vm364_vm0, %v12540_v25  ;;  %v13962_v25 = vld [vmem:[#allocation55_spill] sm:$0xff] }
 0x43d   : > { %10114 = vmatprep.mubr.msk.f32.mxu1 %vm364_vm0, %v12545_v26  ;;  %v13963_v26 = vld [vmem:[#allocation56_spill] sm:$0xff] }
 0x440   : > { %10115 = vmatmul.mubr.msk.f32.gmra.mrb[24].mxu1 %vm364_vm0, %v13947_v2  ;;  %v13973_v2 = vld [vmem:[#allocation66_spill] sm:$0xff] }
 0x441   : > { %10117 = vmatprep.mubr.msk.f32.mxu1 %vm364_vm0, %v13948_v4  ;;  %v13974_v4 = vld [vmem:[#allocation67_spill] sm:$0xff] }
 0x444   : > { %10118 = vmatmul.mubr.msk.f32.gmra.mrb[26].mxu1 %vm364_vm0, %v13949_v50  ;;  %v13975_v50 = vld [vmem:[#allocation68_spill] sm:$0xff] }
 0x445   : > { %10120 = vmatprep.mubr.msk.f32.mxu1 %vm364_vm0, %v13950_v14  ;;  %v13976_v14 = vld [vmem:[#allocation69_spill] sm:$0xff] }
 0x448   : > { %10121 = vmatmul.mubr.msk.f32.gmra.mrb[28].mxu1 %vm364_vm0, %v13951_v17  ;;  %v13977_v17 = vld [vmem:[#allocation70_spill] sm:$0xff] }
 0x449   : > { %10123 = vmatprep.mubr.msk.f32.mxu1 %vm364_vm0, %v13004_v29 }
 0x44c   : > { %10124 = vmatmul.mubr.msk.f32.gmra.mrb[30].mxu1 %vm364_vm0, %v13008_v33 }
 0x44d   : > { %10134 = vmatprep.mubr.msk.f32.mxu1 %vm364_vm0, %v12727_v30  ;;  %v13964_v30 = vld [vmem:[#allocation57_spill] sm:$0xff] }
 0x450   : > { %10135 = vmatmul.mubr.msk.f32.vlgmr.msra.gmra.mrb[0].mxu1 %vm364_vm0, %v12734_v8  ;;  %v13965_v8 = vld [vmem:[#allocation58_spill] sm:$0xff] }
 0x451   : > { %10489 = vmatpush3.bf16.msra.mxu1 %v10486_v18  ;;  %10137 = vmatprep.mubr.msk.f32.mxu1 %vm364_vm0, %v13952_v42  ;;  %v13972_v18 = vld [vmem:[#allocation65_spill] sm:$0xff] }
 0x452   : > { %10491 = vmatprep.subr.bf16.mxu1 %v10490_v63 }
 0x454   : > { %10138 = vmatmul.mubr.msk.f32.gmra.mrb[2].mxu1 %vm364_vm0, %v13953_v24 }
 0x455   : > { %10140 = vmatprep.mubr.msk.f32.mxu1 %vm364_vm0, %v13954_v32  ;;  %10493 = vmatpush3.bf16.msra.mxu1 %v10490_v63  ;;  %v13084_v63 = vld [vmem:[#allocation2 + $0x182] sm:$0xff] }
 0x456   : > { %10495 = vmatprep.subr.bf16.mxu1 %v10494_v9  ;;  %13980 = vst [vmem:[#allocation38_spill] sm:$0xff] %v13084_v63 }
 0x458   : > { %10141 = vmatmul.mubr.msk.f32.gmra.mrb[4].mxu1 %vm364_vm0, %v13955_v43 }
 0x459   : > { %10143 = vmatprep.mubr.msk.f32.mxu1 %vm364_vm0, %v13956_v3 }
 0x45c   : > { %10144 = vmatmul.mubr.msk.f32.gmra.mrb[6].mxu1 %vm364_vm0, %v13957_v55 }
 0x45d   : > { %10146 = vmatprep.mubr.msk.f32.mxu1 %vm364_vm0, %v13958_v12 }
 0x460   : > { %10147 = vmatmul.mubr.msk.f32.gmra.mrb[8].mxu1 %vm364_vm0, %v13959_v37 }
 0x461   : > { %10149 = vmatprep.mubr.msk.f32.mxu1 %vm364_vm0, %v13960_v16 }
 0x464   : > { %10150 = vmatmul.mubr.msk.f32.gmra.mrb[10].mxu1 %vm364_vm0, %v13961_v10 }
 0x465   : > { %10152 = vmatprep.mubr.msk.f32.mxu1 %vm364_vm0, %v13962_v25 }
 0x468   : > { %10153 = vmatmul.mubr.msk.f32.gmra.mrb[12].mxu1 %vm364_vm0, %v13963_v26 }
 0x469   : > { %10155 = vmatprep.mubr.msk.f32.mxu1 %vm364_vm0, %v13964_v30 }
 0x46c   : > { %10156 = vmatmul.mubr.msk.f32.gmra.mrb[14].mxu1 %vm364_vm0, %v13965_v8 }
 0x46d   : > { %10158 = vmatprep.mubr.msk.f32.mxu1 %vm364_vm0, %v13966_v34 }
 0x470   : > { %10159 = vmatmul.mubr.msk.f32.gmra.mrb[16].mxu1 %vm364_vm0, %v13967_v6 }
 0x471   : > { %10161 = vmatprep.mubr.msk.f32.mxu1 %vm364_vm0, %v13968_v59 }
 0x474   : > { %10162 = vmatmul.mubr.msk.f32.gmra.mrb[18].mxu1 %vm364_vm0, %v13969_v48 }
 0x475   : > { %10164 = vmatprep.mubr.msk.f32.mxu1 %vm364_vm0, %v13970_v47 }
 0x478   : > { %10165 = vmatmul.mubr.msk.f32.gmra.mrb[20].mxu1 %vm364_vm0, %v13971_v58 }
 0x479   : > { %10167 = vmatprep.mubr.msk.f32.mxu1 %vm364_vm0, %v13972_v18 }
 0x47c   : > { %10168 = vmatmul.mubr.msk.f32.gmra.mrb[22].mxu1 %vm364_vm0, %v13973_v2 }
 0x47d   : > { %10170 = vmatprep.mubr.msk.f32.mxu1 %vm364_vm0, %v13974_v4 }
 0x480   : > { %10171 = vmatmul.mubr.msk.f32.gmra.mrb[24].mxu1 %vm364_vm0, %v13975_v50 }
 0x481   : > { %10173 = vmatprep.mubr.msk.f32.mxu1 %vm364_vm0, %v13976_v14 }
 0x484   : > { %10174 = vmatmul.mubr.msk.f32.gmra.mrb[26].mxu1 %vm364_vm0, %v13977_v17  ;;  %v8607_v17 = vld [vmem:[%s13643_s3 + $0xf8] sm:$0xff] }
 0x485   : > { %10176 = vmatprep.mubr.msk.f32.mxu1 %vm364_vm0, %v13978_v51  ;;  %v8641_v51 = vld [vmem:[%s13643_s3 + $0x108] sm:$0xff] }
 0x488   : > { %10177 = vmatmul.mubr.msk.f32.gmra.mrb[28].mxu1 %vm364_vm0, %v13979_v39  ;;  %v10498_v39 = vpack.c.bf16 %v8607_v17, %v8606_v7  ;;  %v6823_v17 = vld [vmem:[#allocation2 + $0x169] sm:$0xff] }
 0x489   : > { %10179 = vmatprep.mubr.msk.f32.mxu1 %vm364_vm0, %v13084_v63  ;;  %v8640_v63 = vld [vmem:[%s13643_s3 + $0x100] sm:$0xff] }
 0x48c   : > { %10180 = vmatmul.mubr.msk.f32.gmra.mrb[30].mxu1 %vm364_vm0, %v13088_v22  ;;  %v10502_v22 = vpack.c.bf16 %v8641_v51, %v8640_v63  ;;  %v6824_v51 = vld [vmem:[#allocation2 + $0x171] sm:$0xff]  ;;  %v6828_v63 = vld [vmem:[#allocation2 + $0x1a1] sm:$0xff] }
 0x48d   : > { %10190 = vmatprep.mubr.msk.f32.mxu1 %vm364_vm0, %v12600_v35  ;;  %v6437_v35 = vld [vmem:[#allocation2 + $0x198] sm:$0xff] }
 0x490   : > { %10191 = vmatmul.mubr.msk.f32.vlgmr.msra.gmra.mrb[0].mxu1 %vm364_vm0, %v12605_v57  ;;  %v6438_v57 = vld [vmem:[#allocation2 + $0x1a0] sm:$0xff] }
 0x491   : > { %10497 = vmatpush3.bf16.msra.mxu1 %v10494_v9  ;;  %10193 = vmatprep.mubr.msk.f32.mxu1 %vm364_vm0, %v12609_v40  ;;  %v8642_v40 = vld [vmem:[%s13643_s3 + $0x110] sm:$0xff]  ;;  %v6822_v9 = vld [vmem:[#allocation2 + $0x159] sm:$0xff] }
 0x492   : > { %10499 = vmatprep.subr.bf16.mxu1 %v10498_v39 }
 0x494   : > { %10194 = vmatmul.mubr.msk.f32.gmra.mrb[2].mxu1 %vm364_vm0, %v12613_v52  ;;  %v8643_v52 = vld [vmem:[%s13643_s3 + $0x118] sm:$0xff] }
 0x495   : > { %10196 = vmatprep.mubr.msk.f32.mxu1 %vm364_vm0, %v12617_v21  ;;  %10501 = vmatpush3.bf16.msra.mxu1 %v10498_v39  ;;  %v6797_v21 = vld [vmem:[#allocation2 + $0x31] sm:$0xff]  ;;  %v6827_v39 = vld [vmem:[#allocation2 + $0x199] sm:$0xff] }
 0x496   : > { %10503 = vmatprep.subr.bf16.mxu1 %v10502_v22 }
 0x498   : > { %10197 = vmatmul.mubr.msk.f32.gmra.mrb[4].mxu1 %vm364_vm0, %v12621_v62  ;;  %v10506_v62 = vpack.c.bf16 %v8643_v52, %v8642_v40 }
 0x499   : > { %10199 = vmatprep.mubr.msk.f32.mxu1 %vm364_vm0, %v12625_v13  ;;  %v6798_v13 = vld [vmem:[#allocation2 + $0x39] sm:$0xff] }
 0x49c   : > { %10200 = vmatmul.mubr.msk.f32.gmra.mrb[6].mxu1 %vm364_vm0, %v12629_v60  ;;  %v6799_v60 = vld [vmem:[#allocation2 + $0x49] sm:$0xff] }
 0x49d   : > { %10202 = vmatprep.mubr.msk.f32.mxu1 %vm364_vm0, %v12633_v41  ;;  %v6800_v41 = vld [vmem:[#allocation2 + $0x51] sm:$0xff] }
 0x4a0   : > { %10203 = vmatmul.mubr.msk.f32.gmra.mrb[8].mxu1 %vm364_vm0, %v12637_v44  ;;  %v6801_v44 = vld [vmem:[#allocation2 + $0x61] sm:$0xff] }
 0x4a1   : > { %10205 = vmatprep.mubr.msk.f32.mxu1 %vm364_vm0, %v12641_v45  ;;  %v6802_v45 = vld [vmem:[#allocation2 + $0x69] sm:$0xff] }
 0x4a4   : > { %10206 = vmatmul.mubr.msk.f32.gmra.mrb[10].mxu1 %vm364_vm0, %v12645_v53  ;;  %v6803_v53 = vld [vmem:[#allocation2 + $0x79] sm:$0xff] }
 0x4a5   : > { %10208 = vmatprep.mubr.msk.f32.mxu1 %vm364_vm0, %v12649_v36  ;;  %v6804_v36 = vld [vmem:[#allocation2 + $0x81] sm:$0xff] }
 0x4a8   : > { %10209 = vmatmul.mubr.msk.f32.gmra.mrb[12].mxu1 %vm364_vm0, %v12653_v20  ;;  %v6805_v20 = vld [vmem:[#allocation2 + $0x91] sm:$0xff] }
 0x4a9   : > { %10211 = vmatprep.mubr.msk.f32.mxu1 %vm364_vm0, %v12657_v38  ;;  %v6806_v38 = vld [vmem:[#allocation2 + $0x99] sm:$0xff] }
 0x4ac   : > { %10212 = vmatmul.mubr.msk.f32.gmra.mrb[14].mxu1 %vm364_vm0, %v12661_v15  ;;  %v6807_v15 = vld [vmem:[#allocation2 + $0xa9] sm:$0xff] }
 0x4ad   : > { %10214 = vmatprep.mubr.msk.f32.mxu1 %vm364_vm0, %v12665_v19  ;;  %v6808_v19 = vld [vmem:[#allocation2 + $0xb1] sm:$0xff] }
 0x4b0   : > { %10215 = vmatmul.mubr.msk.f32.gmra.mrb[16].mxu1 %vm364_vm0, %v12669_v23  ;;  %v6809_v23 = vld [vmem:[#allocation2 + $0xc1] sm:$0xff] }
 0x4b1   : > { %10217 = vmatprep.mubr.msk.f32.mxu1 %vm364_vm0, %v12673_v27  ;;  %v6810_v27 = vld [vmem:[#allocation2 + $0xc9] sm:$0xff] }
 0x4b4   : > { %10218 = vmatmul.mubr.msk.f32.gmra.mrb[18].mxu1 %vm364_vm0, %v12677_v28  ;;  %v6811_v28 = vld [vmem:[#allocation2 + $0xd9] sm:$0xff] }
 0x4b5   : > { %10220 = vmatprep.mubr.msk.f32.mxu1 %vm364_vm0, %v12681_v31  ;;  %v6812_v31 = vld [vmem:[#allocation2 + $0xe1] sm:$0xff] }
 0x4b8   : > { %10221 = vmatmul.mubr.msk.f32.gmra.mrb[20].mxu1 %vm364_vm0, %v12685_v46  ;;  %v6813_v46 = vld [vmem:[#allocation2 + $0xf1] sm:$0xff] }
 0x4b9   : > { %10223 = vmatprep.mubr.msk.f32.mxu1 %vm364_vm0, %v12689_v5  ;;  %v6814_v5 = vld [vmem:[#allocation2 + $0xf9] sm:$0xff] }
 0x4bc   : > { %10224 = vmatmul.mubr.msk.f32.gmra.mrb[22].mxu1 %vm364_vm0, %v12693_v49  ;;  %v6815_v49 = vld [vmem:[#allocation2 + $0x109] sm:$0xff] }
 0x4bd   : > { %10226 = vmatprep.mubr.msk.f32.mxu1 %vm364_vm0, %v12697_v54  ;;  %v6816_v54 = vld [vmem:[#allocation2 + $0x111] sm:$0xff] }
 0x4c0   : > { %10227 = vmatmul.mubr.msk.f32.gmra.mrb[24].mxu1 %vm364_vm0, %v12701_v11  ;;  %v6817_v11 = vld [vmem:[#allocation2 + $0x121] sm:$0xff] }
 0x4c1   : > { %10229 = vmatprep.mubr.msk.f32.mxu1 %vm364_vm0, %v12705_v61  ;;  %v6818_v61 = vld [vmem:[#allocation2 + $0x129] sm:$0xff] }
 0x4c4   : > { %10230 = vmatmul.mubr.msk.f32.gmra.mrb[26].mxu1 %vm364_vm0, %v12709_v1  ;;  %v6819_v1 = vld [vmem:[#allocation2 + $0x139] sm:$0xff] }
 0x4c5   : > { %10232 = vmatprep.mubr.msk.f32.mxu1 %vm364_vm0, %v12924_v56  ;;  %v6820_v56 = vld [vmem:[#allocation2 + $0x141] sm:$0xff] }
 0x4c8   : > { %10233 = vmatmul.mubr.msk.f32.gmra.mrb[28].mxu1 %vm364_vm0, %v12928_v0  ;;  %v6821_v0 = vld [vmem:[#allocation2 + $0x151] sm:$0xff] }
 0x4c9   : > { %10235 = vmatprep.mubr.msk.f32.mxu1 %vm364_vm0, %v6437_v35 }
 0x4cc   : > { %10236 = vmatmul.mubr.msk.f32.gmra.mrb[30].mxu1 %vm364_vm0, %v6438_v57 }
 0x4cd   : > { %10246 = vmatprep.mubr.msk.f32.mxu1 %vm364_vm0, %v6797_v21 }
 0x4d0   : > { %10247 = vmatmul.mubr.msk.f32.vlgmr.msra.gmra.mrb[0].mxu1 %vm364_vm0, %v6798_v13 }
 0x4d1   : > { %10505 = vmatpush3.bf16.msra.mxu1 %v10502_v22  ;;  %10249 = vmatprep.mubr.msk.f32.mxu1 %vm364_vm0, %v6799_v60 }
 0x4d2   : > { %10507 = vmatprep.subr.bf16.mxu1 %v10506_v62 }
 0x4d4   : > { %10250 = vmatmul.mubr.msk.f32.gmra.mrb[2].mxu1 %vm364_vm0, %v6800_v41 }
 0x4d5   : > { %10252 = vmatprep.mubr.msk.f32.mxu1 %vm364_vm0, %v6801_v44  ;;  %10509 = vmatpush3.bf16.msra.mxu1 %v10506_v62 }
 0x4d8   : > { %10253 = vmatmul.mubr.msk.f32.gmra.mrb[4].mxu1 %vm364_vm0, %v6802_v45 }
 0x4d9   : > { %10255 = vmatprep.mubr.msk.f32.mxu1 %vm364_vm0, %v6803_v53 }
 0x4dc   : > { %10256 = vmatmul.mubr.msk.f32.gmra.mrb[6].mxu1 %vm364_vm0, %v6804_v36 }
 0x4dd   : > { %10258 = vmatprep.mubr.msk.f32.mxu1 %vm364_vm0, %v6805_v20 }
 0x4e0   : > { %10259 = vmatmul.mubr.msk.f32.gmra.mrb[8].mxu1 %vm364_vm0, %v6806_v38 }
 0x4e1   : > { %10261 = vmatprep.mubr.msk.f32.mxu1 %vm364_vm0, %v6807_v15 }
 0x4e4   : > { %10262 = vmatmul.mubr.msk.f32.gmra.mrb[10].mxu1 %vm364_vm0, %v6808_v19 }
 0x4e5   : > { %10264 = vmatprep.mubr.msk.f32.mxu1 %vm364_vm0, %v6809_v23 }
 0x4e8   : > { %10265 = vmatmul.mubr.msk.f32.gmra.mrb[12].mxu1 %vm364_vm0, %v6810_v27 }
 0x4e9   : > { %10267 = vmatprep.mubr.msk.f32.mxu1 %vm364_vm0, %v6811_v28 }
 0x4ec   : > { %10268 = vmatmul.mubr.msk.f32.gmra.mrb[14].mxu1 %vm364_vm0, %v6812_v31 }
 0x4ed   : > { %10270 = vmatprep.mubr.msk.f32.mxu1 %vm364_vm0, %v6813_v46 }
 0x4f0   : > { %10271 = vmatmul.mubr.msk.f32.gmra.mrb[16].mxu1 %vm364_vm0, %v6814_v5 }
 0x4f1   : > { %10273 = vmatprep.mubr.msk.f32.mxu1 %vm364_vm0, %v6815_v49 }
 0x4f4   : > { %10274 = vmatmul.mubr.msk.f32.gmra.mrb[18].mxu1 %vm364_vm0, %v6816_v54 }
 0x4f5   : > { %10276 = vmatprep.mubr.msk.f32.mxu1 %vm364_vm0, %v6817_v11 }
 0x4f8   : > { %10277 = vmatmul.mubr.msk.f32.gmra.mrb[20].mxu1 %vm364_vm0, %v6818_v61 }
 0x4f9   : > { %10279 = vmatprep.mubr.msk.f32.mxu1 %vm364_vm0, %v6819_v1 }
 0x4fc   : > { %10280 = vmatmul.mubr.msk.f32.gmra.mrb[22].mxu1 %vm364_vm0, %v6820_v56 }
 0x4fd   : > { %10282 = vmatprep.mubr.msk.f32.mxu1 %vm364_vm0, %v6821_v0 }
 0x500   : > { %10283 = vmatmul.mubr.msk.f32.gmra.mrb[24].mxu1 %vm364_vm0, %v6822_v9 }
 0x501   : > { %10285 = vmatprep.mubr.msk.f32.mxu1 %vm364_vm0, %v6823_v17 }
 0x504   : > { %10286 = vmatmul.mubr.msk.f32.gmra.mrb[26].mxu1 %vm364_vm0, %v6824_v51 }
 0x505   : > { %10288 = vmatprep.mubr.msk.f32.mxu1 %vm364_vm0, %v13004_v29  ;;  %v13982_v29 = vld [vmem:[#allocation70_spill] sm:$0xff] }
 0x508   : > { %10289 = vmatmul.mubr.msk.f32.gmra.mrb[28].mxu1 %vm364_vm0, %v13008_v33  ;;  %v13983_v33 = vld [vmem:[#allocation36_spill] sm:$0xff] }
 0x509   : > { %10291 = vmatprep.mubr.msk.f32.mxu1 %vm364_vm0, %v6827_v39 }
 0x50c   : > { %10292 = vmatmul.mubr.msk.f32.gmra.mrb[30].mxu1 %vm364_vm0, %v6828_v63 }
 0x50d   : > { %10302 = vmatprep.mubr.msk.f32.mxu1 %vm364_vm0, %v13952_v42  ;;  %v13984_v42 = vld [vmem:[#allocation37_spill] sm:$0xff] }
 0x510   : > { %10303 = vmatmul.mubr.msk.f32.vlgmr.msra.gmra.mrb[0].mxu1 %vm364_vm0, %v13953_v24  ;;  %v13985_v24 = vld [vmem:[#allocation38_spill] sm:$0xff] }
 0x511   : > { %10305 = vmatprep.mubr.msk.f32.mxu1 %vm364_vm0, %v13954_v32  ;;  %v13986_v32 = vld [vmem:[#allocation39_spill] sm:$0xff] }
 0x514   : > { %10306 = vmatmul.mubr.msk.f32.gmra.mrb[2].mxu1 %vm364_vm0, %v13955_v43  ;;  %v7217_v43 = vld [vmem:[#allocation2 + $0x19a] sm:$0xff] }
 0x515   : > { %10308 = vmatprep.mubr.msk.f32.mxu1 %vm364_vm0, %v13956_v3  ;;  %v7218_v3 = vld [vmem:[#allocation2 + $0x1a2] sm:$0xff] }
 0x518   : > { %10309 = vmatmul.mubr.msk.f32.gmra.mrb[4].mxu1 %vm364_vm0, %v13957_v55  ;;  %v7687_v55 = vld [vmem:[%s13645_s5] sm:$0xff] }
 0x519   : > { %10311 = vmatprep.mubr.msk.f32.mxu1 %vm364_vm0, %v13958_v12  ;;  %v7688_v12 = vld [vmem:[%s13645_s5 + $0x8] sm:$0xff] }
 0x51c   : > { %10312 = vmatmul.mubr.msk.f32.gmra.mrb[6].mxu1 %vm364_vm0, %v13959_v37  ;;  %v11140_v37 = vmov 0.0|0.0  }
 0x51d   : > { %10314 = vmatprep.mubr.msk.f32.mxu1 %vm364_vm0, %v13960_v16  ;;  %10510 = vmatprep.subr.bf16.mxu0 %v11140_v37  ;;  %v10511_v16 = vpack.c.bf16 %v7688_v12, %v7687_v55 }
 0x51f   : > { %10512 = vmatpush3.bf16.msra.mxu0 %v10511_v16 }
 0x520   : > { %10315 = vmatmul.mubr.msk.f32.gmra.mrb[8].mxu1 %vm364_vm0, %v13961_v10  ;;  %10513 = vmatprep.subr.bf16.mxu0 %v11140_v37  ;;  %v7689_v10 = vld [vmem:[%s13645_s5 + $0x10] sm:$0xff] }
 0x521   : > { %10317 = vmatprep.mubr.msk.f32.mxu1 %vm364_vm0, %v13962_v25  ;;  %v7690_v25 = vld [vmem:[%s13645_s5 + $0x18] sm:$0xff] }
 0x524   : > { %10318 = vmatmul.mubr.msk.f32.gmra.mrb[10].mxu1 %vm364_vm0, %v13963_v26  ;;  %v10514_v26 = vpack.c.bf16 %v7690_v25, %v7689_v10 }
 0x525   : > { %10320 = vmatprep.mubr.msk.f32.mxu1 %vm364_vm0, %v13964_v30  ;;  %v11142_v30 = vmov 0.0  }
 0x526   : > { %10515 = vmatpush3.bf16.msra.mxu0 %v10514_v26  ;;  %10358 = vmatprep.mubr.msk.f32.mxu0 %vm11141_vm2, %v11142_v30 }
 0x527   : > { %10361 = vmatprep.subr.mxu1 %v11142_v30 }
 0x528   : > { %10321 = vmatmul.mubr.msk.f32.gmra.mrb[12].mxu1 %vm364_vm0, %v13965_v8  ;;  %v7766_v8 = vld [vmem:[%s13647_s7] sm:$0x3] }
 0x529   : > { %10323 = vmatprep.mubr.msk.f32.mxu1 %vm364_vm0, %v13966_v34  ;;  %10362 = vmatpush3.msk.msra.mxu1 %vm7772_vm3, %v7766_v8  ;;  %v13286_v34 = vld [vmem:[%s13644_s4] ss:$0 sm:$0xff] }
 0x52c   : > { %10324 = vmatmul.mubr.msk.f32.gmra.mrb[14].mxu1 %vm364_vm0, %v13967_v6 }
 0x52d   : > { %10326 = vmatprep.mubr.msk.f32.mxu1 %vm364_vm0, %v13968_v59 }
 0x530   : > { %10327 = vmatmul.mubr.msk.f32.gmra.mrb[16].mxu1 %vm364_vm0, %v13969_v48 }
 0x531   : > { %10329 = vmatprep.mubr.msk.f32.mxu1 %vm364_vm0, %v13970_v47 }
 0x534   : > { %10330 = vmatmul.mubr.msk.f32.gmra.mrb[18].mxu1 %vm364_vm0, %v13971_v58 }
 0x535   : > { %10332 = vmatprep.mubr.msk.f32.mxu1 %vm364_vm0, %v13972_v18 }
 0x538   : > { %10333 = vmatmul.mubr.msk.f32.gmra.mrb[20].mxu1 %vm364_vm0, %v13973_v2 }
 0x539   : > { %10335 = vmatprep.mubr.msk.f32.mxu1 %vm364_vm0, %v13974_v4 }
 0x53c   : > { %10336 = vmatmul.mubr.msk.f32.gmra.mrb[22].mxu1 %vm364_vm0, %v13975_v50 }
 0x53d   : > { %10338 = vmatprep.mubr.msk.f32.mxu1 %vm364_vm0, %v13976_v14 }
 0x540   : > { %10339 = vmatmul.mubr.msk.f32.gmra.mrb[24].mxu1 %vm364_vm0, %v13982_v29 }
 0x541   : > { %10341 = vmatprep.mubr.msk.f32.mxu1 %vm364_vm0, %v13983_v33 }
 0x544   : > { %10342 = vmatmul.mubr.msk.f32.gmra.mrb[26].mxu1 %vm364_vm0, %v13984_v42 }
 0x545   : > { %10344 = vmatprep.mubr.msk.f32.mxu1 %vm364_vm0, %v13985_v24 }
 0x548   : > { %10345 = vmatmul.mubr.msk.f32.gmra.mrb[28].mxu1 %vm364_vm0, %v13986_v32 }
 0x549   : > { %10347 = vmatprep.mubr.msk.f32.mxu1 %vm364_vm0, %v7217_v43 }
 0x54c   : > { %10348 = vmatmul.mubr.msk.f32.gmra.mrb[30].mxu1 %vm364_vm0, %v7218_v3 }
 0x54d   : > { %10363 = vmatprep.mubr.msk.f32.mxu1 %vm11141_vm2, %v11142_v30 }
 0x5e3   : > { %v10304_v6 = vpop.f32.mrb[0].mxu1 }
 0x5e4   : > { %v13289_v59 = vadd.f32 %v10304_v6, %v13286_v34  ;;  %v7386_v48 = vpop.f32.mrb[1].mxu1 }
 0x5e5   : > { %v13292_v47 = vadd.f32 %v13286_v34, %v7386_v48 }
 0x5e6   : > { %v7617_v58 = vsel %vm364_vm0, %v13289_v59, 0.0 }
 0x5e7   : > { %v7616_v18 = vsel %vm364_vm0, %v13292_v47, 0.0  ;;  %v10307_v2 = vpop.f32.mrb[2].mxu1 }
 0x5e8   : > { %v7396_v4 = vpop.f32.mrb[3].mxu1  ;;  %v13299_v50 = vadd.f32 %v10307_v2, %v13286_v34  ;;  %v7618_v22 = vadd.f32 %v7617_v58, %v7616_v18 }
 0x5e9   : > { %v13302_v14 = vadd.f32 %v13286_v34, %v7396_v4 }
 0x5ea   : > { %v7621_v52 = vsel %vm364_vm0, %v13299_v50, 0.0 }
 0x5eb   : > { %v7619_v7 = vsel %vm364_vm0, %v13302_v14, 0.0  ;;  %v10310_v35 = vpop.f32.mrb[4].mxu1 }
 0x5ec   : > { %v7620_v57 = vadd.f32 %v7619_v7, %v7618_v22  ;;  %v7406_v40 = vpop.f32.mrb[5].mxu1  ;;  %v13309_v21 = vadd.f32 %v10310_v35, %v13286_v34 }
 0x5ed   : > { %v13312_v62 = vadd.f32 %v13286_v34, %v7406_v40 }
 0x5ee   : > { %v7622_v13 = vadd.f32 %v7621_v52, %v7620_v57  ;;  %v7625_v53 = vsel %vm364_vm0, %v13309_v21, 0.0 }
 0x5ef   : > { %v7623_v60 = vsel %vm364_vm0, %v13312_v62, 0.0  ;;  %v10313_v41 = vpop.f32.mrb[6].mxu1 }
 0x5f0   : > { %v7624_v44 = vadd.f32 %v7623_v60, %v7622_v13  ;;  %v7416_v45 = vpop.f32.mrb[7].mxu1  ;;  %v13319_v36 = vadd.f32 %v10313_v41, %v13286_v34 }
 0x5f1   : > { %v13322_v20 = vadd.f32 %v13286_v34, %v7416_v45 }
 0x5f2   : > { %v7626_v38 = vadd.f32 %v7625_v53, %v7624_v44  ;;  %v7629_v28 = vsel %vm364_vm0, %v13319_v36, 0.0 }
 0x5f3   : > { %v7627_v15 = vsel %vm364_vm0, %v13322_v20, 0.0  ;;  %v10316_v19 = vpop.f32.mrb[8].mxu1 }
 0x5f4   : > { %v7628_v23 = vadd.f32 %v7627_v15, %v7626_v38  ;;  %v7426_v27 = vpop.f32.mrb[9].mxu1  ;;  %v13329_v31 = vadd.f32 %v10316_v19, %v13286_v34 }
 0x5f5   : > { %v13332_v46 = vadd.f32 %v13286_v34, %v7426_v27 }
 0x5f6   : > { %v7630_v5 = vadd.f32 %v7629_v28, %v7628_v23  ;;  %v7633_v1 = vsel %vm364_vm0, %v13329_v31, 0.0 }
 0x5f7   : > { %v7631_v49 = vsel %vm364_vm0, %v13332_v46, 0.0  ;;  %v10319_v54 = vpop.f32.mrb[10].mxu1 }
 0x5f8   : > { %v7632_v11 = vadd.f32 %v7631_v49, %v7630_v5  ;;  %v7436_v61 = vpop.f32.mrb[11].mxu1  ;;  %v13339_v56 = vadd.f32 %v10319_v54, %v13286_v34 }
 0x5f9   : > { %v13342_v0 = vadd.f32 %v13286_v34, %v7436_v61 }
 0x5fa   : > { %v7634_v9 = vadd.f32 %v7633_v1, %v7632_v11  ;;  %v7637_v29 = vsel %vm364_vm0, %v13339_v56, 0.0 }
 0x5fb   : > { %v7635_v17 = vsel %vm364_vm0, %v13342_v0, 0.0  ;;  %v10322_v51 = vpop.f32.mrb[12].mxu1 }
 0x5fc   : > { %v7636_v39 = vadd.f32 %v7635_v17, %v7634_v9  ;;  %v7446_v63 = vpop.f32.mrb[13].mxu1  ;;  %v13349_v33 = vadd.f32 %v10322_v51, %v13286_v34 }
 0x5fd   : > { %v13352_v42 = vadd.f32 %v13286_v34, %v7446_v63 }
 0x5fe   : > { %v7638_v24 = vadd.f32 %v7637_v29, %v7636_v39  ;;  %v7641_v12 = vsel %vm364_vm0, %v13349_v33, 0.0 }
 0x5ff   : > { %v7639_v32 = vsel %vm364_vm0, %v13352_v42, 0.0  ;;  %v10325_v43 = vpop.f32.mrb[14].mxu1 }
 0x600   : > { %v7640_v3 = vadd.f32 %v7639_v32, %v7638_v24  ;;  %v7456_v55 = vpop.f32.mrb[15].mxu1  ;;  %v13359_v37 = vadd.f32 %v10325_v43, %v13286_v34 }
 0x601   : > { %v13362_v16 = vadd.f32 %v13286_v34, %v7456_v55 }
 0x602   : > { %v7642_v10 = vadd.f32 %v7641_v12, %v7640_v3  ;;  %v7645_v6 = vsel %vm364_vm0, %v13359_v37, 0.0 }
 0x603   : > { %v7643_v25 = vsel %vm364_vm0, %v13362_v16, 0.0  ;;  %v10328_v26 = vpop.f32.mrb[16].mxu1 }
 0x604   : > { %v7644_v30 = vadd.f32 %v7643_v25, %v7642_v10  ;;  %v7466_v8 = vpop.f32.mrb[17].mxu1  ;;  %v13369_v48 = vadd.f32 %v10328_v26, %v13286_v34 }
 0x605   : > { %v13372_v58 = vadd.f32 %v13286_v34, %v7466_v8 }
 0x606   : > { %v7646_v18 = vadd.f32 %v7645_v6, %v7644_v30  ;;  %v7649_v35 = vsel %vm364_vm0, %v13369_v48, 0.0 }
 0x607   : > { %v7647_v2 = vsel %vm364_vm0, %v13372_v58, 0.0  ;;  %v10331_v4 = vpop.f32.mrb[18].mxu1 }
 0x608   : > { %v7648_v22 = vadd.f32 %v7647_v2, %v7646_v18  ;;  %v7476_v7 = vpop.f32.mrb[19].mxu1  ;;  %v13379_v57 = vadd.f32 %v10331_v4, %v13286_v34 }
 0x609   : > { %v13382_v40 = vadd.f32 %v13286_v34, %v7476_v7 }
 0x60a   : > { %v7650_v52 = vadd.f32 %v7649_v35, %v7648_v22  ;;  %v7653_v45 = vsel %vm364_vm0, %v13379_v57, 0.0 }
 0x60b   : > { %v7651_v13 = vsel %vm364_vm0, %v13382_v40, 0.0  ;;  %v10334_v60 = vpop.f32.mrb[20].mxu1 }
 0x60c   : > { %v7652_v41 = vadd.f32 %v7651_v13, %v7650_v52  ;;  %v7486_v44 = vpop.f32.mrb[21].mxu1  ;;  %v13389_v53 = vadd.f32 %v10334_v60, %v13286_v34 }
 0x60d   : > { %v13392_v38 = vadd.f32 %v13286_v34, %v7486_v44 }
 0x60e   : > { %v7654_v15 = vadd.f32 %v7653_v45, %v7652_v41  ;;  %v7657_v5 = vsel %vm364_vm0, %v13389_v53, 0.0 }
 0x60f   : > { %v7655_v19 = vsel %vm364_vm0, %v13392_v38, 0.0  ;;  %v10337_v23 = vpop.f32.mrb[22].mxu1 }
 0x610   : > { %v7656_v27 = vadd.f32 %v7655_v19, %v7654_v15  ;;  %v7496_v28 = vpop.f32.mrb[23].mxu1  ;;  %v13399_v49 = vadd.f32 %v10337_v23, %v13286_v34 }
 0x611   : > { %v13402_v54 = vadd.f32 %v13286_v34, %v7496_v28 }
 0x612   : > { %v7658_v11 = vadd.f32 %v7657_v5, %v7656_v27  ;;  %v7661_v51 = vsel %vm364_vm0, %v13399_v49, 0.0 }
 0x613   : > { %v7659_v61 = vsel %vm364_vm0, %v13402_v54, 0.0  ;;  %v10340_v1 = vpop.f32.mrb[24].mxu1 }
 0x614   : > { %v7660_v9 = vadd.f32 %v7659_v61, %v7658_v11  ;;  %v7506_v17 = vpop.f32.mrb[25].mxu1  ;;  %v13409_v39 = vadd.f32 %v10340_v1, %v13286_v34 }
 0x615   : > { %v13412_v63 = vadd.f32 %v13286_v34, %v7506_v17 }
 0x616   : > { %v7662_v29 = vadd.f32 %v7661_v51, %v7660_v9  ;;  %v7665_v55 = vsel %vm364_vm0, %v13409_v39, 0.0 }
 0x617   : > { %v7663_v24 = vsel %vm364_vm0, %v13412_v63, 0.0  ;;  %v10343_v32 = vpop.f32.mrb[26].mxu1 }
 0x618   : > { %v7664_v43 = vadd.f32 %v7663_v24, %v7662_v29  ;;  %v7516_v3 = vpop.f32.mrb[27].mxu1  ;;  %v13419_v12 = vadd.f32 %v10343_v32, %v13286_v34 }
 0x619   : > { %v13422_v10 = vadd.f32 %v13286_v34, %v7516_v3 }
 0x61a   : > { %v7666_v25 = vadd.f32 %v7665_v55, %v7664_v43  ;;  %v7669_v18 = vsel %vm364_vm0, %v13419_v12, 0.0  ;;  %v7767_v43 = vld [vmem:[%s13648_s8] sm:$0x1] }
 0x61b   : > { %v7667_v26 = vsel %vm364_vm0, %v13422_v10, 0.0  ;;  %v10346_v30 = vpop.f32.mrb[28].mxu1 }
 0x61c   : > { %v7668_v8 = vadd.f32 %v7667_v26, %v7666_v25  ;;  %v7526_v6 = vpop.f32.mrb[29].mxu1  ;;  %v13429_v2 = vadd.f32 %v10346_v30, %v13286_v34 }
 0x61d   : > { %v13432_v4 = vadd.f32 %v13286_v34, %v7526_v6 }
 0x61e   : > { %v7670_v22 = vadd.f32 %v7669_v18, %v7668_v8  ;;  %v7673_v60 = vsel %vm364_vm0, %v13429_v2, 0.0  ;;  %v7852_v18 = vlaneseq }
 0x61f   : > { %v7671_v7 = vsel %vm364_vm0, %v13432_v4, 0.0  ;;  %v10349_v35 = vpop.f32.mrb[30].mxu1 }
 0x620   : > { %v7672_v52 = vadd.f32 %v7671_v7, %v7670_v22  ;;  %v7536_v13 = vpop.f32.mrb[31].mxu1  ;;  %v13439_v41 = vadd.f32 %v10349_v35, %v13286_v34  ;;  %v7853_v22 = vshrl.u32 %v7852_v18, 7 }
 0x621   : > { %v13442_v44 = vadd.f32 %v13286_v34, %v7536_v13  ;;  %v7691_v34 = vld [vmem:[%s13646_s6] sm:$0x1] }
 0x622   : > { %v7674_v45 = vadd.f32 %v7673_v60, %v7672_v52  ;;  %v7677_v23 = vsel %vm364_vm0, %v13439_v41, 0.0  ;;  %v7854_v7 = vsub.s32 0, %v7853_v22  ;;  %v14001_v22 = vld [vmem:[#allocation20_spill] sm:$0xff] }
 0x623   : > { %v7675_v15 = vsel %vm364_vm0, %v13442_v44, 0.0 }
 0x624   : > { %v7676_v19 = vadd.f32 %v7675_v15, %v7674_v45 }
 0x626   : > { %v7678_v27 = vadd.f32 %v7677_v23, %v7676_v19 }
 0x628   : > { %v7679_v28 = vrot.slane %v7678_v27, 4 }
 0x62a   : > { %v7680_v5 = vadd.f32 %v7679_v28, %v7678_v27 }
 0x62c   : > { %v7681_v11 = vrot.slane %v7680_v5, 2 }
 0x62e   : > { %v7682_v61 = vadd.f32 %v7681_v11, %v7680_v5 }
 0x630   : > { %v7683_v1 = vrot.slane %v7682_v61, 1 }
 0x632   : > { %v7684_v9 = vadd.f32 %v7683_v1, %v7682_v61  ;;  %v13987_v61 = vld [vmem:[#allocation8_spill] sm:$0xff]  ;;  %v13988_v1 = vld [vmem:[#allocation9_spill] sm:$0xff] }
 0x634   : > { %v7686_v17 = vmul.f32 0.00390625, %v7684_v9  ;;  %v13989_v9 = vld [vmem:[#allocation6_spill] sm:$0xff] }
 0x636   : > { %10359 = vmatmul.mubr.msk.f32.vlgmr.msra.gmra.mrb[32].mxu0 %vm364_vm0, %v7686_v17  ;;  %v13990_v17 = vld [vmem:[#allocation7_spill] sm:$0xff] }
 0x709   : > { %v7761_v51 = vpop.f32.mrb[32].mxu0 }
 0x70a   : > { %v7762_v29 = vadd.f32 %v7761_v51, %v7691_v34  ;;  %v10360_v24 = vpop.f32.mrb[33].mxu0  ;;  %v13991_v34 = vld [vmem:[#allocation10_spill] sm:$0xff]  ;;  %v13992_v51 = vld [vmem:[#allocation11_spill] sm:$0xff] }
 0x70b   : > { %v13994_v24 = vld [vmem:[#allocation13_spill] sm:$0xff] }
 0x70c   : > { %v7765_v32 = vmax.f32 %v7762_v29, 0.0  ;;  %v13993_v29 = vld [vmem:[#allocation12_spill] sm:$0xff] }
 0x70e   : > { %10364 = vmatmul.mubr.msk.f32.vlgmr.msra.gmra.mrb[32].mxu1 %vm7768_vm4, %v7765_v32  ;;  %v13995_v32 = vld [vmem:[#allocation14_spill] sm:$0xff] }
 0x7e1   : > { %v7842_v3 = vpop.f32.mrb[32].mxu1 }
 0x7e2   : > { %v7843_v55 = vadd.f32 %v7842_v3, %v7767_v43  ;;  %v10365_v25 = vpop.f32.mrb[33].mxu1  ;;  %v13996_v43 = vld [vmem:[#allocation15_spill] sm:$0xff]  ;;  %v13997_v3 = vld [vmem:[#allocation16_spill] sm:$0xff] }
 0x7e3   : > { %v13998_v25 = vld [vmem:[#allocation17_spill] sm:$0xff] }
 0x7e4   : > { %v7846_v26 = vsub.f32 0.0, %v7843_v55 }
 0x7e6   : > { %v7847_v30 = vmul.f32 1.442695, %v7846_v26 }
 0x7e8   : > { %11072 = vpow2.f32 %v7847_v30  ;;  %v13999_v30 = vld [vmem:[#allocation18_spill] sm:$0xff] }
 0x7f2   : > { %v11073_v8 = vpop.eup %11072 }
 0x7f3   : > { %v7849_v6 = vadd.f32 1.0, %v11073_v8 }
 0x7f5   : > { %11074 = vrcp.f32 %v7849_v6  ;;  %v14000_v6 = vld [vmem:[#allocation19_spill] sm:$0xff] }
 0x7ff   : > { %v11075_v35 = vpop.eup %11074 }
 0x800   : > { %v7855_v52 = vrot.slane %v11075_v35, %v7854_v7  ;;  %v14002_v35 = vld [vmem:[#allocation21_spill] sm:$0xff] }
 0x802   : > { %v7856_v13 = vmul.f32 %v7855_v52, %v13292_v47  ;;  %v7857_v60 = vmul.f32 %v7855_v52, %v13289_v59  ;;  %v7858_v45 = vmul.f32 %v7855_v52, %v13302_v14  ;;  %v7859_v15 = vmul.f32 %v7855_v52, %v13299_v50 }
 0x803   : > { %v7860_v19 = vmul.f32 %v7855_v52, %v13312_v62  ;;  %v7861_v23 = vmul.f32 %v7855_v52, %v13309_v21  ;;  %v7862_v27 = vmul.f32 %v7855_v52, %v13322_v20  ;;  %v7863_v28 = vmul.f32 %v7855_v52, %v13319_v36 }
 0x804   : > { %v7864_v5 = vmul.f32 %v7855_v52, %v13332_v46  ;;  %v7865_v47 = vmul.f32 %v7855_v52, %v13329_v31  ;;  %v7866_v59 = vmul.f32 %v7855_v52, %v13342_v0  ;;  %v7867_v11 = vmul.f32 %v7855_v52, %v13339_v56 }
 0x805   : > { %v7868_v14 = vmul.f32 %v7855_v52, %v13352_v42  ;;  %v7869_v50 = vmul.f32 %v7855_v52, %v13349_v33  ;;  %v7870_v62 = vmul.f32 %v7855_v52, %v13362_v16  ;;  %v7871_v21 = vmul.f32 %v7855_v52, %v13359_v37 }
 0x806   : > { %v7872_v36 = vmul.f32 %v7855_v52, %v13372_v58  ;;  %v7873_v20 = vmul.f32 %v7855_v52, %v13369_v48  ;;  %v7874_v31 = vmul.f32 %v7855_v52, %v13382_v40  ;;  %v7875_v46 = vmul.f32 %v7855_v52, %v13379_v57 }
 0x807   : > { %v7876_v56 = vmul.f32 %v7855_v52, %v13392_v38  ;;  %v7877_v0 = vmul.f32 %v7855_v52, %v13389_v53  ;;  %v7878_v33 = vmul.f32 %v7855_v52, %v13402_v54  ;;  %v7879_v42 = vmul.f32 %v7855_v52, %v13399_v49 }
 0x808   : > { %v7880_v37 = vmul.f32 %v7855_v52, %v13412_v63  ;;  %v7881_v16 = vmul.f32 %v7855_v52, %v13409_v39  ;;  %v7882_v58 = vmul.f32 %v7855_v52, %v13422_v10  ;;  %v7883_v48 = vmul.f32 %v7855_v52, %v13419_v12 }
 0x809   : > { %v7884_v40 = vmul.f32 %v7855_v52, %v13432_v4  ;;  %v7885_v57 = vmul.f32 %v7855_v52, %v13429_v2  ;;  %v7886_v38 = vmul.f32 %v7855_v52, %v13442_v44  ;;  %v7887_v53 = vmul.f32 %v7855_v52, %v13439_v41 }
 0x80a   : > { %v7888_v54 = vadd.f32 %v7856_v13, %v13987_v61  ;;  %v7889_v49 = vadd.f32 %v7857_v60, %v13988_v1  ;;  %v7890_v63 = vadd.f32 %v7858_v45, %v13989_v9  ;;  %v7891_v39 = vadd.f32 %v7859_v15, %v13990_v17  ;;  %v14003_v13 = vld [vmem:[#allocation22_spill] sm:$0xff]  ;;  %v14004_v45 = vld [vmem:[#allocation23_spill] sm:$0xff] }
 0x80b   : > { %v7892_v10 = vadd.f32 %v7860_v19, %v13991_v34  ;;  %v7893_v12 = vadd.f32 %v7861_v23, %v13992_v51  ;;  %v7894_v4 = vadd.f32 %v7862_v27, %v13993_v29  ;;  %v7895_v2 = vadd.f32 %v7863_v28, %v13994_v24  ;;  %v14005_v19 = vld [vmem:[#allocation24_spill] sm:$0xff]  ;;  %v14006_v27 = vld [vmem:[#allocation25_spill] sm:$0xff]  ;;  %v14017_v61 = vld [vmem:[#allocation42_spill] sm:$0xff] }
 0x80c   : > { %v7896_v44 = vadd.f32 %v7864_v5, %v13995_v32  ;;  %v7897_v41 = vadd.f32 %v7865_v47, %v13996_v43  ;;  %v7898_v55 = vadd.f32 %v7866_v59, %v13997_v3  ;;  %v7899_v26 = vadd.f32 %v7867_v11, %v13998_v25  ;;  %7920 = vst.msk [vmem:[%s13502_s22] sm:$0xff] %vm364_vm0, %v7888_v54  ;;  %v14007_v5 = vld [vmem:[#allocation26_spill] sm:$0xff]  ;;  %v14008_v59 = vld [vmem:[#allocation27_spill] sm:$0xff] }
 0x80d   : > { %7921 = vst.msk [vmem:[%s13502_s22 + $0x8] sm:$0xff] %vm364_vm0, %v7889_v49  ;;  %7922 = vst.msk [vmem:[%s13502_s22 + $0x10] sm:$0xff] %vm364_vm0, %v7890_v63  ;;  %v7900_v8 = vadd.f32 %v7868_v14, %v13999_v30  ;;  %v7901_v18 = vadd.f32 %v7869_v50, %v14000_v6  ;;  %v7902_v7 = vadd.f32 %v7870_v62, %v14001_v22  ;;  %v14009_v14 = vld [vmem:[#allocation28_spill] sm:$0xff]  ;;  %v14010_v62 = vld [vmem:[#allocation29_spill] sm:$0xff] }
 0x80e   : > { %7923 = vst.msk [vmem:[%s13502_s22 + $0x18] sm:$0xff] %vm364_vm0, %v7891_v39  ;;  %v7903_v52 = vadd.f32 %v7871_v21, %v14002_v35  ;;  %7924 = vst.msk [vmem:[%s13502_s22 + $0x20] sm:$0xff] %vm364_vm0, %v7892_v10  ;;  %v7904_v60 = vadd.f32 %v7872_v36, %v14003_v13  ;;  %v7905_v15 = vadd.f32 %v7873_v20, %v14004_v45  ;;  %v14011_v36 = vld [vmem:[#allocation30_spill] sm:$0xff]  ;;  %v14018_v1 = vld [vmem:[#allocation43_spill] sm:$0xff] }
 0x80f   : > { %7925 = vst.msk [vmem:[%s13502_s22 + $0x28] sm:$0xff] %vm364_vm0, %v7893_v12  ;;  %7926 = vst.msk [vmem:[%s13502_s22 + $0x30] sm:$0xff] %vm364_vm0, %v7894_v4  ;;  %v7906_v23 = vadd.f32 %v7874_v31, %v14005_v19  ;;  %v7907_v28 = vadd.f32 %v7875_v46, %v14006_v27  ;;  %v7908_v47 = vadd.f32 %v7876_v56, %v14007_v5  ;;  %v14012_v31 = vld [vmem:[#allocation31_spill] sm:$0xff]  ;;  %v14013_v56 = vld [vmem:[#allocation32_spill] sm:$0xff] }
 0x810   : > { %7927 = vst.msk [vmem:[%s13502_s22 + $0x38] sm:$0xff] %vm364_vm0, %v7895_v2  ;;  %7928 = vst.msk [vmem:[%s13502_s22 + $0x40] sm:$0xff] %vm364_vm0, %v7896_v44  ;;  %v7909_v11 = vadd.f32 %v7877_v0, %v14008_v59  ;;  %v7910_v50 = vadd.f32 %v7878_v33, %v14009_v14  ;;  %v7911_v21 = vadd.f32 %v7879_v42, %v14010_v62  ;;  %v14014_v33 = vld [vmem:[#allocation33_spill] sm:$0xff] }
 0x811   : > { %7929 = vst.msk [vmem:[%s13502_s22 + $0x48] sm:$0xff] %vm364_vm0, %v7897_v41  ;;  %7930 = vst.msk [vmem:[%s13502_s22 + $0x50] sm:$0xff] %vm364_vm0, %v7898_v55  ;;  %v7912_v20 = vadd.f32 %v7880_v37, %v14011_v36  ;;  %v7913_v46 = vadd.f32 %v7881_v16, %v14012_v31  ;;  %v7914_v0 = vadd.f32 %v7882_v58, %v14013_v56  ;;  %v14015_v37 = vld [vmem:[#allocation34_spill] sm:$0xff]  ;;  %v14016_v58 = vld [vmem:[#allocation35_spill] sm:$0xff] }
 0x812   : > { %7931 = vst.msk [vmem:[%s13502_s22 + $0x58] sm:$0xff] %vm364_vm0, %v7899_v26  ;;  %7932 = vst.msk [vmem:[%s13502_s22 + $0x60] sm:$0xff] %vm364_vm0, %v7900_v8  ;;  %v7915_v42 = vadd.f32 %v7883_v48, %v14014_v33  ;;  %v7916_v16 = vadd.f32 %v7884_v40, %v14015_v37  ;;  %v7917_v48 = vadd.f32 %v7885_v57, %v14016_v58 }
 0x813   : > { %7933 = vst.msk [vmem:[%s13502_s22 + $0x68] sm:$0xff] %vm364_vm0, %v7901_v18  ;;  %7934 = vst.msk [vmem:[%s13502_s22 + $0x70] sm:$0xff] %vm364_vm0, %v7902_v7  ;;  %v7918_v54 = vadd.f32 %v7886_v38, %v14017_v61  ;;  %v7919_v49 = vadd.f32 %v7887_v53, %v14018_v1 }
 0x814   : > { %7935 = vst.msk [vmem:[%s13502_s22 + $0x78] sm:$0xff] %vm364_vm0, %v7903_v52  ;;  %7936 = vst.msk [vmem:[%s13502_s22 + $0x80] sm:$0xff] %vm364_vm0, %v7904_v60 }
 0x815   : > { %7937 = vst.msk [vmem:[%s13502_s22 + $0x88] sm:$0xff] %vm364_vm0, %v7905_v15  ;;  %7938 = vst.msk [vmem:[%s13502_s22 + $0x90] sm:$0xff] %vm364_vm0, %v7906_v23 }
 0x816   : > { %7939 = vst.msk [vmem:[%s13502_s22 + $0x98] sm:$0xff] %vm364_vm0, %v7907_v28  ;;  %7940 = vst.msk [vmem:[%s13502_s22 + $0xa0] sm:$0xff] %vm364_vm0, %v7908_v47 }
 0x817   : > { %7941 = vst.msk [vmem:[%s13502_s22 + $0xa8] sm:$0xff] %vm364_vm0, %v7909_v11  ;;  %7942 = vst.msk [vmem:[%s13502_s22 + $0xb0] sm:$0xff] %vm364_vm0, %v7910_v50 }
 0x818   : > { %7943 = vst.msk [vmem:[%s13502_s22 + $0xb8] sm:$0xff] %vm364_vm0, %v7911_v21  ;;  %7944 = vst.msk [vmem:[%s13502_s22 + $0xc0] sm:$0xff] %vm364_vm0, %v7912_v20 }
 0x819   : > { %7945 = vst.msk [vmem:[%s13502_s22 + $0xc8] sm:$0xff] %vm364_vm0, %v7913_v46  ;;  %7946 = vst.msk [vmem:[%s13502_s22 + $0xd0] sm:$0xff] %vm364_vm0, %v7914_v0 }
 0x81a   : > { %7947 = vst.msk [vmem:[%s13502_s22 + $0xd8] sm:$0xff] %vm364_vm0, %v7915_v42  ;;  %7948 = vst.msk [vmem:[%s13502_s22 + $0xe0] sm:$0xff] %vm364_vm0, %v7916_v16 }
 0x81b   : > { %7949 = vst.msk [vmem:[%s13502_s22 + $0xe8] sm:$0xff] %vm364_vm0, %v7917_v48  ;;  %7950 = vst.msk [vmem:[%s13502_s22 + $0xf0] sm:$0xff] %vm364_vm0, %v7918_v54 }
 0x81c   : > { %7951 = vst.msk [vmem:[%s13502_s22 + $0xf8] sm:$0xff] %vm364_vm0, %v7919_v49 }
 0x81d   : > { %11089 = shalt.err (!%p11086_p3)
}
 0x81e   : > { %s11090_s17 = scalar_lea.hbm %s13565_s27, 4096  ;;  %s11094_s23 = scalar_lea.hbm %s13649_s9, 8192 }
 0x81f   : > { %p11091_p4 = scmp.ne.s32.totalorder %s13565_s27, %s11090_s17  ;;  %p11095_p9 = scmp.lt.u32.totalorder %s13565_s27, %s13649_s9 }
 0x820   : > { %p11096_p10 = scmp.lt.u32.totalorder %s11094_s23, %s11090_s17  ;;  %p11098_p12 = scmp.lt.u32.totalorder %s11090_s17, %s13565_s27 }
 0x821   : > { %p11092_p7 = pnand %p11091_p4, %p11234_p5 }
 0x822   : > { %p11097_p11 = por %p11096_p10, %p11095_p9 }
 0x823   : > { %p11093_p8 = pneg %p11092_p7 }
 0x824   : > { %p11099_p13 = por %p11098_p12, %p11097_p11 }
 0x826   : > { %p11100_p0 = pnand %p11099_p13, %p11093_p8 }
 0x828   : > { %11103 = shalt.err (!%p11100_p0)
}
 0x829   : > { %s11144_s29 = smov 128   ;;  %s11145_s14 = smov 8  }
 0x82a   : > { %11028 = dma.vmem_to_hbm [thread:$0]  (%p11234_p5), %s13567_s24, 4096, %s13565_s27, %s13599_s28, %s11144_s29, %s11144_s29, %s11145_s14  }
 0x82b PF: > { %p11034_p1 = scmp.ge.s32.totalorder %s11138_s12, 2  ;;  %s7981_s25 = sand.u32 1, %s11126_s30  }
 0x82c   : > { %s7982_s16 = scalar_lea.sflag [#allocation4], %s7981_s25 }
 0x82d   : > { %p11031_p2 = pnand %p11034_p1, %p11238_p6 }
 0x82f   : > { %11121 = dma.done.wait (!%p11031_p2), %s7982_s16, 4096  }
 0x830   : > { %11123 = vsyncadd (!%p11031_p2), %s7982_s16, 4294963200  ;;  %p19_p3 = scmp.ge.s32.totalorder %s11221_s15, 4   ;;  %s14019_s30 = smov %s11130_s10 }
 0x831   : > { %s14020_s10 = smov %s11134_s11  ;;  %s14021_s11 = smov %s11232_s18 }
 0x832   : > { %s14022_s12 = smov %s11221_s15  ;;  %21 = sbr.rel (!%p19_p3) target bundleno = 3 (0x3), region = 110 }
 0x839   :  { %7987 = vsyncpa [#allocation4], 1 }
 0x83a   :  { %7989 = vsyncpa [#allocation4 + $0x1], 1 }

</bundles_post_ra>
